<compile_context>
chip_gen: v7x
topology: tpu7x:2x2x1
jax: 0.10.0
libtpu: 0.0.40
codegen_flags: <defaults>
</compile_context>

<pallas_src>
import functools

import jax
import jax.numpy as jnp
from jax import lax
from jax.experimental import pallas as pl
from jax.experimental.pallas import tpu as pltpu


def _sepconv_kernel(x_ref, dw1_ref, pw1_ref, sh1_ref, dw2_ref, pw2_ref,
                    sh2_ref, o_ref, xpad_ref, mid_ref, *, K, stride, padding):
    """Fused SepConv for a block of B images (one grid step = B images).

    x_ref    : (B, C_in, H, W)        VMEM  unpadded input images
    dw1_ref  : (C_in * K * K,)        SMEM  depthwise-1 weights, [c, kh, kw] flat
    pw1_ref  : (C_mid * C_in,)        SMEM  pointwise-1 w * bn1 scale, [co, ci] flat
    sh1_ref  : (C_mid,)               SMEM  bn1 shift
    dw2_ref  : (C_mid * K * K,)       SMEM  depthwise-2 weights
    pw2_ref  : (C_out * C_mid,)       SMEM  pointwise-2 w * bn2 scale, [co, ci] flat
    sh2_ref  : (C_out,)               SMEM  bn2 shift
    o_ref    : (B, C_out, Ho2, Wo2)   VMEM  output
    xpad_ref : (C_in, Hp, Wp)         VMEM  zero-padded, ReLU'd input (f32)
    mid_ref  : (C_mid, Hm, Wm)        VMEM  zero-padded block-1 output (f32)
    """
    B, C_in, H, W = x_ref.shape
    C_out, Ho2, Wo2 = o_ref.shape[1], o_ref.shape[2], o_ref.shape[3]
    C_mid, Hm, Wm = mid_ref.shape
    Hp, Wp = xpad_ref.shape[1], xpad_ref.shape[2]
    p = padding
    Ho1, Wo1 = Hm - 2 * p, Wm - 2 * p
    f32 = jnp.float32

    # --- Zero only the padding borders of the two padded scratch buffers.
    # Interiors are fully overwritten for every image below, so this is all
    # the zeroing that is needed.  Do NOT gate this on program_id(0)==0:
    # with dimension_semantics=("parallel",) on v7x each TensorCore has its
    # own scratch and only one core ever runs step 0.
    if p > 0:
        for ref, (nc, h, w) in ((xpad_ref, (C_in, Hp, Wp)),
                                (mid_ref, (C_mid, Hm, Wm))):
            ref[:, pl.ds(0, p), :] = jnp.zeros((nc, p, w), f32)
            ref[:, pl.ds(h - p, p), :] = jnp.zeros((nc, p, w), f32)
            ref[:, :, pl.ds(0, p)] = jnp.zeros((nc, h, p), f32)
            ref[:, :, pl.ds(w - p, p)] = jnp.zeros((nc, h, p), f32)

    def depthwise(tap, w_ref, n_ch):
        """Per-channel KxK tap accumulation (dilation == 1)."""
        planes = []
        for c in range(n_ch):
            base = c * K * K
            acc = None
            for kh in range(K):
                for kw in range(K):
                    t = tap(c, kh, kw) * w_ref[base + kh * K + kw]
                    acc = t if acc is None else acc + t
            planes.append(acc)
        return planes

    def pointwise(planes, w_ref, sh_ref, co, n_src):
        """1x1 conv (BN scale pre-folded into w) + BN shift, as VPU FMAs."""
        base = co * n_src
        y = None
        for ci in range(n_src):
            t = planes[ci] * w_ref[base + ci]
            y = t if y is None else y + t
        return y + sh_ref[co]

    def tap1(c, kh, kw):
        if stride == 1:
            return xpad_ref[c, pl.ds(kh, Ho1), pl.ds(kw, Wo1)]
        # TODO(synk): strided slice on the lane axis; unvalidated (see header).
        return xpad_ref[c, pl.ds(kh, Ho1, stride), pl.ds(kw, Wo1, stride)]

    def tap2(c, kh, kw):
        return mid_ref[c, pl.ds(kh, Ho2), pl.ds(kw, Wo2)]

    for b in range(B):
        # ---- Stage the image: ReLU + f32 cast applied ONCE per element here
        # (instead of once per tap) while copying into the padded interior.
        # ReLU(0) == 0, so ReLU-then-pad == pad-then-ReLU.
        xpad_ref[:, pl.ds(p, H), pl.ds(p, W)] = jnp.maximum(
            x_ref[b].astype(f32), 0.0)

        # ---- Block 1: depthwise(stride) -> 1x1*bn1_scale -> +bn1_shift -> ReLU
        acc1 = depthwise(tap1, dw1_ref, C_in)
        for co in range(C_mid):
            y = pointwise(acc1, pw1_ref, sh1_ref, co, C_in)
            # ReLU opening block 2, stored into the interior of the padded buf.
            mid_ref[co, pl.ds(p, Ho1), pl.ds(p, Wo1)] = jnp.maximum(y, 0.0)

        # ---- Block 2: depthwise(stride=1) -> 1x1*bn2_scale -> +bn2_shift
        acc2 = depthwise(tap2, dw2_ref, C_mid)
        for co in range(C_out):
            y = pointwise(acc2, pw2_ref, sh2_ref, co, C_mid)
            o_ref[b, co] = y.astype(o_ref.dtype)


def _fold_bn_into_pointwise(pw_w, gamma, beta, mean, var, eps):
    """pw_w: (C_out, C_in, 1, 1). Returns (flat scaled weights, shift)."""
    scale = gamma / jnp.sqrt(var + eps)                       # (C_out,)
    pw_scaled = pw_w[:, :, 0, 0] * scale[:, None]             # (C_out, C_in)
    shift = beta - mean * scale                               # (C_out,)
    return pw_scaled.reshape(-1).astype(jnp.float32), shift.astype(jnp.float32)


def _pick_images_per_step(N, max_b=8):
    """Largest divisor of N that still keeps grid >= 2 (amortize per-step
    overhead while feeding both v7x TensorCores)."""
    best = 1
    for b in range(1, min(max_b, max(N // 2, 1)) + 1):
        if N % b == 0:
            best = b
    return best


def sepconv_forward(x_nchw,
                    dw1_w, pw1_w, bn1_gamma, bn1_beta, bn1_mean, bn1_var,
                    dw2_w, pw2_w, bn2_gamma, bn2_beta, bn2_mean, bn2_var,
                    *, kernel_size, stride, padding, eps=1e-5):
    """SepConv.forward on NCHW input (PyTorch convention), inference BN."""
    N, C_in, H, W = x_nchw.shape
    K = kernel_size
    C_mid = pw1_w.shape[0]          # == C_in for SepConv
    C_out = pw2_w.shape[0]

    # DilConv layout guards (dilation=1, depthwise groups == channels, 1x1 pw).
    assert dw1_w.shape == (C_in, 1, K, K), dw1_w.shape
    assert pw1_w.shape == (C_mid, C_in, 1, 1), pw1_w.shape
    assert dw2_w.shape == (C_mid, 1, K, K), dw2_w.shape
    assert pw2_w.shape == (C_out, C_mid, 1, 1), pw2_w.shape

    Hp, Wp = H + 2 * padding, W + 2 * padding
    Ho1 = (Hp - K) // stride + 1
    Wo1 = (Wp - K) // stride + 1
    Hm, Wm = Ho1 + 2 * padding, Wo1 + 2 * padding
    Ho2, Wo2 = Hm - K + 1, Wm - K + 1

    # Flatten weights; fold BN scales into the pointwise weights.
    dw1 = dw1_w[:, 0, :, :].reshape(-1).astype(jnp.float32)   # [c, kh, kw]
    dw2 = dw2_w[:, 0, :, :].reshape(-1).astype(jnp.float32)
    pw1s, sh1 = _fold_bn_into_pointwise(pw1_w.astype(jnp.float32),
                                        bn1_gamma, bn1_beta, bn1_mean, bn1_var, eps)
    pw2s, sh2 = _fold_bn_into_pointwise(pw2_w.astype(jnp.float32),
                                        bn2_gamma, bn2_beta, bn2_mean, bn2_var, eps)

    B = _pick_images_per_step(N)
    assert N % B == 0
    grid = N // B

    kernel = functools.partial(_sepconv_kernel, K=K, stride=stride,
                               padding=padding)

    smem_specs = [pl.BlockSpec(memory_space=pltpu.MemorySpace.SMEM)
                  for _ in range(6)]

    out = pl.pallas_call(
        kernel,
        out_shape=jax.ShapeDtypeStruct((N, C_out, Ho2, Wo2), x_nchw.dtype),
        grid_spec=pltpu.PrefetchScalarGridSpec(
            num_scalar_prefetch=0,
            grid=(grid,),
            in_specs=[
                pl.BlockSpec((B, C_in, H, W), lambda n: (n, 0, 0, 0)),
            ] + smem_specs,
            out_specs=pl.BlockSpec((B, C_out, Ho2, Wo2),
                                   lambda n: (n, 0, 0, 0)),
            scratch_shapes=[
                pltpu.VMEM((C_in, Hp, Wp), jnp.float32),    # padded ReLU'd input
                pltpu.VMEM((C_mid, Hm, Wm), jnp.float32),   # padded block-1 output
            ],
        ),
        compiler_params=pltpu.CompilerParams(
            dimension_semantics=("parallel",),
            vmem_limit_bytes=32 * 1024 * 1024,   # <= 64 MiB -> v7x-safe
        ),
    )(x_nchw, dw1, pw1s, sh1, dw2, pw2s, sh2)
    return out


def sepconv_reference(x, dw1_w, pw1_w, bn1_g, bn1_b, bn1_m, bn1_v,
                      dw2_w, pw2_w, bn2_g, bn2_b, bn2_m, bn2_v,
                      *, kernel_size, stride, padding, eps=1e-5):
    """Pure-JAX reference matching torch semantics (NCHW, OIHW)."""
    dn = ("NCHW", "OIHW", "NCHW")

    def dilconv(y, dw_w, pw_w, g, b, m, v, s):
        C = y.shape[1]
        y = jnp.maximum(y, 0.0)
        y = lax.conv_general_dilated(
            y, dw_w, window_strides=(s, s),
            padding=[(padding, padding), (padding, padding)],
            rhs_dilation=(1, 1), feature_group_count=C, dimension_numbers=dn)
        y = lax.conv_general_dilated(
            y, pw_w, window_strides=(1, 1), padding=[(0, 0), (0, 0)],
            dimension_numbers=dn)
        inv = 1.0 / jnp.sqrt(v + eps)
        scale = (g * inv).reshape(1, -1, 1, 1)
        shift = (b - m * g * inv).reshape(1, -1, 1, 1)
        return y * scale + shift

    y = dilconv(x, dw1_w, pw1_w, bn1_g, bn1_b, bn1_m, bn1_v, stride)
    return dilconv(y, dw2_w, pw2_w, bn2_g, bn2_b, bn2_m, bn2_v, 1)


if __name__ == "__main__":
    # SepConv(C_in=4, C_out=4, kernel_size=3, stride=1, padding=1)
    N, C_in, C_out, H, W = 2, 4, 4, 16, 16
    kernel_size, stride, padding = 3, 1, 1

    key = jax.random.PRNGKey(0)
    keys = jax.random.split(key, 13)

    x = jax.random.normal(keys[0], (N, C_in, H, W), jnp.float32)

    # Block 1: DilConv(C_in, C_in, K, stride, padding, dilation=1)
    dw1_w = 0.3 * jax.random.normal(keys[1], (C_in, 1, kernel_size, kernel_size),
                                    jnp.float32)
    pw1_w = 0.3 * jax.random.normal(keys[2], (C_in, C_in, 1, 1), jnp.float32)
    bn1_gamma = 1.0 + 0.1 * jax.random.normal(keys[3], (C_in,), jnp.float32)
    bn1_beta = 0.1 * jax.random.normal(keys[4], (C_in,), jnp.float32)
    bn1_mean = 0.1 * jax.random.normal(keys[5], (C_in,), jnp.float32)
    bn1_var = jnp.abs(jax.random.normal(keys[6], (C_in,), jnp.float32)) + 0.5

    # Block 2: DilConv(C_in, C_out, K, 1, padding, dilation=1)
    dw2_w = 0.3 * jax.random.normal(keys[7], (C_in, 1, kernel_size, kernel_size),
                                    jnp.float32)
    pw2_w = 0.3 * jax.random.normal(keys[8], (C_out, C_in, 1, 1), jnp.float32)
    bn2_gamma = 1.0 + 0.1 * jax.random.normal(keys[9], (C_out,), jnp.float32)
    bn2_beta = 0.1 * jax.random.normal(keys[10], (C_out,), jnp.float32)
    bn2_mean = 0.1 * jax.random.normal(keys[11], (C_out,), jnp.float32)
    bn2_var = jnp.abs(jax.random.normal(keys[12], (C_out,), jnp.float32)) + 0.5

    out = sepconv_forward(
        x, dw1_w, pw1_w, bn1_gamma, bn1_beta, bn1_mean, bn1_var,
        dw2_w, pw2_w, bn2_gamma, bn2_beta, bn2_mean, bn2_var,
        kernel_size=kernel_size, stride=stride, padding=padding)
    out = jax.block_until_ready(out)

    ref = sepconv_reference(
        x, dw1_w, pw1_w, bn1_gamma, bn1_beta, bn1_mean, bn1_var,
        dw2_w, pw2_w, bn2_gamma, bn2_beta, bn2_mean, bn2_var,
        kernel_size=kernel_size, stride=stride, padding=padding)

    assert out.shape == (N, C_out, H, W), out.shape
    assert jnp.allclose(out, ref, rtol=1e-4, atol=1e-4), (
        float(jnp.max(jnp.abs(out - ref))))
    print("KERNEL_OK")
</pallas_src>

<mosaic_0001>
module attributes {stable_mosaic.version = 11 : i64} {
  func.func @_sepconv_kernel(%arg0: i32, %arg1: memref<1x4x16x16xf32, #tpu.memory_space<vmem>>, %arg2: memref<36xf32, #tpu.memory_space<smem>>, %arg3: memref<16xf32, #tpu.memory_space<smem>>, %arg4: memref<4xf32, #tpu.memory_space<smem>>, %arg5: memref<36xf32, #tpu.memory_space<smem>>, %arg6: memref<16xf32, #tpu.memory_space<smem>>, %arg7: memref<4xf32, #tpu.memory_space<smem>>, %arg8: memref<1x4x16x16xf32, #tpu.memory_space<vmem>>, %arg9: memref<4x18x18xf32, #tpu.memory_space<vmem>>, %arg10: memref<4x18x18xf32, #tpu.memory_space<vmem>>) attributes {dimension_semantics = [#tpu.dimension_semantics<parallel>], iteration_bounds = array<i64: 2>, scalar_prefetch = 0 : i64, scratch_operands = 2 : i64, tpu.core_type = #tpu.core_type<tc>, window_params = [{transform_indices = @transform_0, window_bounds = array<i64: 1, 4, 16, 16>}, {transform_indices = @transform_1, window_bounds = array<i64: 36>}, {transform_indices = @transform_2, window_bounds = array<i64: 16>}, {transform_indices = @transform_3, window_bounds = array<i64: 4>}, {transform_indices = @transform_4, window_bounds = array<i64: 36>}, {transform_indices = @transform_5, window_bounds = array<i64: 16>}, {transform_indices = @transform_6, window_bounds = array<i64: 4>}, {transform_indices = @transform_7, window_bounds = array<i64: 1, 4, 16, 16>}]} {
    %cst = arith.constant 0.000000e+00 : f32
    %0 = vector.broadcast %cst : f32 to vector<4x1x18xf32>
    %c0 = arith.constant 0 : index
    %c0_0 = arith.constant 0 : index
    %c0_1 = arith.constant 0 : index
    %1 = vector.load %arg9[%c0, %c0_0, %c0_1] : memref<4x18x18xf32, #tpu.memory_space<vmem>>, vector<4x1x18xf32>
    tpu.vector_store %arg9[%c0, %c0_0, %c0_1], %0 {strides = array<i32>} : memref<4x18x18xf32, #tpu.memory_space<vmem>>, vector<4x1x18xf32>,
    %cst_2 = arith.constant 0.000000e+00 : f32
    %2 = vector.broadcast %cst_2 : f32 to vector<4x1x18xf32>
    %c0_3 = arith.constant 0 : index
    %c17 = arith.constant 17 : index
    %c0_4 = arith.constant 0 : index
    %3 = vector.load %arg9[%c0_3, %c17, %c0_4] : memref<4x18x18xf32, #tpu.memory_space<vmem>>, vector<4x1x18xf32>
    tpu.vector_store %arg9[%c0_3, %c17, %c0_4], %2 {strides = array<i32>} : memref<4x18x18xf32, #tpu.memory_space<vmem>>, vector<4x1x18xf32>,
    %cst_5 = arith.constant 0.000000e+00 : f32
    %4 = vector.broadcast %cst_5 : f32 to vector<4x18x1xf32>
    %c0_6 = arith.constant 0 : index
    %c0_7 = arith.constant 0 : index
    %c0_8 = arith.constant 0 : index
    %5 = vector.load %arg9[%c0_6, %c0_7, %c0_8] : memref<4x18x18xf32, #tpu.memory_space<vmem>>, vector<4x18x1xf32>
    tpu.vector_store %arg9[%c0_6, %c0_7, %c0_8], %4 {strides = array<i32>} : memref<4x18x18xf32, #tpu.memory_space<vmem>>, vector<4x18x1xf32>,
    %cst_9 = arith.constant 0.000000e+00 : f32
    %6 = vector.broadcast %cst_9 : f32 to vector<4x18x1xf32>
    %c0_10 = arith.constant 0 : index
    %c0_11 = arith.constant 0 : index
    %c17_12 = arith.constant 17 : index
    %7 = vector.load %arg9[%c0_10, %c0_11, %c17_12] : memref<4x18x18xf32, #tpu.memory_space<vmem>>, vector<4x18x1xf32>
    tpu.vector_store %arg9[%c0_10, %c0_11, %c17_12], %6 {strides = array<i32>} : memref<4x18x18xf32, #tpu.memory_space<vmem>>, vector<4x18x1xf32>,
    %cst_13 = arith.constant 0.000000e+00 : f32
    %8 = vector.broadcast %cst_13 : f32 to vector<4x1x18xf32>
    %c0_14 = arith.constant 0 : index
    %c0_15 = arith.constant 0 : index
    %c0_16 = arith.constant 0 : index
    %9 = vector.load %arg10[%c0_14, %c0_15, %c0_16] : memref<4x18x18xf32, #tpu.memory_space<vmem>>, vector<4x1x18xf32>
    tpu.vector_store %arg10[%c0_14, %c0_15, %c0_16], %8 {strides = array<i32>} : memref<4x18x18xf32, #tpu.memory_space<vmem>>, vector<4x1x18xf32>,
    %cst_17 = arith.constant 0.000000e+00 : f32
    %10 = vector.broadcast %cst_17 : f32 to vector<4x1x18xf32>
    %c0_18 = arith.constant 0 : index
    %c17_19 = arith.constant 17 : index
    %c0_20 = arith.constant 0 : index
    %11 = vector.load %arg10[%c0_18, %c17_19, %c0_20] : memref<4x18x18xf32, #tpu.memory_space<vmem>>, vector<4x1x18xf32>
    tpu.vector_store %arg10[%c0_18, %c17_19, %c0_20], %10 {strides = array<i32>} : memref<4x18x18xf32, #tpu.memory_space<vmem>>, vector<4x1x18xf32>,
    %cst_21 = arith.constant 0.000000e+00 : f32
    %12 = vector.broadcast %cst_21 : f32 to vector<4x18x1xf32>
    %c0_22 = arith.constant 0 : index
    %c0_23 = arith.constant 0 : index
    %c0_24 = arith.constant 0 : index
    %13 = vector.load %arg10[%c0_22, %c0_23, %c0_24] : memref<4x18x18xf32, #tpu.memory_space<vmem>>, vector<4x18x1xf32>
    tpu.vector_store %arg10[%c0_22, %c0_23, %c0_24], %12 {strides = array<i32>} : memref<4x18x18xf32, #tpu.memory_space<vmem>>, vector<4x18x1xf32>,
    %cst_25 = arith.constant 0.000000e+00 : f32
    %14 = vector.broadcast %cst_25 : f32 to vector<4x18x1xf32>
    %c0_26 = arith.constant 0 : index
    %c0_27 = arith.constant 0 : index
    %c17_28 = arith.constant 17 : index
    %15 = vector.load %arg10[%c0_26, %c0_27, %c17_28] : memref<4x18x18xf32, #tpu.memory_space<vmem>>, vector<4x18x1xf32>
    tpu.vector_store %arg10[%c0_26, %c0_27, %c17_28], %14 {strides = array<i32>} : memref<4x18x18xf32, #tpu.memory_space<vmem>>, vector<4x18x1xf32>,
    %c0_29 = arith.constant 0 : index
    %c0_30 = arith.constant 0 : index
    %c0_31 = arith.constant 0 : index
    %c0_32 = arith.constant 0 : index
    %16 = vector.load %arg1[%c0_29, %c0_30, %c0_31, %c0_32] : memref<1x4x16x16xf32, #tpu.memory_space<vmem>>, vector<1x4x16x16xf32>
    %17 = vector.shape_cast %16 : vector<1x4x16x16xf32> to vector<4x16x16xf32>
    %cst_33 = arith.constant 0.000000e+00 : f32
    %18 = vector.broadcast %cst_33 : f32 to vector<4x16x16xf32>
    %19 = arith.maximumf %17, %18 : vector<4x16x16xf32>
    %c0_34 = arith.constant 0 : index
    %c1 = arith.constant 1 : index
    %c1_35 = arith.constant 1 : index
    %20 = vector.load %arg9[%c0_34, %c1, %c1_35] : memref<4x18x18xf32, #tpu.memory_space<vmem>>, vector<4x16x16xf32>
    tpu.vector_store %arg9[%c0_34, %c1, %c1_35], %19 {strides = array<i32>} : memref<4x18x18xf32, #tpu.memory_space<vmem>>, vector<4x16x16xf32>,
    %c0_36 = arith.constant 0 : index
    %c0_37 = arith.constant 0 : index
    %c0_38 = arith.constant 0 : index
    %21 = vector.load %arg9[%c0_36, %c0_37, %c0_38] : memref<4x18x18xf32, #tpu.memory_space<vmem>>, vector<1x16x16xf32>
    %22 = vector.shape_cast %21 : vector<1x16x16xf32> to vector<16x16xf32>
    %c0_39 = arith.constant 0 : index
    %23 = memref.load %arg2[%c0_39] : memref<36xf32, #tpu.memory_space<smem>>
    %24 = vector.broadcast %23 : f32 to vector<16x16xf32>
    %25 = arith.mulf %22, %24 : vector<16x16xf32>
    %c0_40 = arith.constant 0 : index
    %c0_41 = arith.constant 0 : index
    %c1_42 = arith.constant 1 : index
    %26 = vector.load %arg9[%c0_40, %c0_41, %c1_42] : memref<4x18x18xf32, #tpu.memory_space<vmem>>, vector<1x16x16xf32>
    %27 = vector.shape_cast %26 : vector<1x16x16xf32> to vector<16x16xf32>
    %c1_43 = arith.constant 1 : index
    %28 = memref.load %arg2[%c1_43] : memref<36xf32, #tpu.memory_space<smem>>
    %29 = vector.broadcast %28 : f32 to vector<16x16xf32>
    %30 = arith.mulf %27, %29 : vector<16x16xf32>
    %31 = arith.addf %25, %30 : vector<16x16xf32>
    %c0_44 = arith.constant 0 : index
    %c0_45 = arith.constant 0 : index
    %c2 = arith.constant 2 : index
    %32 = vector.load %arg9[%c0_44, %c0_45, %c2] : memref<4x18x18xf32, #tpu.memory_space<vmem>>, vector<1x16x16xf32>
    %33 = vector.shape_cast %32 : vector<1x16x16xf32> to vector<16x16xf32>
    %c2_46 = arith.constant 2 : index
    %34 = memref.load %arg2[%c2_46] : memref<36xf32, #tpu.memory_space<smem>>
    %35 = vector.broadcast %34 : f32 to vector<16x16xf32>
    %36 = arith.mulf %33, %35 : vector<16x16xf32>
    %37 = arith.addf %31, %36 : vector<16x16xf32>
    %c0_47 = arith.constant 0 : index
    %c1_48 = arith.constant 1 : index
    %c0_49 = arith.constant 0 : index
    %38 = vector.load %arg9[%c0_47, %c1_48, %c0_49] : memref<4x18x18xf32, #tpu.memory_space<vmem>>, vector<1x16x16xf32>
    %39 = vector.shape_cast %38 : vector<1x16x16xf32> to vector<16x16xf32>
    %c3 = arith.constant 3 : index
    %40 = memref.load %arg2[%c3] : memref<36xf32, #tpu.memory_space<smem>>
    %41 = vector.broadcast %40 : f32 to vector<16x16xf32>
    %42 = arith.mulf %39, %41 : vector<16x16xf32>
    %43 = arith.addf %37, %42 : vector<16x16xf32>
    %c0_50 = arith.constant 0 : index
    %c1_51 = arith.constant 1 : index
    %c1_52 = arith.constant 1 : index
    %44 = vector.load %arg9[%c0_50, %c1_51, %c1_52] : memref<4x18x18xf32, #tpu.memory_space<vmem>>, vector<1x16x16xf32>
    %45 = vector.shape_cast %44 : vector<1x16x16xf32> to vector<16x16xf32>
    %c4 = arith.constant 4 : index
    %46 = memref.load %arg2[%c4] : memref<36xf32, #tpu.memory_space<smem>>
    %47 = vector.broadcast %46 : f32 to vector<16x16xf32>
    %48 = arith.mulf %45, %47 : vector<16x16xf32>
    %49 = arith.addf %43, %48 : vector<16x16xf32>
    %c0_53 = arith.constant 0 : index
    %c1_54 = arith.constant 1 : index
    %c2_55 = arith.constant 2 : index
    %50 = vector.load %arg9[%c0_53, %c1_54, %c2_55] : memref<4x18x18xf32, #tpu.memory_space<vmem>>, vector<1x16x16xf32>
    %51 = vector.shape_cast %50 : vector<1x16x16xf32> to vector<16x16xf32>
    %c5 = arith.constant 5 : index
    %52 = memref.load %arg2[%c5] : memref<36xf32, #tpu.memory_space<smem>>
    %53 = vector.broadcast %52 : f32 to vector<16x16xf32>
    %54 = arith.mulf %51, %53 : vector<16x16xf32>
    %55 = arith.addf %49, %54 : vector<16x16xf32>
    %c0_56 = arith.constant 0 : index
    %c2_57 = arith.constant 2 : index
    %c0_58 = arith.constant 0 : index
    %56 = vector.load %arg9[%c0_56, %c2_57, %c0_58] : memref<4x18x18xf32, #tpu.memory_space<vmem>>, vector<1x16x16xf32>
    %57 = vector.shape_cast %56 : vector<1x16x16xf32> to vector<16x16xf32>
    %c6 = arith.constant 6 : index
    %58 = memref.load %arg2[%c6] : memref<36xf32, #tpu.memory_space<smem>>
    %59 = vector.broadcast %58 : f32 to vector<16x16xf32>
    %60 = arith.mulf %57, %59 : vector<16x16xf32>
    %61 = arith.addf %55, %60 : vector<16x16xf32>
    %c0_59 = arith.constant 0 : index
    %c2_60 = arith.constant 2 : index
    %c1_61 = arith.constant 1 : index
    %62 = vector.load %arg9[%c0_59, %c2_60, %c1_61] : memref<4x18x18xf32, #tpu.memory_space<vmem>>, vector<1x16x16xf32>
    %63 = vector.shape_cast %62 : vector<1x16x16xf32> to vector<16x16xf32>
    %c7 = arith.constant 7 : index
    %64 = memref.load %arg2[%c7] : memref<36xf32, #tpu.memory_space<smem>>
    %65 = vector.broadcast %64 : f32 to vector<16x16xf32>
    %66 = arith.mulf %63, %65 : vector<16x16xf32>
    %67 = arith.addf %61, %66 : vector<16x16xf32>
    %c0_62 = arith.constant 0 : index
    %c2_63 = arith.constant 2 : index
    %c2_64 = arith.constant 2 : index
    %68 = vector.load %arg9[%c0_62, %c2_63, %c2_64] : memref<4x18x18xf32, #tpu.memory_space<vmem>>, vector<1x16x16xf32>
    %69 = vector.shape_cast %68 : vector<1x16x16xf32> to vector<16x16xf32>
    %c8 = arith.constant 8 : index
    %70 = memref.load %arg2[%c8] : memref<36xf32, #tpu.memory_space<smem>>
    %71 = vector.broadcast %70 : f32 to vector<16x16xf32>
    %72 = arith.mulf %69, %71 : vector<16x16xf32>
    %73 = arith.addf %67, %72 : vector<16x16xf32>
    %c1_65 = arith.constant 1 : index
    %c0_66 = arith.constant 0 : index
    %c0_67 = arith.constant 0 : index
    %74 = vector.load %arg9[%c1_65, %c0_66, %c0_67] : memref<4x18x18xf32, #tpu.memory_space<vmem>>, vector<1x16x16xf32>
    %75 = vector.shape_cast %74 : vector<1x16x16xf32> to vector<16x16xf32>
    %c9 = arith.constant 9 : index
    %76 = memref.load %arg2[%c9] : memref<36xf32, #tpu.memory_space<smem>>
    %77 = vector.broadcast %76 : f32 to vector<16x16xf32>
    %78 = arith.mulf %75, %77 : vector<16x16xf32>
    %c1_68 = arith.constant 1 : index
    %c0_69 = arith.constant 0 : index
    %c1_70 = arith.constant 1 : index
    %79 = vector.load %arg9[%c1_68, %c0_69, %c1_70] : memref<4x18x18xf32, #tpu.memory_space<vmem>>, vector<1x16x16xf32>
    %80 = vector.shape_cast %79 : vector<1x16x16xf32> to vector<16x16xf32>
    %c10 = arith.constant 10 : index
    %81 = memref.load %arg2[%c10] : memref<36xf32, #tpu.memory_space<smem>>
    %82 = vector.broadcast %81 : f32 to vector<16x16xf32>
    %83 = arith.mulf %80, %82 : vector<16x16xf32>
    %84 = arith.addf %78, %83 : vector<16x16xf32>
    %c1_71 = arith.constant 1 : index
    %c0_72 = arith.constant 0 : index
    %c2_73 = arith.constant 2 : index
    %85 = vector.load %arg9[%c1_71, %c0_72, %c2_73] : memref<4x18x18xf32, #tpu.memory_space<vmem>>, vector<1x16x16xf32>
    %86 = vector.shape_cast %85 : vector<1x16x16xf32> to vector<16x16xf32>
    %c11 = arith.constant 11 : index
    %87 = memref.load %arg2[%c11] : memref<36xf32, #tpu.memory_space<smem>>
    %88 = vector.broadcast %87 : f32 to vector<16x16xf32>
    %89 = arith.mulf %86, %88 : vector<16x16xf32>
    %90 = arith.addf %84, %89 : vector<16x16xf32>
    %c1_74 = arith.constant 1 : index
    %c1_75 = arith.constant 1 : index
    %c0_76 = arith.constant 0 : index
    %91 = vector.load %arg9[%c1_74, %c1_75, %c0_76] : memref<4x18x18xf32, #tpu.memory_space<vmem>>, vector<1x16x16xf32>
    %92 = vector.shape_cast %91 : vector<1x16x16xf32> to vector<16x16xf32>
    %c12 = arith.constant 12 : index
    %93 = memref.load %arg2[%c12] : memref<36xf32, #tpu.memory_space<smem>>
    %94 = vector.broadcast %93 : f32 to vector<16x16xf32>
    %95 = arith.mulf %92, %94 : vector<16x16xf32>
    %96 = arith.addf %90, %95 : vector<16x16xf32>
    %c1_77 = arith.constant 1 : index
    %c1_78 = arith.constant 1 : index
    %c1_79 = arith.constant 1 : index
    %97 = vector.load %arg9[%c1_77, %c1_78, %c1_79] : memref<4x18x18xf32, #tpu.memory_space<vmem>>, vector<1x16x16xf32>
    %98 = vector.shape_cast %97 : vector<1x16x16xf32> to vector<16x16xf32>
    %c13 = arith.constant 13 : index
    %99 = memref.load %arg2[%c13] : memref<36xf32, #tpu.memory_space<smem>>
    %100 = vector.broadcast %99 : f32 to vector<16x16xf32>
    %101 = arith.mulf %98, %100 : vector<16x16xf32>
    %102 = arith.addf %96, %101 : vector<16x16xf32>
    %c1_80 = arith.constant 1 : index
    %c1_81 = arith.constant 1 : index
    %c2_82 = arith.constant 2 : index
    %103 = vector.load %arg9[%c1_80, %c1_81, %c2_82] : memref<4x18x18xf32, #tpu.memory_space<vmem>>, vector<1x16x16xf32>
    %104 = vector.shape_cast %103 : vector<1x16x16xf32> to vector<16x16xf32>
    %c14 = arith.constant 14 : index
    %105 = memref.load %arg2[%c14] : memref<36xf32, #tpu.memory_space<smem>>
    %106 = vector.broadcast %105 : f32 to vector<16x16xf32>
    %107 = arith.mulf %104, %106 : vector<16x16xf32>
    %108 = arith.addf %102, %107 : vector<16x16xf32>
    %c1_83 = arith.constant 1 : index
    %c2_84 = arith.constant 2 : index
    %c0_85 = arith.constant 0 : index
    %109 = vector.load %arg9[%c1_83, %c2_84, %c0_85] : memref<4x18x18xf32, #tpu.memory_space<vmem>>, vector<1x16x16xf32>
    %110 = vector.shape_cast %109 : vector<1x16x16xf32> to vector<16x16xf32>
    %c15 = arith.constant 15 : index
    %111 = memref.load %arg2[%c15] : memref<36xf32, #tpu.memory_space<smem>>
    %112 = vector.broadcast %111 : f32 to vector<16x16xf32>
    %113 = arith.mulf %110, %112 : vector<16x16xf32>
    %114 = arith.addf %108, %113 : vector<16x16xf32>
    %c1_86 = arith.constant 1 : index
    %c2_87 = arith.constant 2 : index
    %c1_88 = arith.constant 1 : index
    %115 = vector.load %arg9[%c1_86, %c2_87, %c1_88] : memref<4x18x18xf32, #tpu.memory_space<vmem>>, vector<1x16x16xf32>
    %116 = vector.shape_cast %115 : vector<1x16x16xf32> to vector<16x16xf32>
    %c16 = arith.constant 16 : index
    %117 = memref.load %arg2[%c16] : memref<36xf32, #tpu.memory_space<smem>>
    %118 = vector.broadcast %117 : f32 to vector<16x16xf32>
    %119 = arith.mulf %116, %118 : vector<16x16xf32>
    %120 = arith.addf %114, %119 : vector<16x16xf32>
    %c1_89 = arith.constant 1 : index
    %c2_90 = arith.constant 2 : index
    %c2_91 = arith.constant 2 : index
    %121 = vector.load %arg9[%c1_89, %c2_90, %c2_91] : memref<4x18x18xf32, #tpu.memory_space<vmem>>, vector<1x16x16xf32>
    %122 = vector.shape_cast %121 : vector<1x16x16xf32> to vector<16x16xf32>
    %c17_92 = arith.constant 17 : index
    %123 = memref.load %arg2[%c17_92] : memref<36xf32, #tpu.memory_space<smem>>
    %124 = vector.broadcast %123 : f32 to vector<16x16xf32>
    %125 = arith.mulf %122, %124 : vector<16x16xf32>
    %126 = arith.addf %120, %125 : vector<16x16xf32>
    %c2_93 = arith.constant 2 : index
    %c0_94 = arith.constant 0 : index
    %c0_95 = arith.constant 0 : index
    %127 = vector.load %arg9[%c2_93, %c0_94, %c0_95] : memref<4x18x18xf32, #tpu.memory_space<vmem>>, vector<1x16x16xf32>
    %128 = vector.shape_cast %127 : vector<1x16x16xf32> to vector<16x16xf32>
    %c18 = arith.constant 18 : index
    %129 = memref.load %arg2[%c18] : memref<36xf32, #tpu.memory_space<smem>>
    %130 = vector.broadcast %129 : f32 to vector<16x16xf32>
    %131 = arith.mulf %128, %130 : vector<16x16xf32>
    %c2_96 = arith.constant 2 : index
    %c0_97 = arith.constant 0 : index
    %c1_98 = arith.constant 1 : index
    %132 = vector.load %arg9[%c2_96, %c0_97, %c1_98] : memref<4x18x18xf32, #tpu.memory_space<vmem>>, vector<1x16x16xf32>
    %133 = vector.shape_cast %132 : vector<1x16x16xf32> to vector<16x16xf32>
    %c19 = arith.constant 19 : index
    %134 = memref.load %arg2[%c19] : memref<36xf32, #tpu.memory_space<smem>>
    %135 = vector.broadcast %134 : f32 to vector<16x16xf32>
    %136 = arith.mulf %133, %135 : vector<16x16xf32>
    %137 = arith.addf %131, %136 : vector<16x16xf32>
    %c2_99 = arith.constant 2 : index
    %c0_100 = arith.constant 0 : index
    %c2_101 = arith.constant 2 : index
    %138 = vector.load %arg9[%c2_99, %c0_100, %c2_101] : memref<4x18x18xf32, #tpu.memory_space<vmem>>, vector<1x16x16xf32>
    %139 = vector.shape_cast %138 : vector<1x16x16xf32> to vector<16x16xf32>
    %c20 = arith.constant 20 : index
    %140 = memref.load %arg2[%c20] : memref<36xf32, #tpu.memory_space<smem>>
    %141 = vector.broadcast %140 : f32 to vector<16x16xf32>
    %142 = arith.mulf %139, %141 : vector<16x16xf32>
    %143 = arith.addf %137, %142 : vector<16x16xf32>
    %c2_102 = arith.constant 2 : index
    %c1_103 = arith.constant 1 : index
    %c0_104 = arith.constant 0 : index
    %144 = vector.load %arg9[%c2_102, %c1_103, %c0_104] : memref<4x18x18xf32, #tpu.memory_space<vmem>>, vector<1x16x16xf32>
    %145 = vector.shape_cast %144 : vector<1x16x16xf32> to vector<16x16xf32>
    %c21 = arith.constant 21 : index
    %146 = memref.load %arg2[%c21] : memref<36xf32, #tpu.memory_space<smem>>
    %147 = vector.broadcast %146 : f32 to vector<16x16xf32>
    %148 = arith.mulf %145, %147 : vector<16x16xf32>
    %149 = arith.addf %143, %148 : vector<16x16xf32>
    %c2_105 = arith.constant 2 : index
    %c1_106 = arith.constant 1 : index
    %c1_107 = arith.constant 1 : index
    %150 = vector.load %arg9[%c2_105, %c1_106, %c1_107] : memref<4x18x18xf32, #tpu.memory_space<vmem>>, vector<1x16x16xf32>
    %151 = vector.shape_cast %150 : vector<1x16x16xf32> to vector<16x16xf32>
    %c22 = arith.constant 22 : index
    %152 = memref.load %arg2[%c22] : memref<36xf32, #tpu.memory_space<smem>>
    %153 = vector.broadcast %152 : f32 to vector<16x16xf32>
    %154 = arith.mulf %151, %153 : vector<16x16xf32>
    %155 = arith.addf %149, %154 : vector<16x16xf32>
    %c2_108 = arith.constant 2 : index
    %c1_109 = arith.constant 1 : index
    %c2_110 = arith.constant 2 : index
    %156 = vector.load %arg9[%c2_108, %c1_109, %c2_110] : memref<4x18x18xf32, #tpu.memory_space<vmem>>, vector<1x16x16xf32>
    %157 = vector.shape_cast %156 : vector<1x16x16xf32> to vector<16x16xf32>
    %c23 = arith.constant 23 : index
    %158 = memref.load %arg2[%c23] : memref<36xf32, #tpu.memory_space<smem>>
    %159 = vector.broadcast %158 : f32 to vector<16x16xf32>
    %160 = arith.mulf %157, %159 : vector<16x16xf32>
    %161 = arith.addf %155, %160 : vector<16x16xf32>
    %c2_111 = arith.constant 2 : index
    %c2_112 = arith.constant 2 : index
    %c0_113 = arith.constant 0 : index
    %162 = vector.load %arg9[%c2_111, %c2_112, %c0_113] : memref<4x18x18xf32, #tpu.memory_space<vmem>>, vector<1x16x16xf32>
    %163 = vector.shape_cast %162 : vector<1x16x16xf32> to vector<16x16xf32>
    %c24 = arith.constant 24 : index
    %164 = memref.load %arg2[%c24] : memref<36xf32, #tpu.memory_space<smem>>
    %165 = vector.broadcast %164 : f32 to vector<16x16xf32>
    %166 = arith.mulf %163, %165 : vector<16x16xf32>
    %167 = arith.addf %161, %166 : vector<16x16xf32>
    %c2_114 = arith.constant 2 : index
    %c2_115 = arith.constant 2 : index
    %c1_116 = arith.constant 1 : index
    %168 = vector.load %arg9[%c2_114, %c2_115, %c1_116] : memref<4x18x18xf32, #tpu.memory_space<vmem>>, vector<1x16x16xf32>
    %169 = vector.shape_cast %168 : vector<1x16x16xf32> to vector<16x16xf32>
    %c25 = arith.constant 25 : index
    %170 = memref.load %arg2[%c25] : memref<36xf32, #tpu.memory_space<smem>>
    %171 = vector.broadcast %170 : f32 to vector<16x16xf32>
    %172 = arith.mulf %169, %171 : vector<16x16xf32>
    %173 = arith.addf %167, %172 : vector<16x16xf32>
    %c2_117 = arith.constant 2 : index
    %c2_118 = arith.constant 2 : index
    %c2_119 = arith.constant 2 : index
    %174 = vector.load %arg9[%c2_117, %c2_118, %c2_119] : memref<4x18x18xf32, #tpu.memory_space<vmem>>, vector<1x16x16xf32>
    %175 = vector.shape_cast %174 : vector<1x16x16xf32> to vector<16x16xf32>
    %c26 = arith.constant 26 : index
    %176 = memref.load %arg2[%c26] : memref<36xf32, #tpu.memory_space<smem>>
    %177 = vector.broadcast %176 : f32 to vector<16x16xf32>
    %178 = arith.mulf %175, %177 : vector<16x16xf32>
    %179 = arith.addf %173, %178 : vector<16x16xf32>
    %c3_120 = arith.constant 3 : index
    %c0_121 = arith.constant 0 : index
    %c0_122 = arith.constant 0 : index
    %180 = vector.load %arg9[%c3_120, %c0_121, %c0_122] : memref<4x18x18xf32, #tpu.memory_space<vmem>>, vector<1x16x16xf32>
    %181 = vector.shape_cast %180 : vector<1x16x16xf32> to vector<16x16xf32>
    %c27 = arith.constant 27 : index
    %182 = memref.load %arg2[%c27] : memref<36xf32, #tpu.memory_space<smem>>
    %183 = vector.broadcast %182 : f32 to vector<16x16xf32>
    %184 = arith.mulf %181, %183 : vector<16x16xf32>
    %c3_123 = arith.constant 3 : index
    %c0_124 = arith.constant 0 : index
    %c1_125 = arith.constant 1 : index
    %185 = vector.load %arg9[%c3_123, %c0_124, %c1_125] : memref<4x18x18xf32, #tpu.memory_space<vmem>>, vector<1x16x16xf32>
    %186 = vector.shape_cast %185 : vector<1x16x16xf32> to vector<16x16xf32>
    %c28 = arith.constant 28 : index
    %187 = memref.load %arg2[%c28] : memref<36xf32, #tpu.memory_space<smem>>
    %188 = vector.broadcast %187 : f32 to vector<16x16xf32>
    %189 = arith.mulf %186, %188 : vector<16x16xf32>
    %190 = arith.addf %184, %189 : vector<16x16xf32>
    %c3_126 = arith.constant 3 : index
    %c0_127 = arith.constant 0 : index
    %c2_128 = arith.constant 2 : index
    %191 = vector.load %arg9[%c3_126, %c0_127, %c2_128] : memref<4x18x18xf32, #tpu.memory_space<vmem>>, vector<1x16x16xf32>
    %192 = vector.shape_cast %191 : vector<1x16x16xf32> to vector<16x16xf32>
    %c29 = arith.constant 29 : index
    %193 = memref.load %arg2[%c29] : memref<36xf32, #tpu.memory_space<smem>>
    %194 = vector.broadcast %193 : f32 to vector<16x16xf32>
    %195 = arith.mulf %192, %194 : vector<16x16xf32>
    %196 = arith.addf %190, %195 : vector<16x16xf32>
    %c3_129 = arith.constant 3 : index
    %c1_130 = arith.constant 1 : index
    %c0_131 = arith.constant 0 : index
    %197 = vector.load %arg9[%c3_129, %c1_130, %c0_131] : memref<4x18x18xf32, #tpu.memory_space<vmem>>, vector<1x16x16xf32>
    %198 = vector.shape_cast %197 : vector<1x16x16xf32> to vector<16x16xf32>
    %c30 = arith.constant 30 : index
    %199 = memref.load %arg2[%c30] : memref<36xf32, #tpu.memory_space<smem>>
    %200 = vector.broadcast %199 : f32 to vector<16x16xf32>
    %201 = arith.mulf %198, %200 : vector<16x16xf32>
    %202 = arith.addf %196, %201 : vector<16x16xf32>
    %c3_132 = arith.constant 3 : index
    %c1_133 = arith.constant 1 : index
    %c1_134 = arith.constant 1 : index
    %203 = vector.load %arg9[%c3_132, %c1_133, %c1_134] : memref<4x18x18xf32, #tpu.memory_space<vmem>>, vector<1x16x16xf32>
    %204 = vector.shape_cast %203 : vector<1x16x16xf32> to vector<16x16xf32>
    %c31 = arith.constant 31 : index
    %205 = memref.load %arg2[%c31] : memref<36xf32, #tpu.memory_space<smem>>
    %206 = vector.broadcast %205 : f32 to vector<16x16xf32>
    %207 = arith.mulf %204, %206 : vector<16x16xf32>
    %208 = arith.addf %202, %207 : vector<16x16xf32>
    %c3_135 = arith.constant 3 : index
    %c1_136 = arith.constant 1 : index
    %c2_137 = arith.constant 2 : index
    %209 = vector.load %arg9[%c3_135, %c1_136, %c2_137] : memref<4x18x18xf32, #tpu.memory_space<vmem>>, vector<1x16x16xf32>
    %210 = vector.shape_cast %209 : vector<1x16x16xf32> to vector<16x16xf32>
    %c32 = arith.constant 32 : index
    %211 = memref.load %arg2[%c32] : memref<36xf32, #tpu.memory_space<smem>>
    %212 = vector.broadcast %211 : f32 to vector<16x16xf32>
    %213 = arith.mulf %210, %212 : vector<16x16xf32>
    %214 = arith.addf %208, %213 : vector<16x16xf32>
    %c3_138 = arith.constant 3 : index
    %c2_139 = arith.constant 2 : index
    %c0_140 = arith.constant 0 : index
    %215 = vector.load %arg9[%c3_138, %c2_139, %c0_140] : memref<4x18x18xf32, #tpu.memory_space<vmem>>, vector<1x16x16xf32>
    %216 = vector.shape_cast %215 : vector<1x16x16xf32> to vector<16x16xf32>
    %c33 = arith.constant 33 : index
    %217 = memref.load %arg2[%c33] : memref<36xf32, #tpu.memory_space<smem>>
    %218 = vector.broadcast %217 : f32 to vector<16x16xf32>
    %219 = arith.mulf %216, %218 : vector<16x16xf32>
    %220 = arith.addf %214, %219 : vector<16x16xf32>
    %c3_141 = arith.constant 3 : index
    %c2_142 = arith.constant 2 : index
    %c1_143 = arith.constant 1 : index
    %221 = vector.load %arg9[%c3_141, %c2_142, %c1_143] : memref<4x18x18xf32, #tpu.memory_space<vmem>>, vector<1x16x16xf32>
    %222 = vector.shape_cast %221 : vector<1x16x16xf32> to vector<16x16xf32>
    %c34 = arith.constant 34 : index
    %223 = memref.load %arg2[%c34] : memref<36xf32, #tpu.memory_space<smem>>
    %224 = vector.broadcast %223 : f32 to vector<16x16xf32>
    %225 = arith.mulf %222, %224 : vector<16x16xf32>
    %226 = arith.addf %220, %225 : vector<16x16xf32>
    %c3_144 = arith.constant 3 : index
    %c2_145 = arith.constant 2 : index
    %c2_146 = arith.constant 2 : index
    %227 = vector.load %arg9[%c3_144, %c2_145, %c2_146] : memref<4x18x18xf32, #tpu.memory_space<vmem>>, vector<1x16x16xf32>
    %228 = vector.shape_cast %227 : vector<1x16x16xf32> to vector<16x16xf32>
    %c35 = arith.constant 35 : index
    %229 = memref.load %arg2[%c35] : memref<36xf32, #tpu.memory_space<smem>>
    %230 = vector.broadcast %229 : f32 to vector<16x16xf32>
    %231 = arith.mulf %228, %230 : vector<16x16xf32>
    %232 = arith.addf %226, %231 : vector<16x16xf32>
    %c0_147 = arith.constant 0 : index
    %233 = memref.load %arg3[%c0_147] : memref<16xf32, #tpu.memory_space<smem>>
    %234 = vector.broadcast %233 : f32 to vector<16x16xf32>
    %235 = arith.mulf %73, %234 : vector<16x16xf32>
    %c1_148 = arith.constant 1 : index
    %236 = memref.load %arg3[%c1_148] : memref<16xf32, #tpu.memory_space<smem>>
    %237 = vector.broadcast %236 : f32 to vector<16x16xf32>
    %238 = arith.mulf %126, %237 : vector<16x16xf32>
    %239 = arith.addf %235, %238 : vector<16x16xf32>
    %c2_149 = arith.constant 2 : index
    %240 = memref.load %arg3[%c2_149] : memref<16xf32, #tpu.memory_space<smem>>
    %241 = vector.broadcast %240 : f32 to vector<16x16xf32>
    %242 = arith.mulf %179, %241 : vector<16x16xf32>
    %243 = arith.addf %239, %242 : vector<16x16xf32>
    %c3_150 = arith.constant 3 : index
    %244 = memref.load %arg3[%c3_150] : memref<16xf32, #tpu.memory_space<smem>>
    %245 = vector.broadcast %244 : f32 to vector<16x16xf32>
    %246 = arith.mulf %232, %245 : vector<16x16xf32>
    %247 = arith.addf %243, %246 : vector<16x16xf32>
    %c0_151 = arith.constant 0 : index
    %248 = memref.load %arg4[%c0_151] : memref<4xf32, #tpu.memory_space<smem>>
    %249 = vector.broadcast %248 : f32 to vector<16x16xf32>
    %250 = arith.addf %247, %249 : vector<16x16xf32>
    %cst_152 = arith.constant 0.000000e+00 : f32
    %251 = vector.broadcast %cst_152 : f32 to vector<16x16xf32>
    %252 = arith.maximumf %250, %251 : vector<16x16xf32>
    %c0_153 = arith.constant 0 : index
    %c1_154 = arith.constant 1 : index
    %c1_155 = arith.constant 1 : index
    %253 = vector.load %arg10[%c0_153, %c1_154, %c1_155] : memref<4x18x18xf32, #tpu.memory_space<vmem>>, vector<1x16x16xf32>
    %254 = vector.shape_cast %253 : vector<1x16x16xf32> to vector<16x16xf32>
    %255 = vector.shape_cast %252 : vector<16x16xf32> to vector<1x16x16xf32>
    tpu.vector_store %arg10[%c0_153, %c1_154, %c1_155], %255 {strides = array<i32>} : memref<4x18x18xf32, #tpu.memory_space<vmem>>, vector<1x16x16xf32>,
    %c4_156 = arith.constant 4 : index
    %256 = memref.load %arg3[%c4_156] : memref<16xf32, #tpu.memory_space<smem>>
    %257 = vector.broadcast %256 : f32 to vector<16x16xf32>
    %258 = arith.mulf %73, %257 : vector<16x16xf32>
    %c5_157 = arith.constant 5 : index
    %259 = memref.load %arg3[%c5_157] : memref<16xf32, #tpu.memory_space<smem>>
    %260 = vector.broadcast %259 : f32 to vector<16x16xf32>
    %261 = arith.mulf %126, %260 : vector<16x16xf32>
    %262 = arith.addf %258, %261 : vector<16x16xf32>
    %c6_158 = arith.constant 6 : index
    %263 = memref.load %arg3[%c6_158] : memref<16xf32, #tpu.memory_space<smem>>
    %264 = vector.broadcast %263 : f32 to vector<16x16xf32>
    %265 = arith.mulf %179, %264 : vector<16x16xf32>
    %266 = arith.addf %262, %265 : vector<16x16xf32>
    %c7_159 = arith.constant 7 : index
    %267 = memref.load %arg3[%c7_159] : memref<16xf32, #tpu.memory_space<smem>>
    %268 = vector.broadcast %267 : f32 to vector<16x16xf32>
    %269 = arith.mulf %232, %268 : vector<16x16xf32>
    %270 = arith.addf %266, %269 : vector<16x16xf32>
    %c1_160 = arith.constant 1 : index
    %271 = memref.load %arg4[%c1_160] : memref<4xf32, #tpu.memory_space<smem>>
    %272 = vector.broadcast %271 : f32 to vector<16x16xf32>
    %273 = arith.addf %270, %272 : vector<16x16xf32>
    %cst_161 = arith.constant 0.000000e+00 : f32
    %274 = vector.broadcast %cst_161 : f32 to vector<16x16xf32>
    %275 = arith.maximumf %273, %274 : vector<16x16xf32>
    %c1_162 = arith.constant 1 : index
    %c1_163 = arith.constant 1 : index
    %c1_164 = arith.constant 1 : index
    %276 = vector.load %arg10[%c1_162, %c1_163, %c1_164] : memref<4x18x18xf32, #tpu.memory_space<vmem>>, vector<1x16x16xf32>
    %277 = vector.shape_cast %276 : vector<1x16x16xf32> to vector<16x16xf32>
    %278 = vector.shape_cast %275 : vector<16x16xf32> to vector<1x16x16xf32>
    tpu.vector_store %arg10[%c1_162, %c1_163, %c1_164], %278 {strides = array<i32>} : memref<4x18x18xf32, #tpu.memory_space<vmem>>, vector<1x16x16xf32>,
    %c8_165 = arith.constant 8 : index
    %279 = memref.load %arg3[%c8_165] : memref<16xf32, #tpu.memory_space<smem>>
    %280 = vector.broadcast %279 : f32 to vector<16x16xf32>
    %281 = arith.mulf %73, %280 : vector<16x16xf32>
    %c9_166 = arith.constant 9 : index
    %282 = memref.load %arg3[%c9_166] : memref<16xf32, #tpu.memory_space<smem>>
    %283 = vector.broadcast %282 : f32 to vector<16x16xf32>
    %284 = arith.mulf %126, %283 : vector<16x16xf32>
    %285 = arith.addf %281, %284 : vector<16x16xf32>
    %c10_167 = arith.constant 10 : index
    %286 = memref.load %arg3[%c10_167] : memref<16xf32, #tpu.memory_space<smem>>
    %287 = vector.broadcast %286 : f32 to vector<16x16xf32>
    %288 = arith.mulf %179, %287 : vector<16x16xf32>
    %289 = arith.addf %285, %288 : vector<16x16xf32>
    %c11_168 = arith.constant 11 : index
    %290 = memref.load %arg3[%c11_168] : memref<16xf32, #tpu.memory_space<smem>>
    %291 = vector.broadcast %290 : f32 to vector<16x16xf32>
    %292 = arith.mulf %232, %291 : vector<16x16xf32>
    %293 = arith.addf %289, %292 : vector<16x16xf32>
    %c2_169 = arith.constant 2 : index
    %294 = memref.load %arg4[%c2_169] : memref<4xf32, #tpu.memory_space<smem>>
    %295 = vector.broadcast %294 : f32 to vector<16x16xf32>
    %296 = arith.addf %293, %295 : vector<16x16xf32>
    %cst_170 = arith.constant 0.000000e+00 : f32
    %297 = vector.broadcast %cst_170 : f32 to vector<16x16xf32>
    %298 = arith.maximumf %296, %297 : vector<16x16xf32>
    %c2_171 = arith.constant 2 : index
    %c1_172 = arith.constant 1 : index
    %c1_173 = arith.constant 1 : index
    %299 = vector.load %arg10[%c2_171, %c1_172, %c1_173] : memref<4x18x18xf32, #tpu.memory_space<vmem>>, vector<1x16x16xf32>
    %300 = vector.shape_cast %299 : vector<1x16x16xf32> to vector<16x16xf32>
    %301 = vector.shape_cast %298 : vector<16x16xf32> to vector<1x16x16xf32>
    tpu.vector_store %arg10[%c2_171, %c1_172, %c1_173], %301 {strides = array<i32>} : memref<4x18x18xf32, #tpu.memory_space<vmem>>, vector<1x16x16xf32>,
    %c12_174 = arith.constant 12 : index
    %302 = memref.load %arg3[%c12_174] : memref<16xf32, #tpu.memory_space<smem>>
    %303 = vector.broadcast %302 : f32 to vector<16x16xf32>
    %304 = arith.mulf %73, %303 : vector<16x16xf32>
    %c13_175 = arith.constant 13 : index
    %305 = memref.load %arg3[%c13_175] : memref<16xf32, #tpu.memory_space<smem>>
    %306 = vector.broadcast %305 : f32 to vector<16x16xf32>
    %307 = arith.mulf %126, %306 : vector<16x16xf32>
    %308 = arith.addf %304, %307 : vector<16x16xf32>
    %c14_176 = arith.constant 14 : index
    %309 = memref.load %arg3[%c14_176] : memref<16xf32, #tpu.memory_space<smem>>
    %310 = vector.broadcast %309 : f32 to vector<16x16xf32>
    %311 = arith.mulf %179, %310 : vector<16x16xf32>
    %312 = arith.addf %308, %311 : vector<16x16xf32>
    %c15_177 = arith.constant 15 : index
    %313 = memref.load %arg3[%c15_177] : memref<16xf32, #tpu.memory_space<smem>>
    %314 = vector.broadcast %313 : f32 to vector<16x16xf32>
    %315 = arith.mulf %232, %314 : vector<16x16xf32>
    %316 = arith.addf %312, %315 : vector<16x16xf32>
    %c3_178 = arith.constant 3 : index
    %317 = memref.load %arg4[%c3_178] : memref<4xf32, #tpu.memory_space<smem>>
    %318 = vector.broadcast %317 : f32 to vector<16x16xf32>
    %319 = arith.addf %316, %318 : vector<16x16xf32>
    %cst_179 = arith.constant 0.000000e+00 : f32
    %320 = vector.broadcast %cst_179 : f32 to vector<16x16xf32>
    %321 = arith.maximumf %319, %320 : vector<16x16xf32>
    %c3_180 = arith.constant 3 : index
    %c1_181 = arith.constant 1 : index
    %c1_182 = arith.constant 1 : index
    %322 = vector.load %arg10[%c3_180, %c1_181, %c1_182] : memref<4x18x18xf32, #tpu.memory_space<vmem>>, vector<1x16x16xf32>
    %323 = vector.shape_cast %322 : vector<1x16x16xf32> to vector<16x16xf32>
    %324 = vector.shape_cast %321 : vector<16x16xf32> to vector<1x16x16xf32>
    tpu.vector_store %arg10[%c3_180, %c1_181, %c1_182], %324 {strides = array<i32>} : memref<4x18x18xf32, #tpu.memory_space<vmem>>, vector<1x16x16xf32>,
    %c0_183 = arith.constant 0 : index
    %c0_184 = arith.constant 0 : index
    %c0_185 = arith.constant 0 : index
    %325 = vector.load %arg10[%c0_183, %c0_184, %c0_185] : memref<4x18x18xf32, #tpu.memory_space<vmem>>, vector<1x16x16xf32>
    %326 = vector.shape_cast %325 : vector<1x16x16xf32> to vector<16x16xf32>
    %c0_186 = arith.constant 0 : index
    %327 = memref.load %arg5[%c0_186] : memref<36xf32, #tpu.memory_space<smem>>
    %328 = vector.broadcast %327 : f32 to vector<16x16xf32>
    %329 = arith.mulf %326, %328 : vector<16x16xf32>
    %c0_187 = arith.constant 0 : index
    %c0_188 = arith.constant 0 : index
    %c1_189 = arith.constant 1 : index
    %330 = vector.load %arg10[%c0_187, %c0_188, %c1_189] : memref<4x18x18xf32, #tpu.memory_space<vmem>>, vector<1x16x16xf32>
    %331 = vector.shape_cast %330 : vector<1x16x16xf32> to vector<16x16xf32>
    %c1_190 = arith.constant 1 : index
    %332 = memref.load %arg5[%c1_190] : memref<36xf32, #tpu.memory_space<smem>>
    %333 = vector.broadcast %332 : f32 to vector<16x16xf32>
    %334 = arith.mulf %331, %333 : vector<16x16xf32>
    %335 = arith.addf %329, %334 : vector<16x16xf32>
    %c0_191 = arith.constant 0 : index
    %c0_192 = arith.constant 0 : index
    %c2_193 = arith.constant 2 : index
    %336 = vector.load %arg10[%c0_191, %c0_192, %c2_193] : memref<4x18x18xf32, #tpu.memory_space<vmem>>, vector<1x16x16xf32>
    %337 = vector.shape_cast %336 : vector<1x16x16xf32> to vector<16x16xf32>
    %c2_194 = arith.constant 2 : index
    %338 = memref.load %arg5[%c2_194] : memref<36xf32, #tpu.memory_space<smem>>
    %339 = vector.broadcast %338 : f32 to vector<16x16xf32>
    %340 = arith.mulf %337, %339 : vector<16x16xf32>
    %341 = arith.addf %335, %340 : vector<16x16xf32>
    %c0_195 = arith.constant 0 : index
    %c1_196 = arith.constant 1 : index
    %c0_197 = arith.constant 0 : index
    %342 = vector.load %arg10[%c0_195, %c1_196, %c0_197] : memref<4x18x18xf32, #tpu.memory_space<vmem>>, vector<1x16x16xf32>
    %343 = vector.shape_cast %342 : vector<1x16x16xf32> to vector<16x16xf32>
    %c3_198 = arith.constant 3 : index
    %344 = memref.load %arg5[%c3_198] : memref<36xf32, #tpu.memory_space<smem>>
    %345 = vector.broadcast %344 : f32 to vector<16x16xf32>
    %346 = arith.mulf %343, %345 : vector<16x16xf32>
    %347 = arith.addf %341, %346 : vector<16x16xf32>
    %c0_199 = arith.constant 0 : index
    %c1_200 = arith.constant 1 : index
    %c1_201 = arith.constant 1 : index
    %348 = vector.load %arg10[%c0_199, %c1_200, %c1_201] : memref<4x18x18xf32, #tpu.memory_space<vmem>>, vector<1x16x16xf32>
    %349 = vector.shape_cast %348 : vector<1x16x16xf32> to vector<16x16xf32>
    %c4_202 = arith.constant 4 : index
    %350 = memref.load %arg5[%c4_202] : memref<36xf32, #tpu.memory_space<smem>>
    %351 = vector.broadcast %350 : f32 to vector<16x16xf32>
    %352 = arith.mulf %349, %351 : vector<16x16xf32>
    %353 = arith.addf %347, %352 : vector<16x16xf32>
    %c0_203 = arith.constant 0 : index
    %c1_204 = arith.constant 1 : index
    %c2_205 = arith.constant 2 : index
    %354 = vector.load %arg10[%c0_203, %c1_204, %c2_205] : memref<4x18x18xf32, #tpu.memory_space<vmem>>, vector<1x16x16xf32>
    %355 = vector.shape_cast %354 : vector<1x16x16xf32> to vector<16x16xf32>
    %c5_206 = arith.constant 5 : index
    %356 = memref.load %arg5[%c5_206] : memref<36xf32, #tpu.memory_space<smem>>
    %357 = vector.broadcast %356 : f32 to vector<16x16xf32>
    %358 = arith.mulf %355, %357 : vector<16x16xf32>
    %359 = arith.addf %353, %358 : vector<16x16xf32>
    %c0_207 = arith.constant 0 : index
    %c2_208 = arith.constant 2 : index
    %c0_209 = arith.constant 0 : index
    %360 = vector.load %arg10[%c0_207, %c2_208, %c0_209] : memref<4x18x18xf32, #tpu.memory_space<vmem>>, vector<1x16x16xf32>
    %361 = vector.shape_cast %360 : vector<1x16x16xf32> to vector<16x16xf32>
    %c6_210 = arith.constant 6 : index
    %362 = memref.load %arg5[%c6_210] : memref<36xf32, #tpu.memory_space<smem>>
    %363 = vector.broadcast %362 : f32 to vector<16x16xf32>
    %364 = arith.mulf %361, %363 : vector<16x16xf32>
    %365 = arith.addf %359, %364 : vector<16x16xf32>
    %c0_211 = arith.constant 0 : index
    %c2_212 = arith.constant 2 : index
    %c1_213 = arith.constant 1 : index
    %366 = vector.load %arg10[%c0_211, %c2_212, %c1_213] : memref<4x18x18xf32, #tpu.memory_space<vmem>>, vector<1x16x16xf32>
    %367 = vector.shape_cast %366 : vector<1x16x16xf32> to vector<16x16xf32>
    %c7_214 = arith.constant 7 : index
    %368 = memref.load %arg5[%c7_214] : memref<36xf32, #tpu.memory_space<smem>>
    %369 = vector.broadcast %368 : f32 to vector<16x16xf32>
    %370 = arith.mulf %367, %369 : vector<16x16xf32>
    %371 = arith.addf %365, %370 : vector<16x16xf32>
    %c0_215 = arith.constant 0 : index
    %c2_216 = arith.constant 2 : index
    %c2_217 = arith.constant 2 : index
    %372 = vector.load %arg10[%c0_215, %c2_216, %c2_217] : memref<4x18x18xf32, #tpu.memory_space<vmem>>, vector<1x16x16xf32>
    %373 = vector.shape_cast %372 : vector<1x16x16xf32> to vector<16x16xf32>
    %c8_218 = arith.constant 8 : index
    %374 = memref.load %arg5[%c8_218] : memref<36xf32, #tpu.memory_space<smem>>
    %375 = vector.broadcast %374 : f32 to vector<16x16xf32>
    %376 = arith.mulf %373, %375 : vector<16x16xf32>
    %377 = arith.addf %371, %376 : vector<16x16xf32>
    %c1_219 = arith.constant 1 : index
    %c0_220 = arith.constant 0 : index
    %c0_221 = arith.constant 0 : index
    %378 = vector.load %arg10[%c1_219, %c0_220, %c0_221] : memref<4x18x18xf32, #tpu.memory_space<vmem>>, vector<1x16x16xf32>
    %379 = vector.shape_cast %378 : vector<1x16x16xf32> to vector<16x16xf32>
    %c9_222 = arith.constant 9 : index
    %380 = memref.load %arg5[%c9_222] : memref<36xf32, #tpu.memory_space<smem>>
    %381 = vector.broadcast %380 : f32 to vector<16x16xf32>
    %382 = arith.mulf %379, %381 : vector<16x16xf32>
    %c1_223 = arith.constant 1 : index
    %c0_224 = arith.constant 0 : index
    %c1_225 = arith.constant 1 : index
    %383 = vector.load %arg10[%c1_223, %c0_224, %c1_225] : memref<4x18x18xf32, #tpu.memory_space<vmem>>, vector<1x16x16xf32>
    %384 = vector.shape_cast %383 : vector<1x16x16xf32> to vector<16x16xf32>
    %c10_226 = arith.constant 10 : index
    %385 = memref.load %arg5[%c10_226] : memref<36xf32, #tpu.memory_space<smem>>
    %386 = vector.broadcast %385 : f32 to vector<16x16xf32>
    %387 = arith.mulf %384, %386 : vector<16x16xf32>
    %388 = arith.addf %382, %387 : vector<16x16xf32>
    %c1_227 = arith.constant 1 : index
    %c0_228 = arith.constant 0 : index
    %c2_229 = arith.constant 2 : index
    %389 = vector.load %arg10[%c1_227, %c0_228, %c2_229] : memref<4x18x18xf32, #tpu.memory_space<vmem>>, vector<1x16x16xf32>
    %390 = vector.shape_cast %389 : vector<1x16x16xf32> to vector<16x16xf32>
    %c11_230 = arith.constant 11 : index
    %391 = memref.load %arg5[%c11_230] : memref<36xf32, #tpu.memory_space<smem>>
    %392 = vector.broadcast %391 : f32 to vector<16x16xf32>
    %393 = arith.mulf %390, %392 : vector<16x16xf32>
    %394 = arith.addf %388, %393 : vector<16x16xf32>
    %c1_231 = arith.constant 1 : index
    %c1_232 = arith.constant 1 : index
    %c0_233 = arith.constant 0 : index
    %395 = vector.load %arg10[%c1_231, %c1_232, %c0_233] : memref<4x18x18xf32, #tpu.memory_space<vmem>>, vector<1x16x16xf32>
    %396 = vector.shape_cast %395 : vector<1x16x16xf32> to vector<16x16xf32>
    %c12_234 = arith.constant 12 : index
    %397 = memref.load %arg5[%c12_234] : memref<36xf32, #tpu.memory_space<smem>>
    %398 = vector.broadcast %397 : f32 to vector<16x16xf32>
    %399 = arith.mulf %396, %398 : vector<16x16xf32>
    %400 = arith.addf %394, %399 : vector<16x16xf32>
    %c1_235 = arith.constant 1 : index
    %c1_236 = arith.constant 1 : index
    %c1_237 = arith.constant 1 : index
    %401 = vector.load %arg10[%c1_235, %c1_236, %c1_237] : memref<4x18x18xf32, #tpu.memory_space<vmem>>, vector<1x16x16xf32>
    %402 = vector.shape_cast %401 : vector<1x16x16xf32> to vector<16x16xf32>
    %c13_238 = arith.constant 13 : index
    %403 = memref.load %arg5[%c13_238] : memref<36xf32, #tpu.memory_space<smem>>
    %404 = vector.broadcast %403 : f32 to vector<16x16xf32>
    %405 = arith.mulf %402, %404 : vector<16x16xf32>
    %406 = arith.addf %400, %405 : vector<16x16xf32>
    %c1_239 = arith.constant 1 : index
    %c1_240 = arith.constant 1 : index
    %c2_241 = arith.constant 2 : index
    %407 = vector.load %arg10[%c1_239, %c1_240, %c2_241] : memref<4x18x18xf32, #tpu.memory_space<vmem>>, vector<1x16x16xf32>
    %408 = vector.shape_cast %407 : vector<1x16x16xf32> to vector<16x16xf32>
    %c14_242 = arith.constant 14 : index
    %409 = memref.load %arg5[%c14_242] : memref<36xf32, #tpu.memory_space<smem>>
    %410 = vector.broadcast %409 : f32 to vector<16x16xf32>
    %411 = arith.mulf %408, %410 : vector<16x16xf32>
    %412 = arith.addf %406, %411 : vector<16x16xf32>
    %c1_243 = arith.constant 1 : index
    %c2_244 = arith.constant 2 : index
    %c0_245 = arith.constant 0 : index
    %413 = vector.load %arg10[%c1_243, %c2_244, %c0_245] : memref<4x18x18xf32, #tpu.memory_space<vmem>>, vector<1x16x16xf32>
    %414 = vector.shape_cast %413 : vector<1x16x16xf32> to vector<16x16xf32>
    %c15_246 = arith.constant 15 : index
    %415 = memref.load %arg5[%c15_246] : memref<36xf32, #tpu.memory_space<smem>>
    %416 = vector.broadcast %415 : f32 to vector<16x16xf32>
    %417 = arith.mulf %414, %416 : vector<16x16xf32>
    %418 = arith.addf %412, %417 : vector<16x16xf32>
    %c1_247 = arith.constant 1 : index
    %c2_248 = arith.constant 2 : index
    %c1_249 = arith.constant 1 : index
    %419 = vector.load %arg10[%c1_247, %c2_248, %c1_249] : memref<4x18x18xf32, #tpu.memory_space<vmem>>, vector<1x16x16xf32>
    %420 = vector.shape_cast %419 : vector<1x16x16xf32> to vector<16x16xf32>
    %c16_250 = arith.constant 16 : index
    %421 = memref.load %arg5[%c16_250] : memref<36xf32, #tpu.memory_space<smem>>
    %422 = vector.broadcast %421 : f32 to vector<16x16xf32>
    %423 = arith.mulf %420, %422 : vector<16x16xf32>
    %424 = arith.addf %418, %423 : vector<16x16xf32>
    %c1_251 = arith.constant 1 : index
    %c2_252 = arith.constant 2 : index
    %c2_253 = arith.constant 2 : index
    %425 = vector.load %arg10[%c1_251, %c2_252, %c2_253] : memref<4x18x18xf32, #tpu.memory_space<vmem>>, vector<1x16x16xf32>
    %426 = vector.shape_cast %425 : vector<1x16x16xf32> to vector<16x16xf32>
    %c17_254 = arith.constant 17 : index
    %427 = memref.load %arg5[%c17_254] : memref<36xf32, #tpu.memory_space<smem>>
    %428 = vector.broadcast %427 : f32 to vector<16x16xf32>
    %429 = arith.mulf %426, %428 : vector<16x16xf32>
    %430 = arith.addf %424, %429 : vector<16x16xf32>
    %c2_255 = arith.constant 2 : index
    %c0_256 = arith.constant 0 : index
    %c0_257 = arith.constant 0 : index
    %431 = vector.load %arg10[%c2_255, %c0_256, %c0_257] : memref<4x18x18xf32, #tpu.memory_space<vmem>>, vector<1x16x16xf32>
    %432 = vector.shape_cast %431 : vector<1x16x16xf32> to vector<16x16xf32>
    %c18_258 = arith.constant 18 : index
    %433 = memref.load %arg5[%c18_258] : memref<36xf32, #tpu.memory_space<smem>>
    %434 = vector.broadcast %433 : f32 to vector<16x16xf32>
    %435 = arith.mulf %432, %434 : vector<16x16xf32>
    %c2_259 = arith.constant 2 : index
    %c0_260 = arith.constant 0 : index
    %c1_261 = arith.constant 1 : index
    %436 = vector.load %arg10[%c2_259, %c0_260, %c1_261] : memref<4x18x18xf32, #tpu.memory_space<vmem>>, vector<1x16x16xf32>
    %437 = vector.shape_cast %436 : vector<1x16x16xf32> to vector<16x16xf32>
    %c19_262 = arith.constant 19 : index
    %438 = memref.load %arg5[%c19_262] : memref<36xf32, #tpu.memory_space<smem>>
    %439 = vector.broadcast %438 : f32 to vector<16x16xf32>
    %440 = arith.mulf %437, %439 : vector<16x16xf32>
    %441 = arith.addf %435, %440 : vector<16x16xf32>
    %c2_263 = arith.constant 2 : index
    %c0_264 = arith.constant 0 : index
    %c2_265 = arith.constant 2 : index
    %442 = vector.load %arg10[%c2_263, %c0_264, %c2_265] : memref<4x18x18xf32, #tpu.memory_space<vmem>>, vector<1x16x16xf32>
    %443 = vector.shape_cast %442 : vector<1x16x16xf32> to vector<16x16xf32>
    %c20_266 = arith.constant 20 : index
    %444 = memref.load %arg5[%c20_266] : memref<36xf32, #tpu.memory_space<smem>>
    %445 = vector.broadcast %444 : f32 to vector<16x16xf32>
    %446 = arith.mulf %443, %445 : vector<16x16xf32>
    %447 = arith.addf %441, %446 : vector<16x16xf32>
    %c2_267 = arith.constant 2 : index
    %c1_268 = arith.constant 1 : index
    %c0_269 = arith.constant 0 : index
    %448 = vector.load %arg10[%c2_267, %c1_268, %c0_269] : memref<4x18x18xf32, #tpu.memory_space<vmem>>, vector<1x16x16xf32>
    %449 = vector.shape_cast %448 : vector<1x16x16xf32> to vector<16x16xf32>
    %c21_270 = arith.constant 21 : index
    %450 = memref.load %arg5[%c21_270] : memref<36xf32, #tpu.memory_space<smem>>
    %451 = vector.broadcast %450 : f32 to vector<16x16xf32>
    %452 = arith.mulf %449, %451 : vector<16x16xf32>
    %453 = arith.addf %447, %452 : vector<16x16xf32>
    %c2_271 = arith.constant 2 : index
    %c1_272 = arith.constant 1 : index
    %c1_273 = arith.constant 1 : index
    %454 = vector.load %arg10[%c2_271, %c1_272, %c1_273] : memref<4x18x18xf32, #tpu.memory_space<vmem>>, vector<1x16x16xf32>
    %455 = vector.shape_cast %454 : vector<1x16x16xf32> to vector<16x16xf32>
    %c22_274 = arith.constant 22 : index
    %456 = memref.load %arg5[%c22_274] : memref<36xf32, #tpu.memory_space<smem>>
    %457 = vector.broadcast %456 : f32 to vector<16x16xf32>
    %458 = arith.mulf %455, %457 : vector<16x16xf32>
    %459 = arith.addf %453, %458 : vector<16x16xf32>
    %c2_275 = arith.constant 2 : index
    %c1_276 = arith.constant 1 : index
    %c2_277 = arith.constant 2 : index
    %460 = vector.load %arg10[%c2_275, %c1_276, %c2_277] : memref<4x18x18xf32, #tpu.memory_space<vmem>>, vector<1x16x16xf32>
    %461 = vector.shape_cast %460 : vector<1x16x16xf32> to vector<16x16xf32>
    %c23_278 = arith.constant 23 : index
    %462 = memref.load %arg5[%c23_278] : memref<36xf32, #tpu.memory_space<smem>>
    %463 = vector.broadcast %462 : f32 to vector<16x16xf32>
    %464 = arith.mulf %461, %463 : vector<16x16xf32>
    %465 = arith.addf %459, %464 : vector<16x16xf32>
    %c2_279 = arith.constant 2 : index
    %c2_280 = arith.constant 2 : index
    %c0_281 = arith.constant 0 : index
    %466 = vector.load %arg10[%c2_279, %c2_280, %c0_281] : memref<4x18x18xf32, #tpu.memory_space<vmem>>, vector<1x16x16xf32>
    %467 = vector.shape_cast %466 : vector<1x16x16xf32> to vector<16x16xf32>
    %c24_282 = arith.constant 24 : index
    %468 = memref.load %arg5[%c24_282] : memref<36xf32, #tpu.memory_space<smem>>
    %469 = vector.broadcast %468 : f32 to vector<16x16xf32>
    %470 = arith.mulf %467, %469 : vector<16x16xf32>
    %471 = arith.addf %465, %470 : vector<16x16xf32>
    %c2_283 = arith.constant 2 : index
    %c2_284 = arith.constant 2 : index
    %c1_285 = arith.constant 1 : index
    %472 = vector.load %arg10[%c2_283, %c2_284, %c1_285] : memref<4x18x18xf32, #tpu.memory_space<vmem>>, vector<1x16x16xf32>
    %473 = vector.shape_cast %472 : vector<1x16x16xf32> to vector<16x16xf32>
    %c25_286 = arith.constant 25 : index
    %474 = memref.load %arg5[%c25_286] : memref<36xf32, #tpu.memory_space<smem>>
    %475 = vector.broadcast %474 : f32 to vector<16x16xf32>
    %476 = arith.mulf %473, %475 : vector<16x16xf32>
    %477 = arith.addf %471, %476 : vector<16x16xf32>
    %c2_287 = arith.constant 2 : index
    %c2_288 = arith.constant 2 : index
    %c2_289 = arith.constant 2 : index
    %478 = vector.load %arg10[%c2_287, %c2_288, %c2_289] : memref<4x18x18xf32, #tpu.memory_space<vmem>>, vector<1x16x16xf32>
    %479 = vector.shape_cast %478 : vector<1x16x16xf32> to vector<16x16xf32>
    %c26_290 = arith.constant 26 : index
    %480 = memref.load %arg5[%c26_290] : memref<36xf32, #tpu.memory_space<smem>>
    %481 = vector.broadcast %480 : f32 to vector<16x16xf32>
    %482 = arith.mulf %479, %481 : vector<16x16xf32>
    %483 = arith.addf %477, %482 : vector<16x16xf32>
    %c3_291 = arith.constant 3 : index
    %c0_292 = arith.constant 0 : index
    %c0_293 = arith.constant 0 : index
    %484 = vector.load %arg10[%c3_291, %c0_292, %c0_293] : memref<4x18x18xf32, #tpu.memory_space<vmem>>, vector<1x16x16xf32>
    %485 = vector.shape_cast %484 : vector<1x16x16xf32> to vector<16x16xf32>
    %c27_294 = arith.constant 27 : index
    %486 = memref.load %arg5[%c27_294] : memref<36xf32, #tpu.memory_space<smem>>
    %487 = vector.broadcast %486 : f32 to vector<16x16xf32>
    %488 = arith.mulf %485, %487 : vector<16x16xf32>
    %c3_295 = arith.constant 3 : index
    %c0_296 = arith.constant 0 : index
    %c1_297 = arith.constant 1 : index
    %489 = vector.load %arg10[%c3_295, %c0_296, %c1_297] : memref<4x18x18xf32, #tpu.memory_space<vmem>>, vector<1x16x16xf32>
    %490 = vector.shape_cast %489 : vector<1x16x16xf32> to vector<16x16xf32>
    %c28_298 = arith.constant 28 : index
    %491 = memref.load %arg5[%c28_298] : memref<36xf32, #tpu.memory_space<smem>>
    %492 = vector.broadcast %491 : f32 to vector<16x16xf32>
    %493 = arith.mulf %490, %492 : vector<16x16xf32>
    %494 = arith.addf %488, %493 : vector<16x16xf32>
    %c3_299 = arith.constant 3 : index
    %c0_300 = arith.constant 0 : index
    %c2_301 = arith.constant 2 : index
    %495 = vector.load %arg10[%c3_299, %c0_300, %c2_301] : memref<4x18x18xf32, #tpu.memory_space<vmem>>, vector<1x16x16xf32>
    %496 = vector.shape_cast %495 : vector<1x16x16xf32> to vector<16x16xf32>
    %c29_302 = arith.constant 29 : index
    %497 = memref.load %arg5[%c29_302] : memref<36xf32, #tpu.memory_space<smem>>
    %498 = vector.broadcast %497 : f32 to vector<16x16xf32>
    %499 = arith.mulf %496, %498 : vector<16x16xf32>
    %500 = arith.addf %494, %499 : vector<16x16xf32>
    %c3_303 = arith.constant 3 : index
    %c1_304 = arith.constant 1 : index
    %c0_305 = arith.constant 0 : index
    %501 = vector.load %arg10[%c3_303, %c1_304, %c0_305] : memref<4x18x18xf32, #tpu.memory_space<vmem>>, vector<1x16x16xf32>
    %502 = vector.shape_cast %501 : vector<1x16x16xf32> to vector<16x16xf32>
    %c30_306 = arith.constant 30 : index
    %503 = memref.load %arg5[%c30_306] : memref<36xf32, #tpu.memory_space<smem>>
    %504 = vector.broadcast %503 : f32 to vector<16x16xf32>
    %505 = arith.mulf %502, %504 : vector<16x16xf32>
    %506 = arith.addf %500, %505 : vector<16x16xf32>
    %c3_307 = arith.constant 3 : index
    %c1_308 = arith.constant 1 : index
    %c1_309 = arith.constant 1 : index
    %507 = vector.load %arg10[%c3_307, %c1_308, %c1_309] : memref<4x18x18xf32, #tpu.memory_space<vmem>>, vector<1x16x16xf32>
    %508 = vector.shape_cast %507 : vector<1x16x16xf32> to vector<16x16xf32>
    %c31_310 = arith.constant 31 : index
    %509 = memref.load %arg5[%c31_310] : memref<36xf32, #tpu.memory_space<smem>>
    %510 = vector.broadcast %509 : f32 to vector<16x16xf32>
    %511 = arith.mulf %508, %510 : vector<16x16xf32>
    %512 = arith.addf %506, %511 : vector<16x16xf32>
    %c3_311 = arith.constant 3 : index
    %c1_312 = arith.constant 1 : index
    %c2_313 = arith.constant 2 : index
    %513 = vector.load %arg10[%c3_311, %c1_312, %c2_313] : memref<4x18x18xf32, #tpu.memory_space<vmem>>, vector<1x16x16xf32>
    %514 = vector.shape_cast %513 : vector<1x16x16xf32> to vector<16x16xf32>
    %c32_314 = arith.constant 32 : index
    %515 = memref.load %arg5[%c32_314] : memref<36xf32, #tpu.memory_space<smem>>
    %516 = vector.broadcast %515 : f32 to vector<16x16xf32>
    %517 = arith.mulf %514, %516 : vector<16x16xf32>
    %518 = arith.addf %512, %517 : vector<16x16xf32>
    %c3_315 = arith.constant 3 : index
    %c2_316 = arith.constant 2 : index
    %c0_317 = arith.constant 0 : index
    %519 = vector.load %arg10[%c3_315, %c2_316, %c0_317] : memref<4x18x18xf32, #tpu.memory_space<vmem>>, vector<1x16x16xf32>
    %520 = vector.shape_cast %519 : vector<1x16x16xf32> to vector<16x16xf32>
    %c33_318 = arith.constant 33 : index
    %521 = memref.load %arg5[%c33_318] : memref<36xf32, #tpu.memory_space<smem>>
    %522 = vector.broadcast %521 : f32 to vector<16x16xf32>
    %523 = arith.mulf %520, %522 : vector<16x16xf32>
    %524 = arith.addf %518, %523 : vector<16x16xf32>
    %c3_319 = arith.constant 3 : index
    %c2_320 = arith.constant 2 : index
    %c1_321 = arith.constant 1 : index
    %525 = vector.load %arg10[%c3_319, %c2_320, %c1_321] : memref<4x18x18xf32, #tpu.memory_space<vmem>>, vector<1x16x16xf32>
    %526 = vector.shape_cast %525 : vector<1x16x16xf32> to vector<16x16xf32>
    %c34_322 = arith.constant 34 : index
    %527 = memref.load %arg5[%c34_322] : memref<36xf32, #tpu.memory_space<smem>>
    %528 = vector.broadcast %527 : f32 to vector<16x16xf32>
    %529 = arith.mulf %526, %528 : vector<16x16xf32>
    %530 = arith.addf %524, %529 : vector<16x16xf32>
    %c3_323 = arith.constant 3 : index
    %c2_324 = arith.constant 2 : index
    %c2_325 = arith.constant 2 : index
    %531 = vector.load %arg10[%c3_323, %c2_324, %c2_325] : memref<4x18x18xf32, #tpu.memory_space<vmem>>, vector<1x16x16xf32>
    %532 = vector.shape_cast %531 : vector<1x16x16xf32> to vector<16x16xf32>
    %c35_326 = arith.constant 35 : index
    %533 = memref.load %arg5[%c35_326] : memref<36xf32, #tpu.memory_space<smem>>
    %534 = vector.broadcast %533 : f32 to vector<16x16xf32>
    %535 = arith.mulf %532, %534 : vector<16x16xf32>
    %536 = arith.addf %530, %535 : vector<16x16xf32>
    %c0_327 = arith.constant 0 : index
    %537 = memref.load %arg6[%c0_327] : memref<16xf32, #tpu.memory_space<smem>>
    %538 = vector.broadcast %537 : f32 to vector<16x16xf32>
    %539 = arith.mulf %377, %538 : vector<16x16xf32>
    %c1_328 = arith.constant 1 : index
    %540 = memref.load %arg6[%c1_328] : memref<16xf32, #tpu.memory_space<smem>>
    %541 = vector.broadcast %540 : f32 to vector<16x16xf32>
    %542 = arith.mulf %430, %541 : vector<16x16xf32>
    %543 = arith.addf %539, %542 : vector<16x16xf32>
    %c2_329 = arith.constant 2 : index
    %544 = memref.load %arg6[%c2_329] : memref<16xf32, #tpu.memory_space<smem>>
    %545 = vector.broadcast %544 : f32 to vector<16x16xf32>
    %546 = arith.mulf %483, %545 : vector<16x16xf32>
    %547 = arith.addf %543, %546 : vector<16x16xf32>
    %c3_330 = arith.constant 3 : index
    %548 = memref.load %arg6[%c3_330] : memref<16xf32, #tpu.memory_space<smem>>
    %549 = vector.broadcast %548 : f32 to vector<16x16xf32>
    %550 = arith.mulf %536, %549 : vector<16x16xf32>
    %551 = arith.addf %547, %550 : vector<16x16xf32>
    %c0_331 = arith.constant 0 : index
    %552 = memref.load %arg7[%c0_331] : memref<4xf32, #tpu.memory_space<smem>>
    %553 = vector.broadcast %552 : f32 to vector<16x16xf32>
    %554 = arith.addf %551, %553 : vector<16x16xf32>
    %c0_332 = arith.constant 0 : index
    %c0_333 = arith.constant 0 : index
    %c0_334 = arith.constant 0 : index
    %c0_335 = arith.constant 0 : index
    %555 = vector.load %arg8[%c0_332, %c0_333, %c0_334, %c0_335] : memref<1x4x16x16xf32, #tpu.memory_space<vmem>>, vector<1x1x16x16xf32>
    %556 = vector.shape_cast %555 : vector<1x1x16x16xf32> to vector<16x16xf32>
    %557 = vector.shape_cast %554 : vector<16x16xf32> to vector<1x1x16x16xf32>
    tpu.vector_store %arg8[%c0_332, %c0_333, %c0_334, %c0_335], %557 {strides = array<i32>} : memref<1x4x16x16xf32, #tpu.memory_space<vmem>>, vector<1x1x16x16xf32>,
    %c4_336 = arith.constant 4 : index
    %558 = memref.load %arg6[%c4_336] : memref<16xf32, #tpu.memory_space<smem>>
    %559 = vector.broadcast %558 : f32 to vector<16x16xf32>
    %560 = arith.mulf %377, %559 : vector<16x16xf32>
    %c5_337 = arith.constant 5 : index
    %561 = memref.load %arg6[%c5_337] : memref<16xf32, #tpu.memory_space<smem>>
    %562 = vector.broadcast %561 : f32 to vector<16x16xf32>
    %563 = arith.mulf %430, %562 : vector<16x16xf32>
    %564 = arith.addf %560, %563 : vector<16x16xf32>
    %c6_338 = arith.constant 6 : index
    %565 = memref.load %arg6[%c6_338] : memref<16xf32, #tpu.memory_space<smem>>
    %566 = vector.broadcast %565 : f32 to vector<16x16xf32>
    %567 = arith.mulf %483, %566 : vector<16x16xf32>
    %568 = arith.addf %564, %567 : vector<16x16xf32>
    %c7_339 = arith.constant 7 : index
    %569 = memref.load %arg6[%c7_339] : memref<16xf32, #tpu.memory_space<smem>>
    %570 = vector.broadcast %569 : f32 to vector<16x16xf32>
    %571 = arith.mulf %536, %570 : vector<16x16xf32>
    %572 = arith.addf %568, %571 : vector<16x16xf32>
    %c1_340 = arith.constant 1 : index
    %573 = memref.load %arg7[%c1_340] : memref<4xf32, #tpu.memory_space<smem>>
    %574 = vector.broadcast %573 : f32 to vector<16x16xf32>
    %575 = arith.addf %572, %574 : vector<16x16xf32>
    %c0_341 = arith.constant 0 : index
    %c1_342 = arith.constant 1 : index
    %c0_343 = arith.constant 0 : index
    %c0_344 = arith.constant 0 : index
    %576 = vector.load %arg8[%c0_341, %c1_342, %c0_343, %c0_344] : memref<1x4x16x16xf32, #tpu.memory_space<vmem>>, vector<1x1x16x16xf32>
    %577 = vector.shape_cast %576 : vector<1x1x16x16xf32> to vector<16x16xf32>
    %578 = vector.shape_cast %575 : vector<16x16xf32> to vector<1x1x16x16xf32>
    tpu.vector_store %arg8[%c0_341, %c1_342, %c0_343, %c0_344], %578 {strides = array<i32>} : memref<1x4x16x16xf32, #tpu.memory_space<vmem>>, vector<1x1x16x16xf32>,
    %c8_345 = arith.constant 8 : index
    %579 = memref.load %arg6[%c8_345] : memref<16xf32, #tpu.memory_space<smem>>
    %580 = vector.broadcast %579 : f32 to vector<16x16xf32>
    %581 = arith.mulf %377, %580 : vector<16x16xf32>
    %c9_346 = arith.constant 9 : index
    %582 = memref.load %arg6[%c9_346] : memref<16xf32, #tpu.memory_space<smem>>
    %583 = vector.broadcast %582 : f32 to vector<16x16xf32>
    %584 = arith.mulf %430, %583 : vector<16x16xf32>
    %585 = arith.addf %581, %584 : vector<16x16xf32>
    %c10_347 = arith.constant 10 : index
    %586 = memref.load %arg6[%c10_347] : memref<16xf32, #tpu.memory_space<smem>>
    %587 = vector.broadcast %586 : f32 to vector<16x16xf32>
    %588 = arith.mulf %483, %587 : vector<16x16xf32>
    %589 = arith.addf %585, %588 : vector<16x16xf32>
    %c11_348 = arith.constant 11 : index
    %590 = memref.load %arg6[%c11_348] : memref<16xf32, #tpu.memory_space<smem>>
    %591 = vector.broadcast %590 : f32 to vector<16x16xf32>
    %592 = arith.mulf %536, %591 : vector<16x16xf32>
    %593 = arith.addf %589, %592 : vector<16x16xf32>
    %c2_349 = arith.constant 2 : index
    %594 = memref.load %arg7[%c2_349] : memref<4xf32, #tpu.memory_space<smem>>
    %595 = vector.broadcast %594 : f32 to vector<16x16xf32>
    %596 = arith.addf %593, %595 : vector<16x16xf32>
    %c0_350 = arith.constant 0 : index
    %c2_351 = arith.constant 2 : index
    %c0_352 = arith.constant 0 : index
    %c0_353 = arith.constant 0 : index
    %597 = vector.load %arg8[%c0_350, %c2_351, %c0_352, %c0_353] : memref<1x4x16x16xf32, #tpu.memory_space<vmem>>, vector<1x1x16x16xf32>
    %598 = vector.shape_cast %597 : vector<1x1x16x16xf32> to vector<16x16xf32>
    %599 = vector.shape_cast %596 : vector<16x16xf32> to vector<1x1x16x16xf32>
    tpu.vector_store %arg8[%c0_350, %c2_351, %c0_352, %c0_353], %599 {strides = array<i32>} : memref<1x4x16x16xf32, #tpu.memory_space<vmem>>, vector<1x1x16x16xf32>,
    %c12_354 = arith.constant 12 : index
    %600 = memref.load %arg6[%c12_354] : memref<16xf32, #tpu.memory_space<smem>>
    %601 = vector.broadcast %600 : f32 to vector<16x16xf32>
    %602 = arith.mulf %377, %601 : vector<16x16xf32>
    %c13_355 = arith.constant 13 : index
    %603 = memref.load %arg6[%c13_355] : memref<16xf32, #tpu.memory_space<smem>>
    %604 = vector.broadcast %603 : f32 to vector<16x16xf32>
    %605 = arith.mulf %430, %604 : vector<16x16xf32>
    %606 = arith.addf %602, %605 : vector<16x16xf32>
    %c14_356 = arith.constant 14 : index
    %607 = memref.load %arg6[%c14_356] : memref<16xf32, #tpu.memory_space<smem>>
    %608 = vector.broadcast %607 : f32 to vector<16x16xf32>
    %609 = arith.mulf %483, %608 : vector<16x16xf32>
    %610 = arith.addf %606, %609 : vector<16x16xf32>
    %c15_357 = arith.constant 15 : index
    %611 = memref.load %arg6[%c15_357] : memref<16xf32, #tpu.memory_space<smem>>
    %612 = vector.broadcast %611 : f32 to vector<16x16xf32>
    %613 = arith.mulf %536, %612 : vector<16x16xf32>
    %614 = arith.addf %610, %613 : vector<16x16xf32>
    %c3_358 = arith.constant 3 : index
    %615 = memref.load %arg7[%c3_358] : memref<4xf32, #tpu.memory_space<smem>>
    %616 = vector.broadcast %615 : f32 to vector<16x16xf32>
    %617 = arith.addf %614, %616 : vector<16x16xf32>
    %c0_359 = arith.constant 0 : index
    %c3_360 = arith.constant 3 : index
    %c0_361 = arith.constant 0 : index
    %c0_362 = arith.constant 0 : index
    %618 = vector.load %arg8[%c0_359, %c3_360, %c0_361, %c0_362] : memref<1x4x16x16xf32, #tpu.memory_space<vmem>>, vector<1x1x16x16xf32>
    %619 = vector.shape_cast %618 : vector<1x1x16x16xf32> to vector<16x16xf32>
    %620 = vector.shape_cast %617 : vector<16x16xf32> to vector<1x1x16x16xf32>
    tpu.vector_store %arg8[%c0_359, %c3_360, %c0_361, %c0_362], %620 {strides = array<i32>} : memref<1x4x16x16xf32, #tpu.memory_space<vmem>>, vector<1x1x16x16xf32>,
    return
  }
  func.func @transform_0(%arg0: i32) -> (i32, i32, i32, i32) {
    %c0_i32 = arith.constant 0 : i32
    %c0_i32_0 = arith.constant 0 : i32
    %c0_i32_1 = arith.constant 0 : i32
    %c0_i32_2 = arith.constant 0 : i32
    return %arg0, %c0_i32, %c0_i32_0, %c0_i32_1 : i32, i32, i32, i32
  }
  func.func @transform_1(%arg0: i32) -> i32 {
    %c0_i32 = arith.constant 0 : i32
    %c0_i32_0 = arith.constant 0 : i32
    return %c0_i32 : i32
  }
  func.func @transform_2(%arg0: i32) -> i32 {
    %c0_i32 = arith.constant 0 : i32
    %c0_i32_0 = arith.constant 0 : i32
    return %c0_i32 : i32
  }
  func.func @transform_3(%arg0: i32) -> i32 {
    %c0_i32 = arith.constant 0 : i32
    %c0_i32_0 = arith.constant 0 : i32
    return %c0_i32 : i32
  }
  func.func @transform_4(%arg0: i32) -> i32 {
    %c0_i32 = arith.constant 0 : i32
    %c0_i32_0 = arith.constant 0 : i32
    return %c0_i32 : i32
  }
  func.func @transform_5(%arg0: i32) -> i32 {
    %c0_i32 = arith.constant 0 : i32
    %c0_i32_0 = arith.constant 0 : i32
    return %c0_i32 : i32
  }
  func.func @transform_6(%arg0: i32) -> i32 {
    %c0_i32 = arith.constant 0 : i32
    %c0_i32_0 = arith.constant 0 : i32
    return %c0_i32 : i32
  }
  func.func @transform_7(%arg0: i32) -> (i32, i32, i32, i32) {
    %c0_i32 = arith.constant 0 : i32
    %c0_i32_0 = arith.constant 0 : i32
    %c0_i32_1 = arith.constant 0 : i32
    %c0_i32_2 = arith.constant 0 : i32
    return %arg0, %c0_i32, %c0_i32_0, %c0_i32_1 : i32, i32, i32, i32
  }
}

</mosaic_0001>

<bundles_post_ra>
// kernel: tpu_custom_call.1
= control target key start
LH: loop header
LB: loop body
LE: loop exit
PB: predicated region body
PF: predicated region fallthrough
CT: control target
= control target key end

     0   :  { %12 = vsyncpa [#allocation5], 0  ;;  %s3254_s0 = inlined_call_operand.hbm [shape: f32[2,4,16,16], index: 0, kind: input, shape index: {}]   ;;  %s3255_s1 = inlined_call_operand.vmem [shape: f32[36], index: 1, kind: input, shape index: {}]   ;;  %s3256_s2 = inlined_call_operand.vmem [shape: f32[16], index: 2, kind: input, shape index: {}]   ;;  %s3257_s3 = inlined_call_operand.vmem [shape: f32[4], index: 3, kind: input, shape index: {}]   ;;  %s3258_s4 = inlined_call_operand.vmem [shape: f32[36], index: 4, kind: input, shape index: {}]   ;;  %s3259_s5 = inlined_call_operand.vmem [shape: f32[16], index: 5, kind: input, shape index: {}]   ;;  %s3260_s6 = inlined_call_operand.vmem [shape: f32[4], index: 6, kind: input, shape index: {}]   ;;  %s3261_s7 = inlined_call_operand.hbm [shape: f32[2,4,16,16], index: 7, kind: output, shape index: {}]  }
   0x1   :  { %14 = vsyncpa [#allocation5 + $0x1], 0 }
   0x2   :  { %15 = vsyncpa [#allocation7], 0 }
   0x3   :  { %16 = vsyncpa [#allocation10], 0 }
   0x4   :  { %17 = vsyncpa [#allocation13], 0 }
   0x5   :  { %18 = vsyncpa [#allocation16], 0 }
   0x6   :  { %19 = vsyncpa [#allocation6], 0 }
   0x7   :  { %21 = vsyncpa [#allocation6 + $0x1], 0  ;;  %s2284_s24 = smov 0   ;;  %s2286_s25 = smov 0  }
   0x8   :  { %s2288_s26 = smov 0   ;;  %s2290_s27 = smov 0  }
   0x9 LB: > { %s234_s30 = sshll.u32 %s3256_s2, 4  ;;  %s2308_s8 = sadd.s32 4294967295, %s2226_s27   ;;  %s2226_s27 = sphi %s2290_s27, %s3297_s27   ;;  %s2222_s26 = sphi %s2288_s26, %s3296_s26   ;;  %s2218_s25 = sphi %s2286_s25, %s3295_s25   ;;  %s2214_s24 = sphi %s2284_s24, %s3294_s24   ;;  %s235_s30 = int_to_ptr.vmem [resolvable:$true] %s234_s30 }
   0xa   : > { %p1770_p0 = scmp.ge.s32.totalorder %s2226_s27, 1  ;;  %p3262_p1 = scmp.eq.s32.totalorder %s2308_s8, 0 }
   0xb   : > { %p210_p2 = scmp.lt.s32.totalorder %s2226_s27, 3  ;;  %s256_s12 = sshll.u32 %s3258_s4, 4  ;;  %s257_s12 = int_to_ptr.vmem [resolvable:$true] %s256_s12 }
   0xc   : > { %s223_s15 = sshll.u32 %s3255_s1, 4  ;;  %s245_s19 = sshll.u32 %s3257_s3, 4  ;;  %s2332_s15 = int_to_ptr.vmem [resolvable:$true] %s223_s15  ;;  %s2337_s19 = int_to_ptr.vmem [resolvable:$true] %s245_s19 }
   0xd   : > { %p2313_p3 = pnand %p1770_p0, %p210_p2  ;;  %s2024_s20 = scalar_lea.vmem %s235_s30, 16 }
   0xe   : > { %p2025_p7 = scmp.ne.s32.totalorder %s235_s30, %s2024_s20  ;;  %p2032_p11 = scmp.lt.s32.totalorder %s235_s30, %s235_s30 }
   0xf   : > { %s3270_s9 = scalar_select %p2313_p3, 1, 0 }
  0x10   : > { %p1937_p5 = pneg %p2313_p3  ;;  %p2033_p12 = scmp.lt.s32.totalorder %s2024_s20, %s2024_s20 }
  0x12   : > { %p2328_p6 = pnand %p1937_p5, %p3262_p1  ;;  %p2034_p13 = por %p2033_p12, %p2032_p11 }
  0x14   : > { %p2341_p8 = pneg %p2328_p6 }
  0x16   : > { %p2027_p9 = pnand %p2341_p8, %p2025_p7 }
  0x18   : > { %p2028_p10 = pneg %p2027_p9 }
  0x1a   : > { %p2035_p0 = pnand %p2034_p13, %p2028_p10 }
  0x1c   : > { %2038 = shalt.err (!%p2035_p0)
}
  0x1d   : > { %s2228_s22 = smov [#allocation9]   ;;  %s2039_s23 = scalar_lea.vmem %s257_s12, 16 }
  0x1e   : > { %1943 = dma.vmem_to_smem (!%p2328_p6), %s235_s30, 16, %s2228_s22, [#allocation10]  }
  0x1f   : > { %p2040_p2 = scmp.ne.s32.totalorder %s257_s12, %s2039_s23  ;;  %p2047_p1 = scmp.lt.s32.totalorder %s257_s12, %s257_s12 }
  0x20   : > { %p2048_p3 = scmp.lt.s32.totalorder %s2039_s23, %s2039_s23 }
  0x21   : > { %p2042_p5 = pnand %p2040_p2, %p2341_p8 }
  0x22   : > { %p2049_p7 = por %p2048_p3, %p2047_p1 }
  0x23   : > { %p2043_p4 = pneg %p2042_p5 }
  0x25   : > { %p2050_p9 = pnand %p2049_p7, %p2043_p4 }
  0x27   : > { %2053 = shalt.err (!%p2050_p9)
}
  0x28   : > { %s2229_s28 = smov [#allocation12]   ;;  %s2054_s29 = scalar_lea.vmem %s2332_s15, 16 }
  0x29   : > { %1949 = dma.vmem_to_smem (!%p2328_p6), %s257_s12, 16, %s2229_s28, [#allocation13]  }
  0x2a   : > { %p2055_p10 = scmp.ne.s32.totalorder %s2332_s15, %s2054_s29  ;;  %p2062_p13 = scmp.lt.s32.totalorder %s2332_s15, %s2332_s15 }
  0x2b   : > { %p2063_p0 = scmp.lt.s32.totalorder %s2054_s29, %s2054_s29 }
  0x2c   : > { %p2057_p11 = pnand %p2055_p10, %p2341_p8 }
  0x2d   : > { %p2064_p2 = por %p2063_p0, %p2062_p13 }
  0x2e   : > { %p2058_p12 = pneg %p2057_p11 }
  0x30   : > { %p2065_p1 = pnand %p2064_p2, %p2058_p12 }
  0x32   : > { %2068 = shalt.err (!%p2065_p1)
}
  0x33   : > { %s2230_s30 = smov [#allocation8]   ;;  %s2069_s10 = scalar_lea.vmem %s2337_s19, 16 }
  0x34   : > { %1940 = dma.vmem_to_smem (!%p2328_p6), %s2332_s15, 16, %s2230_s30, [#allocation7]  }
  0x35   : > { %p2070_p3 = scmp.ne.s32.totalorder %s2337_s19, %s2069_s10  ;;  %p2077_p7 = scmp.lt.s32.totalorder %s2337_s19, %s2337_s19 }
  0x36   : > { %p2078_p9 = scmp.lt.s32.totalorder %s2069_s10, %s2069_s10 }
  0x37   : > { %p2072_p4 = pnand %p2070_p3, %p2341_p8 }
  0x38   : > { %p2079_p10 = por %p2078_p9, %p2077_p7 }
  0x39   : > { %p2073_p5 = pneg %p2072_p4 }
  0x3b   : > { %p2080_p11 = pnand %p2079_p10, %p2073_p5 }
  0x3d   : > { %2083 = shalt.err (!%p2080_p11)
}
  0x3e   : > { %s2231_s11 = smov [#allocation11]   ;;  %s267_s14 = sshll.u32 %s3259_s5, 4  ;;  %s268_s14 = int_to_ptr.vmem [resolvable:$true] %s267_s14 }
  0x3f   : > { %1946 = dma.vmem_to_smem (!%p2328_p6), %s2337_s19, 16, %s2231_s11, [#allocation10]  }
  0x40   : > { %s278_s18 = sshll.u32 %s3260_s6, 4  ;;  %s2084_s20 = scalar_lea.vmem %s268_s14, 16  ;;  %s279_s18 = int_to_ptr.vmem [resolvable:$true] %s278_s18 }
  0x41   : > { %p2085_p12 = scmp.ne.s32.totalorder %s268_s14, %s2084_s20  ;;  %p2092_p2 = scmp.lt.s32.totalorder %s268_s14, %s268_s14 }
  0x42   : > { %p2093_p1 = scmp.lt.s32.totalorder %s2084_s20, %s2084_s20 }
  0x43   : > { %p2087_p13 = pnand %p2085_p12, %p2341_p8 }
  0x44   : > { %p2094_p3 = por %p2093_p1, %p2092_p2 }
  0x45   : > { %p2088_p0 = pneg %p2087_p13 }
  0x47   : > { %p2095_p4 = pnand %p2094_p3, %p2088_p0 }
  0x49   : > { %2098 = shalt.err (!%p2095_p4)
}
  0x4a   : > { %s2232_s19 = smov [#allocation14]   ;;  %s2099_s22 = scalar_lea.vmem %s279_s18, 16 }
  0x4b   : > { %1952 = dma.vmem_to_smem (!%p2328_p6), %s268_s14, 16, %s2232_s19, [#allocation13]  }
  0x4c   : > { %p2100_p5 = scmp.ne.s32.totalorder %s279_s18, %s2099_s22  ;;  %p2107_p10 = scmp.lt.s32.totalorder %s279_s18, %s279_s18 }
  0x4d   : > { %p2108_p11 = scmp.lt.s32.totalorder %s2099_s22, %s2099_s22 }
  0x4e   : > { %p2102_p7 = pnand %p2100_p5, %p2341_p8 }
  0x4f   : > { %p2109_p12 = por %p2108_p11, %p2107_p10 }
  0x50   : > { %p2103_p9 = pneg %p2102_p7 }
  0x52   : > { %p2110_p13 = pnand %p2109_p12, %p2103_p9 }
  0x54   : > { %2113 = shalt.err (!%p2110_p13)
}
  0x55   : > { %s2233_s23 = smov [#allocation15]   ;;  %s1769_s21 = sadd.s32 4294967294, %s2226_s27  }
  0x56   : > { %1955 = dma.vmem_to_smem (!%p2328_p6), %s279_s18, 16, %s2233_s23, [#allocation16]  }
  0x57   : > { %s2387_s28 = sadd.s32 1, %s2226_s27   ;;  %s34_s29 = sadd.s32 1, %s2222_s26 }
  0x58   : > { %s31_s16 = ssub.s32 %s2226_s27, %s2387_s28  ;;  %p41_p0 = scmp.ne.s32.totalorder %s2222_s26, %s2218_s25 }
  0x59   : > { %p32_p8 = scmp.eq.s32.totalorder %s31_s16, 0  ;;  %p42_p2 = scmp.eq.s32.totalorder %s2226_s27, 0 }
  0x5a   : > { %p47_p1 = scmp.ne.s32.totalorder %s2218_s25, %s2214_s24  ;;  %p3274_p4 = scmp.eq.s32.totalorder %s2308_s8, 0 }
  0x5b   : > { %s2398_s30 = scalar_select %p32_p8, %s2222_s26, %s34_s29  }
  0x5c   : > { %p2400_p3 = por %p42_p2, %p41_p0  ;;  %p2406_p6 = por %p3274_p4, %p47_p1 }
  0x5d   : > { %p197_p5 = scmp.eq.s32.totalorder %s2308_s8, 1  ;;  %p203_p7 = scmp.eq.s32.totalorder %s1769_s21, 1 }
  0x5e   : > { %p1970_p9 = scmp.lt.s32.totalorder %s2226_s27, 2  ;;  %s289_s12 = sand.u32 1, %s2222_s26  }
  0x5f   : > { %p2413_p10 = por %p197_p5, %p41_p0  ;;  %p2417_p11 = por %p203_p7, %p47_p1 }
  0x60   : > { %s1778_s15 = sshll.u32 %s289_s12, 6  ;;  %s1907_s17 = sshll.u32 %s2226_s27, 10 }
  0x61   : > { %s3276_s13 = scalar_select %p2413_p10, 1, 0 }
  0x62   : > { %s3277_s14 = scalar_select %p2417_p11, 1, 0 }
  0x63   : > { %s2425_s19 = scalar_lea.hbm %s3254_s0, %s1907_s17  ;;  %s293_s22 = scalar_lea.vmem [#allocation4], %s1778_s15 }
  0x64   : > { %s300_s23 = sshll.u32 %s293_s22, 4  ;;  %p2431_p12 = pnand %p1970_p9, %p2400_p3  ;;  %s2427_s23 = int_to_ptr.vmem [resolvable:$true] %s300_s23 }
  0x65   : > { %s2435_s16 = scalar_lea.sflag [#allocation5], %s289_s12  ;;  %s2114_s29 = scalar_lea.hbm %s2425_s19, 1024 }
  0x66   : > { %p2115_p13 = scmp.ne.s32.totalorder %s2425_s19, %s2114_s29  ;;  %p2116_p8 = pneg %p2431_p12 }
  0x67   : > { %s2119_s10 = scalar_lea.hbm %s3254_s0, 2048  ;;  %p2120_p1 = scmp.lt.u32.totalorder %s2425_s19, %s3254_s0 }
  0x68   : > { %p2117_p0 = pnand %p2116_p8, %p2115_p13  ;;  %p2121_p3 = scmp.lt.u32.totalorder %s2119_s10, %s2114_s29 }
  0x69   : > { %p2123_p5 = scmp.lt.u32.totalorder %s2114_s29, %s2425_s19 }
  0x6a   : > { %p2118_p2 = pneg %p2117_p0  ;;  %p2122_p4 = por %p2121_p3, %p2120_p1 }
  0x6c   : > { %p2124_p7 = por %p2123_p5, %p2122_p4 }
  0x6e   : > { %p2125_p9 = pnand %p2124_p7, %p2118_p2 }
  0x70   : > { %2128 = shalt.err (!%p2125_p9)
}
  0x71   : > { %s2129_s12 = scalar_lea.vmem %s2427_s23, 1024  ;;  %s2234_s22 = smov [#allocation4]  }
  0x72   : > { %p2130_p13 = scmp.ne.s32.totalorder %s2427_s23, %s2129_s12  ;;  %s2134_s15 = sshll.u32 %s2234_s22, 4  ;;  %s2135_s15 = int_to_ptr.vmem [resolvable:$false] %s2134_s15 }
  0x73   : > { %s2136_s17 = scalar_lea.vmem %s2135_s15, 2048  ;;  %p2137_p10 = scmp.lt.s32.totalorder %s2427_s23, %s2135_s15 }
  0x74   : > { %p2132_p0 = pnand %p2130_p13, %p2116_p8  ;;  %p2138_p1 = scmp.lt.s32.totalorder %s2136_s17, %s2129_s12 }
  0x76   : > { %p2133_p11 = pneg %p2132_p0  ;;  %p2139_p3 = por %p2138_p1, %p2137_p10 }
  0x78   : > { %p2140_p4 = pnand %p2139_p3, %p2133_p11 }
  0x7a   : > { %2143 = shalt.err (!%p2140_p4)
}
  0x7b   : > { %s2235_s29 = smov 128   ;;  %s2236_s10 = smov 8  }
  0x7c   : > { %1959 = dma.hbm_to_vmem [thread:$0]  (!%p2431_p12), %s2425_s19, 1024, %s2427_s23, %s2435_s16, %s2235_s29, %s2235_s29, %s2236_s10  }
  0x7d   : > { %p3279_p8 = scmp.ne.s32.totalorder %s3270_s9, 0 }
  0x7e   : > { %s2466_s18 = sand.u32 (!%p3279_p8), 1, %s2218_s25  }
  0x7f   : > { %312 = sbr.rel (%p3279_p8) target bundleno = 855 (0x357), region = 48  ;;  %s3265_s20 = sshll.u32 (!%p3279_p8), %s2466_s18, 6 }
  0x80   : > { %s315_s12 = scalar_lea.sflag (!%p3279_p8), [#allocation5], %s2466_s18  ;;  %s2472_s22 = scalar_lea.vmem (!%p3279_p8), [#allocation4], %s3265_s20 }
  0x86   : > { %2189 = dma.done.wait (%p2406_p6), %s315_s12, 1024  }
  0x87   : > { %2191 = vsyncadd (%p2406_p6), %s315_s12, 4294966272  ;;  %p3280_p10 = scmp.eq.s32.totalorder %s2308_s8, 0 }
  0x89   : > { %2193 = dma.done.wait (%p3280_p10), [#allocation7], 16   ;;  %p3281_p11 = pmov %p3280_p10 }
  0x8a   : > { %p3282_p12 = pmov %p3280_p10 }
  0x8b   : > { %2195 = vsyncadd (%p3281_p11), [#allocation7], 4294967280 }
  0x8c   : > { %2197 = dma.done.wait (%p3282_p12), [#allocation10], 32   ;;  %p3283_p2 = pmov %p3280_p10 }
  0x8e   : > { %2199 = vsyncadd (%p3283_p2), [#allocation10], 4294967264  ;;  %p3284_p5 = pmov %p3283_p2 }
  0x8f   : > { %p3285_p7 = pmov %p3283_p2 }
  0x90   : > { %2201 = dma.done.wait (%p3284_p5), [#allocation13], 32  }
  0x91   : > { %2203 = vsyncadd (%p3285_p7), [#allocation13], 4294967264  ;;  %p3286_p6 = pmov %p3283_p2 }
  0x92   : > { %p3287_p9 = pmov %p3283_p2 }
  0x93   : > { %2205 = dma.done.wait (%p3286_p6), [#allocation16], 16  }
  0x94   : > { %2207 = vsyncadd (%p3287_p9), [#allocation16], 4294967280 }
  0x95   : > { %347 = sfence }
  0x96   : > { %v445_v0 = vld [vmem:[%s2472_s22 + $0x10] sm:$0xff]  ;;  %v443_v1 = vld [vmem:[%s2472_s22] sm:$0xff]  ;;  %v2497_v2 = vld [vmem:[%s2472_s22 + $0x18] sm:$0xff]  ;;  %vm374_vm0 = vcmask 139264   ;;  %s2237_s9 = smov 1   ;;  %v2238_v8 = vmov 0.0  }
  0x97   : > { %v453_v3 = vmax.f32 %v445_v0, 0.0  ;;  %v451_v4 = vmax.f32 %v443_v1, 0.0  ;;  %v2500_v5 = vld [vmem:[%s2472_s22 + $0x8] sm:$0xff]  ;;  %v454_v6 = vmax.f32 %v2497_v2, 0.0  ;;  %376 = vst.msk [vmem:[#allocation2 + $0x18] sm:$0x1] %vm374_vm0, %v2238_v8 }
  0x98   : > { %v452_v7 = vmax.f32 %v2500_v5, 0.0  ;;  %vm383_vm1 = vcmask 7168   ;;  %vm397_vm2 = vcmask 146568   ;;  %375 = vst.msk [vmem:[#allocation2] sm:$0x1] %vm374_vm0, %v2238_v8  ;;  %v447_v9 = vld [vmem:[%s2472_s22 + $0x20] sm:$0xff] }
  0x99   : > { %471 = vrot.lane.b32.xlu1 %v453_v3, %s2237_s9  ;;  %467 = vrot.lane.b32.xlu0 %v451_v4, %s2237_s9  ;;  %377 = vst.msk [vmem:[#allocation2 + $0x30] sm:$0x1] %vm374_vm0, %v2238_v8  ;;  %378 = vst.msk [vmem:[#allocation2 + $0x48] sm:$0x1] %vm374_vm0, %v2238_v8  ;;  %v448_v10 = vld [vmem:[%s2472_s22 + $0x28] sm:$0xff]  ;;  %vm386_vm3 = vcmask 1024  }
  0x9a   : > { %379 = vst.msk [vmem:[#allocation2 + $0x11] sm:$0x1] %vm374_vm0, %v2238_v8  ;;  %380 = vst.msk [vmem:[#allocation2 + $0x29] sm:$0x1] %vm374_vm0, %v2238_v8  ;;  %vm400_vm4 = vcmask 140424   ;;  %v455_v11 = vmax.f32 %v447_v9, 0.0 }
  0x9b   : > { %381 = vst.msk [vmem:[#allocation2 + $0x41] sm:$0x1] %vm374_vm0, %v2238_v8  ;;  %382 = vst.msk [vmem:[#allocation2 + $0x59] sm:$0x1] %vm374_vm0, %v2238_v8  ;;  %v456_v12 = vmax.f32 %v448_v10, 0.0  ;;  %v449_v13 = vld [vmem:[%s2472_s22 + $0x30] sm:$0xff] }
  0x9c   : > { %411 = vst.msk [vmem:[#allocation3] sm:$0x1] %vm374_vm0, %v2238_v8  ;;  %412 = vst.msk [vmem:[#allocation3 + $0x18] sm:$0x1] %vm374_vm0, %v2238_v8  ;;  %v450_v14 = vld [vmem:[%s2472_s22 + $0x38] sm:$0xff]  ;;  %v457_v15 = vmax.f32 %v449_v13, 0.0 }
  0x9d   : > { %413 = vst.msk [vmem:[#allocation3 + $0x30] sm:$0x1] %vm374_vm0, %v2238_v8  ;;  %414 = vst.msk [vmem:[#allocation3 + $0x48] sm:$0x1] %vm374_vm0, %v2238_v8  ;;  %473 = vrot.lane.b32.xlu1 %v454_v6, %s2237_s9  ;;  %469 = vrot.lane.b32.xlu0 %v452_v7, %s2237_s9  ;;  %v458_v16 = vmax.f32 %v450_v14, 0.0  ;;  %vm491_vm5 = vcmask 138248  }
  0x9e   : > { %415 = vst.msk [vmem:[#allocation3 + $0x11] sm:$0x1] %vm374_vm0, %v2238_v8  ;;  %416 = vst.msk [vmem:[#allocation3 + $0x29] sm:$0x1] %vm374_vm0, %v2238_v8  ;;  %s1790_s11 = sld [smem:[#allocation8 + $0x1]]  ;;  %s2648_s19 = sld [smem:[#allocation8 + $0xa]] }
  0x9f   : > { %417 = vst.msk [vmem:[#allocation3 + $0x41] sm:$0x1] %vm374_vm0, %v2238_v8  ;;  %418 = vst.msk [vmem:[#allocation3 + $0x59] sm:$0x1] %vm374_vm0, %v2238_v8  ;;  %s2654_s23 = sld [smem:[#allocation8 + $0x2]]  ;;  %s2664_s21 = sld [smem:[#allocation8 + $0xb]] }
  0xa0   : > { %388 = vst.msk [vmem:[#allocation2 + $0x18] sm:$0xff] %vm383_vm1, %v2238_v8  ;;  %389 = vst.msk [vmem:[#allocation2 + $0x20] sm:$0xff] %vm383_vm1, %v2238_v8  ;;  %s3268_s16 = smov 127   ;;  %s2670_s15 = sld [smem:[#allocation8 + $0x13]]  ;;  %vm1532_vm6 = vcmask 130048  }
  0xa1   : > { %385 = vst.msk [vmem:[#allocation2 + $0x8] sm:$0xff] %vm383_vm1, %v2238_v8  ;;  %392 = vst.msk [vmem:[#allocation2 + $0x38] sm:$0xff] %vm383_vm1, %v2238_v8  ;;  %475 = vrot.lane.b32.xlu0 %v455_v11, %s2237_s9  ;;  %477 = vrot.lane.b32.xlu1 %v456_v12, %s2237_s9  ;;  %s1809_s17 = sld [smem:[#allocation8 + $0x14]]  ;;  %s3266_s29 = smov 126  }
  0xa2   : > { %395 = vst.msk [vmem:[#allocation2 + $0x50] sm:$0xff] %vm383_vm1, %v2238_v8  ;;  %420 = vst.msk [vmem:[#allocation3 + $0x8] sm:$0xff] %vm383_vm1, %v2238_v8  ;;  %s1817_s10 = sld [smem:[#allocation8 + $0x1c]]  ;;  %s1802_s22 = sld [smem:[#allocation8 + $0xd]] }
  0xa3   : > { %423 = vst.msk [vmem:[#allocation3 + $0x20] sm:$0xff] %vm383_vm1, %v2238_v8  ;;  %426 = vst.msk [vmem:[#allocation3 + $0x38] sm:$0xff] %vm383_vm1, %v2238_v8  ;;  %s1793_s12 = sld [smem:[#allocation8 + $0x4]]  ;;  %s2875_s20 = sld [smem:[#allocation9 + $0x6]] }
  0xa4   : > { %429 = vst.msk [vmem:[#allocation3 + $0x50] sm:$0xff] %vm383_vm1, %v2238_v8  ;;  %384 = vst.msk [vmem:[#allocation2] sm:$0xff] %vm383_vm1, %v2238_v8  ;;  %v507_v21 = vstv %s1790_s11  ;;  %v614_v24 = vstv %s2648_s19  ;;  %s1818_s11 = sld [smem:[#allocation8 + $0x1d]]  ;;  %p3291_p0 = scmp.ne.s32.totalorder %s3276_s13, 0 }
  0xa5   : > { %391 = vst.msk [vmem:[#allocation2 + $0x30] sm:$0xff] %vm383_vm1, %v2238_v8  ;;  %394 = vst.msk [vmem:[#allocation2 + $0x48] sm:$0xff] %vm383_vm1, %v2238_v8  ;;  %479 = vrot.lane.b32.xlu0 %v457_v15, %s2237_s9  ;;  %481 = vrot.lane.b32.xlu1 %v458_v16, %s2237_s9  ;;  %v521_v34 = vstv %s2654_s23  ;;  %v628_v37 = vstv %s2664_s21  ;;  %s1794_s19 = sld [smem:[#allocation8 + $0x5]]  ;;  %s1803_s23 = sld [smem:[#allocation8 + $0xe]] }
  0xa6   : > { %419 = vst.msk [vmem:[#allocation3] sm:$0xff] %vm383_vm1, %v2238_v8  ;;  %422 = vst.msk [vmem:[#allocation3 + $0x18] sm:$0xff] %vm383_vm1, %v2238_v8  ;;  %v721_v39 = vstv %s2670_s15  ;;  %s1811_s21 = sld [smem:[#allocation8 + $0x16]]  ;;  %s1812_s15 = sld [smem:[#allocation8 + $0x17]] }
  0xa7   : > { %425 = vst.msk [vmem:[#allocation3 + $0x30] sm:$0xff] %vm383_vm1, %v2238_v8  ;;  %428 = vst.msk [vmem:[#allocation3 + $0x48] sm:$0xff] %vm383_vm1, %v2238_v8  ;;  %v735_v44 = vstv %s1809_s17  ;;  %s1820_s17 = sld [smem:[#allocation8 + $0x1f]] }
  0xa8   : > { %402 = vst.msk [vmem:[#allocation2 + $0x18] sm:$0xff] %vm397_vm2, %v2238_v8  ;;  %403 = vst.msk [vmem:[#allocation2 + $0x20] sm:$0xff] %vm397_vm2, %v2238_v8  ;;  %v828_v49 = vstv %s1817_s10  ;;  %v650_v59 = vstv %s1802_s22  ;;  %s1796_s10 = sld [smem:[#allocation8 + $0x7]]  ;;  %s1821_s22 = sld [smem:[#allocation8 + $0x20]] }
  0xa9   : > { %398 = vst.msk [vmem:[#allocation2] sm:$0xff] %vm397_vm2, %v2238_v8  ;;  %399 = vst.msk [vmem:[#allocation2 + $0x8] sm:$0xff] %vm397_vm2, %v2238_v8  ;;  %v543_v54 = vstv %s1793_s12  ;;  %s1805_s12 = sld [smem:[#allocation8 + $0x10]] }
  0xaa   : > { %406 = vst.msk [vmem:[#allocation2 + $0x38] sm:$0xff] %vm397_vm2, %v2238_v8  ;;  %409 = vst.msk [vmem:[#allocation2 + $0x50] sm:$0xff] %vm397_vm2, %v2238_v8  ;;  %v842_v63 = vstv %s1818_s11  ;;  %s1797_s11 = sld [smem:[#allocation8 + $0x8]] }
  0xab   : > { %432 = vst.msk [vmem:[#allocation3 + $0x8] sm:$0xff] %vm397_vm2, %v2238_v8  ;;  %435 = vst.msk [vmem:[#allocation3 + $0x20] sm:$0xff] %vm397_vm2, %v2238_v8  ;;  %v557_v2 = vstv %s1794_s19  ;;  %v664_v5 = vstv %s1803_s23  ;;  %s1806_s19 = sld [smem:[#allocation8 + $0x11]] }
  0xac   : > { %438 = vst.msk [vmem:[#allocation3 + $0x38] sm:$0xff] %vm397_vm2, %v2238_v8  ;;  %441 = vst.msk [vmem:[#allocation3 + $0x50] sm:$0xff] %vm397_vm2, %v2238_v8  ;;  %v757_v9 = vstv %s1811_s21  ;;  %v771_v13 = vstv %s1812_s15  ;;  %s1814_s23 = sld [smem:[#allocation8 + $0x19]]  ;;  %s1815_s21 = sld [smem:[#allocation8 + $0x1a]] }
  0xad   : > { %390 = vst.msk [vmem:[#allocation2 + $0x28] sm:$0x3] %vm386_vm3, %v2238_v8  ;;  %387 = vst.msk [vmem:[#allocation2 + $0x10] sm:$0x3] %vm386_vm3, %v2238_v8  ;;  %s1823_s15 = sld [smem:[#allocation8 + $0x22]] }
  0xae   : > { %393 = vst.msk [vmem:[#allocation2 + $0x40] sm:$0x3] %vm386_vm3, %v2238_v8  ;;  %396 = vst.msk [vmem:[#allocation2 + $0x58] sm:$0x3] %vm386_vm3, %v2238_v8 }
  0xaf   : > { %405 = vst.msk [vmem:[#allocation2 + $0x30] sm:$0xff] %vm397_vm2, %v2238_v8  ;;  %408 = vst.msk [vmem:[#allocation2 + $0x48] sm:$0xff] %vm397_vm2, %v2238_v8 }
  0xb0   : > { %421 = vst.msk [vmem:[#allocation3 + $0x10] sm:$0x3] %vm386_vm3, %v2238_v8  ;;  %424 = vst.msk [vmem:[#allocation3 + $0x28] sm:$0x3] %vm386_vm3, %v2238_v8 }
  0xb1   : > { %427 = vst.msk [vmem:[#allocation3 + $0x40] sm:$0x3] %vm386_vm3, %v2238_v8  ;;  %430 = vst.msk [vmem:[#allocation3 + $0x58] sm:$0x3] %vm386_vm3, %v2238_v8 }
  0xb2   : > { %431 = vst.msk [vmem:[#allocation3] sm:$0xff] %vm397_vm2, %v2238_v8  ;;  %434 = vst.msk [vmem:[#allocation3 + $0x18] sm:$0xff] %vm397_vm2, %v2238_v8 }
  0xb3   : > { %437 = vst.msk [vmem:[#allocation3 + $0x30] sm:$0xff] %vm397_vm2, %v2238_v8  ;;  %440 = vst.msk [vmem:[#allocation3 + $0x48] sm:$0xff] %vm397_vm2, %v2238_v8 }
  0xb4   : > { %404 = vst.msk [vmem:[#allocation2 + $0x28] sm:$0x3] %vm400_vm4, %v2238_v8  ;;  %401 = vst.msk [vmem:[#allocation2 + $0x10] sm:$0x3] %vm400_vm4, %v2238_v8 }
  0xb5   : > { %407 = vst.msk [vmem:[#allocation2 + $0x40] sm:$0x3] %vm400_vm4, %v2238_v8  ;;  %410 = vst.msk [vmem:[#allocation2 + $0x58] sm:$0x3] %vm400_vm4, %v2238_v8 }
  0xb6   : > { %433 = vst.msk [vmem:[#allocation3 + $0x10] sm:$0x3] %vm400_vm4, %v2238_v8  ;;  %436 = vst.msk [vmem:[#allocation3 + $0x28] sm:$0x3] %vm400_vm4, %v2238_v8 }
  0xb7   : > { %439 = vst.msk [vmem:[#allocation3 + $0x40] sm:$0x3] %vm400_vm4, %v2238_v8  ;;  %442 = vst.msk [vmem:[#allocation3 + $0x58] sm:$0x3] %vm400_vm4, %v2238_v8 }
 0x10b   : > { %v472_v17 = vpop.permute.xlu1 %471  ;;  %v468_v18 = vpop.permute.xlu0 %467 }
 0x10c   : > { %494 = vst.msk [vmem:[#allocation2 + $0x19] sm:$0xff] %vm491_vm5, %v472_v17  ;;  %492 = vst.msk [vmem:[#allocation2 + $0x1] sm:$0xff] %vm491_vm5, %v468_v18  ;;  %v864_v17 = vstv %s1820_s17  ;;  %s1824_s17 = sld [smem:[#allocation8 + $0x23]] }
 0x10f   : > { %v474_v19 = vpop.permute.xlu1 %473  ;;  %v470_v20 = vpop.permute.xlu0 %469 }
 0x110   : > { %495 = vst.msk [vmem:[#allocation2 + $0x21] sm:$0xff] %vm491_vm5, %v474_v19  ;;  %493 = vst.msk [vmem:[#allocation2 + $0x9] sm:$0xff] %vm491_vm5, %v470_v20 }
 0x113   : > { %v2656_v22 = vld [vmem:[#allocation2] sm:$0xff]  ;;  %v2658_v23 = vld [vmem:[#allocation2 + $0x18] sm:$0xff]  ;;  %v476_v25 = vpop.permute.xlu0 %475  ;;  %v478_v26 = vpop.permute.xlu1 %477 }
 0x114   : > { %v508_v27 = vmul.f32 %v507_v21, %v2656_v22  ;;  %496 = vst.msk [vmem:[#allocation2 + $0x31] sm:$0xff] %vm491_vm5, %v476_v25  ;;  %497 = vst.msk [vmem:[#allocation2 + $0x39] sm:$0xff] %vm491_vm5, %v478_v26  ;;  %v615_v28 = vmul.f32 %v614_v24, %v2658_v23  ;;  %v522_v36 = vmul.f32 %v521_v34, %v2656_v22  ;;  %v2708_v53 = vld [vmem:[#allocation2 + $0x1] sm:$0xff]  ;;  %v2716_v58 = vld [vmem:[#allocation2 + $0x19] sm:$0xff] }
 0x115   : > { %v629_v41 = vmul.f32 %v628_v37, %v2658_v23  ;;  %v544_v56 = vmul.f32 %v543_v54, %v2708_v53  ;;  %v651_v61 = vmul.f32 %v650_v59, %v2716_v58  ;;  %v558_v4 = vmul.f32 %v557_v2, %v2708_v53 }
 0x116   : > { %512 = vrot.lane.b32.xlu0 %v508_v27, %s3268_s16  ;;  %v665_v7 = vmul.f32 %v664_v5, %v2716_v58 }
 0x117   : > { %v2668_v29 = vld [vmem:[#allocation2 + $0x8] sm:$0xff]  ;;  %v480_v30 = vpop.permute.xlu0 %479  ;;  %v482_v31 = vpop.permute.xlu1 %481  ;;  %v2675_v33 = vld [vmem:[#allocation2 + $0x20] sm:$0xff] }
 0x118   : > { %v509_v32 = vmul.f32 %v507_v21, %v2668_v29  ;;  %498 = vst.msk [vmem:[#allocation2 + $0x49] sm:$0xff] %vm491_vm5, %v480_v30  ;;  %499 = vst.msk [vmem:[#allocation2 + $0x51] sm:$0xff] %vm491_vm5, %v482_v31  ;;  %v616_v35 = vmul.f32 %v614_v24, %v2675_v33  ;;  %v523_v40 = vmul.f32 %v521_v34, %v2668_v29  ;;  %v2714_v57 = vld [vmem:[#allocation2 + $0x9] sm:$0xff]  ;;  %v2722_v62 = vld [vmem:[#allocation2 + $0x21] sm:$0xff]  ;;  %v579_v24 = vstv %s1796_s10  ;;  %s502_s10 = sld [smem:[#allocation8]] }
 0x119   : > { %v630_v45 = vmul.f32 %v628_v37, %v2675_v33  ;;  %v545_v60 = vmul.f32 %v543_v54, %v2714_v57  ;;  %v652_v0 = vmul.f32 %v650_v59, %v2722_v62  ;;  %v559_v6 = vmul.f32 %v557_v2, %v2714_v57  ;;  %v2756_v21 = vld [vmem:[#allocation2 + $0x2] sm:$0xff]  ;;  %v2762_v27 = vld [vmem:[#allocation2 + $0xa] sm:$0xff] }
 0x11a   : > { %514 = vrot.lane.b32.xlu1 %v509_v32, %s3268_s16  ;;  %619 = vrot.lane.b32.xlu0 %v615_v28, %s3268_s16  ;;  %v666_v10 = vmul.f32 %v664_v5, %v2722_v62  ;;  %v580_v26 = vmul.f32 %v579_v24, %v2756_v21  ;;  %v2764_v28 = vld [vmem:[#allocation2 + $0x1a] sm:$0xff]  ;;  %v686_v30 = vstv %s1805_s12  ;;  %v581_v31 = vmul.f32 %v579_v24, %v2762_v27  ;;  %v2770_v34 = vld [vmem:[#allocation2 + $0x22] sm:$0xff]  ;;  %s1798_s12 = sld [smem:[#allocation8 + $0x9]] }
 0x11b   : > { %v2685_v38 = vld [vmem:[#allocation2 + $0x30] sm:$0xff]  ;;  %v2693_v43 = vld [vmem:[#allocation2 + $0x38] sm:$0xff]  ;;  %v687_v32 = vmul.f32 %v686_v30, %v2764_v28  ;;  %v807_v54 = vstv %s1815_s21  ;;  %s1816_s21 = sld [smem:[#allocation8 + $0x1b]] }
 0x11c   : > { %v722_v42 = vmul.f32 %v721_v39, %v2685_v38  ;;  %v723_v46 = vmul.f32 %v721_v39, %v2693_v43  ;;  %v736_v47 = vmul.f32 %v735_v44, %v2685_v38  ;;  %v737_v52 = vmul.f32 %v735_v44, %v2693_v43  ;;  %v2736_v8 = vld [vmem:[#allocation2 + $0x31] sm:$0xff]  ;;  %v2742_v12 = vld [vmem:[#allocation2 + $0x39] sm:$0xff] }
 0x11d   : > { %v758_v11 = vmul.f32 %v757_v9, %v2736_v8  ;;  %v759_v14 = vmul.f32 %v757_v9, %v2742_v12  ;;  %v772_v15 = vmul.f32 %v771_v13, %v2736_v8  ;;  %v773_v18 = vmul.f32 %v771_v13, %v2742_v12 }
 0x11e   : > { %621 = vrot.lane.b32.xlu1 %v616_v35, %s3268_s16  ;;  %526 = vrot.lane.b32.xlu0 %v522_v36, %s3266_s29  ;;  %v878_v35 = vstv %s1821_s22  ;;  %v688_v36 = vmul.f32 %v686_v30, %v2770_v34  ;;  %v593_v39 = vstv %s1797_s11  ;;  %s1792_s22 = sld [smem:[#allocation8 + $0x3]]  ;;  %s2812_s11 = sld [smem:[#allocation8 + $0xc]] }
 0x11f   : > { %v2700_v48 = vld [vmem:[#allocation2 + $0x48] sm:$0xff]  ;;  %v2705_v51 = vld [vmem:[#allocation2 + $0x50] sm:$0xff]  ;;  %v595_v44 = vmul.f32 %v593_v39, %v2762_v27 }
 0x120   : > { %v829_v50 = vmul.f32 %v828_v49, %v2700_v48  ;;  %v830_v55 = vmul.f32 %v828_v49, %v2705_v51  ;;  %v843_v1 = vmul.f32 %v842_v63, %v2700_v48  ;;  %v844_v3 = vmul.f32 %v842_v63, %v2705_v51  ;;  %v2748_v16 = vld [vmem:[#allocation2 + $0x49] sm:$0xff]  ;;  %v2754_v20 = vld [vmem:[#allocation2 + $0x51] sm:$0xff] }
 0x121   : > { %v865_v19 = vmul.f32 %v864_v17, %v2748_v16  ;;  %v866_v25 = vmul.f32 %v864_v17, %v2754_v20  ;;  %v879_v37 = vmul.f32 %v878_v35, %v2748_v16  ;;  %v2796_v59 = vld [vmem:[#allocation2 + $0x4a] sm:$0xff] }
 0x122   : > { %528 = vrot.lane.b32.xlu1 %v523_v40, %s3266_s29  ;;  %633 = vrot.lane.b32.xlu0 %v629_v41, %s3266_s29  ;;  %v880_v40 = vmul.f32 %v878_v35, %v2754_v20  ;;  %v594_v41 = vmul.f32 %v593_v39, %v2756_v21 }
 0x124   : > { %v537_v13 = vstv %s1792_s22  ;;  %s2851_s22 = sld [smem:[#allocation8 + $0x21]] }
 0x126   : > { %635 = vrot.lane.b32.xlu1 %v630_v45, %s3266_s29  ;;  %726 = vrot.lane.b32.xlu0 %v722_v42, %s3268_s16  ;;  %v700_v42 = vstv %s1806_s19  ;;  %s2815_s19 = sld [smem:[#allocation8 + $0x12]] }
 0x127   : > { %v701_v45 = vmul.f32 %v700_v42, %v2764_v28  ;;  %v702_v49 = vmul.f32 %v700_v42, %v2770_v34 }
 0x12a   : > { %728 = vrot.lane.b32.xlu1 %v723_v46, %s3268_s16  ;;  %740 = vrot.lane.b32.xlu0 %v736_v47, %s3266_s29  ;;  %v2784_v46 = vld [vmem:[#allocation2 + $0x32] sm:$0xff]  ;;  %v793_v47 = vstv %s1814_s23  ;;  %s2821_s23 = sld [smem:[#allocation8 + $0x15]] }
 0x12e   : > { %742 = vrot.lane.b32.xlu1 %v737_v52, %s3266_s29  ;;  %833 = vrot.lane.b32.xlu0 %v829_v50, %s3268_s16  ;;  %v794_v50 = vmul.f32 %v793_v47, %v2784_v46  ;;  %v2790_v52 = vld [vmem:[#allocation2 + $0x3a] sm:$0xff] }
 0x132   : > { %835 = vrot.lane.b32.xlu1 %v830_v55, %s3268_s16  ;;  %548 = vrot.lane.b32.xlu0 %v544_v56, %s3268_s16  ;;  %v795_v55 = vmul.f32 %v793_v47, %v2790_v52  ;;  %v808_v56 = vmul.f32 %v807_v54, %v2784_v46 }
 0x136   : > { %550 = vrot.lane.b32.xlu1 %v545_v60, %s3268_s16  ;;  %655 = vrot.lane.b32.xlu0 %v651_v61, %s3268_s16  ;;  %v900_v60 = vstv %s1823_s15  ;;  %v809_v61 = vmul.f32 %v807_v54, %v2790_v52  ;;  %v751_v54 = vstv %s2821_s23  ;;  %s1819_s15 = sld [smem:[#allocation8 + $0x1e]]  ;;  %s2860_s23 = sld [smem:[#allocation9 + $0x8]] }
 0x137   : > { %v901_v63 = vmul.f32 %v900_v60, %v2796_v59 }
 0x13a   : > { %657 = vrot.lane.b32.xlu1 %v652_v0, %s3268_s16  ;;  %847 = vrot.lane.b32.xlu0 %v843_v1, %s3266_s29  ;;  %v2802_v0 = vld [vmem:[#allocation2 + $0x52] sm:$0xff]  ;;  %v914_v1 = vstv %s1824_s17  ;;  %s2833_s17 = sld [smem:[#allocation8 + $0x6]] }
 0x13b   : > { %v902_v2 = vmul.f32 %v900_v60, %v2802_v0 }
 0x13e   : > { %849 = vrot.lane.b32.xlu1 %v844_v3, %s3266_s29  ;;  %562 = vrot.lane.b32.xlu0 %v558_v4, %s3266_s29  ;;  %v915_v3 = vmul.f32 %v914_v1, %v2796_v59  ;;  %v916_v4 = vmul.f32 %v914_v1, %v2802_v0 }
 0x142   : > { %564 = vrot.lane.b32.xlu1 %v559_v6, %s3266_s29  ;;  %669 = vrot.lane.b32.xlu0 %v665_v7, %s3266_s29  ;;  %v503_v6 = vstv %s502_s10  ;;  %s2836_s10 = sld [smem:[#allocation8 + $0xf]] }
 0x146   : > { %671 = vrot.lane.b32.xlu1 %v666_v10, %s3266_s29  ;;  %762 = vrot.lane.b32.xlu0 %v758_v11, %s3268_s16  ;;  %v504_v10 = vmul.f32 %v503_v6, %v2656_v22  ;;  %v610_v11 = vstv %s1798_s12  ;;  %s1813_s12 = sld [smem:[#allocation8 + $0x18]] }
 0x147   : > { %v611_v24 = vmul.f32 %v610_v11, %v2658_v23  ;;  %v717_v23 = vstv %s2815_s19  ;;  %s2857_s19 = sld [smem:[#allocation9 + $0x4]] }
 0x148   : > { %v719_v60 = vmul.f32 %v717_v23, %v2693_v43 }
 0x14a   : > { %764 = vrot.lane.b32.xlu1 %v759_v14, %s3268_s16  ;;  %776 = vrot.lane.b32.xlu0 %v772_v15, %s3266_s29 }
 0x14e   : > { %778 = vrot.lane.b32.xlu1 %v773_v18, %s3266_s29  ;;  %869 = vrot.lane.b32.xlu0 %v865_v19, %s3268_s16  ;;  %v644_v18 = vstv %s2812_s11  ;;  %v505_v19 = vmul.f32 %v503_v6, %v2668_v29  ;;  %v539_v29 = vmul.f32 %v537_v13, %v2714_v57  ;;  %v752_v57 = vmul.f32 %v751_v54, %v2736_v8  ;;  %s2855_s11 = sld [smem:[#allocation9]] }
 0x152   : > { %871 = vrot.lane.b32.xlu1 %v866_v25, %s3268_s16  ;;  %584 = vrot.lane.b32.xlu0 %v580_v26, %s3268_s16  ;;  %v538_v26 = vmul.f32 %v537_v13, %v2708_v53 }
 0x156   : > { %586 = vrot.lane.b32.xlu1 %v581_v31, %s3268_s16  ;;  %691 = vrot.lane.b32.xlu0 %v687_v32, %s3268_s16 }
 0x15a   : > { %693 = vrot.lane.b32.xlu1 %v688_v36, %s3268_s16  ;;  %883 = vrot.lane.b32.xlu0 %v879_v37, %s3266_s29  ;;  %v645_v36 = vmul.f32 %v644_v18, %v2716_v58  ;;  %v612_v37 = vmul.f32 %v610_v11, %v2675_v33 }
 0x15e   : > { %885 = vrot.lane.b32.xlu1 %v880_v40, %s3266_s29  ;;  %598 = vrot.lane.b32.xlu0 %v594_v41, %s3266_s29 }
 0x162   : > { %600 = vrot.lane.b32.xlu1 %v595_v44, %s3266_s29  ;;  %705 = vrot.lane.b32.xlu0 %v701_v45, %s3266_s29 }
 0x166   : > { %707 = vrot.lane.b32.xlu1 %v702_v49, %s3266_s29  ;;  %798 = vrot.lane.b32.xlu0 %v794_v50, %s3268_s16  ;;  %v718_v49 = vmul.f32 %v717_v23, %v2685_v38  ;;  %v646_v50 = vmul.f32 %v644_v18, %v2722_v62  ;;  %v753_v38 = vmul.f32 %v751_v54, %v2742_v12  ;;  %v573_v18 = vstv %s2833_s17  ;;  %s2866_s17 = sld [smem:[#allocation9 + $0x5]] }
 0x16a   : > { %800 = vrot.lane.b32.xlu1 %v795_v55, %s3268_s16  ;;  %812 = vrot.lane.b32.xlu0 %v808_v56, %s3266_s29 }
 0x16e   : > { %814 = vrot.lane.b32.xlu1 %v809_v61, %s3266_s29  ;;  %905 = vrot.lane.b32.xlu0 %v901_v63, %s3268_s16 }
 0x172   : > { %907 = vrot.lane.b32.xlu1 %v902_v2, %s3268_s16  ;;  %919 = vrot.lane.b32.xlu0 %v915_v3, %s3266_s29  ;;  %s2888_s16 = sld [smem:[#allocation9 + $0xe]] }
 0x176   : > { %921 = vrot.lane.b32.xlu1 %v916_v4, %s3266_s29  ;;  %s2886_s29 = sld [smem:[#allocation9 + $0xa]] }
 0x188   : > { %v513_v5 = vpop.permute.xlu0 %512 }
 0x189   : > { %v518_v14 = vadd.f32 %v513_v5, %v504_v10  ;;  %v858_v10 = vstv %s1819_s15  ;;  %s2864_s15 = sld [smem:[#allocation9 + $0x1]] }
 0x18c   : > { %v515_v7 = vpop.permute.xlu1 %514  ;;  %v620_v9 = vpop.permute.xlu0 %619 }
 0x18d   : > { %v519_v30 = vadd.f32 %v515_v7, %v505_v19  ;;  %v625_v22 = vadd.f32 %v620_v9, %v611_v24  ;;  %v824_v7 = vstv %s1816_s21  ;;  %s2862_s21 = sld [smem:[#allocation9 + $0xc]] }
 0x18e   : > { %v825_v8 = vmul.f32 %v824_v7, %v2700_v48  ;;  %v826_v12 = vmul.f32 %v824_v7, %v2705_v51 }
 0x190   : > { %v622_v15 = vpop.permute.xlu1 %621  ;;  %v527_v17 = vpop.permute.xlu0 %526 }
 0x191   : > { %v532_v25 = vadd.f32 %v527_v17, %v518_v14  ;;  %v626_v41 = vadd.f32 %v622_v15, %v612_v37  ;;  %v859_v17 = vmul.f32 %v858_v10, %v2748_v16 }
 0x193   : > { %v540_v31 = vadd.f32 %v538_v26, %v532_v25 }
 0x194   : > { %v529_v32 = vpop.permute.xlu1 %528  ;;  %v634_v35 = vpop.permute.xlu0 %633 }
 0x195   : > { %v533_v39 = vadd.f32 %v529_v32, %v519_v30  ;;  %v639_v40 = vadd.f32 %v634_v35, %v625_v22  ;;  %v860_v32 = vmul.f32 %v858_v10, %v2754_v20  ;;  %v574_v35 = vmul.f32 %v573_v18, %v2756_v21 }
 0x197   : > { %v541_v42 = vadd.f32 %v539_v29, %v533_v39  ;;  %v647_v53 = vadd.f32 %v645_v36, %v639_v40  ;;  %v680_v36 = vstv %s2836_s10  ;;  %s2868_s10 = sld [smem:[#allocation9 + $0x9]] }
 0x198   : > { %v636_v44 = vpop.permute.xlu1 %635  ;;  %v727_v45 = vpop.permute.xlu0 %726  ;;  %v682_v54 = vmul.f32 %v680_v36, %v2770_v34 }
 0x199   : > { %v640_v47 = vadd.f32 %v636_v44, %v626_v41  ;;  %v732_v55 = vadd.f32 %v727_v45, %v718_v49  ;;  %v681_v44 = vmul.f32 %v680_v36, %v2764_v28 }
 0x19b   : > { %v648_v58 = vadd.f32 %v646_v50, %v640_v47 }
 0x19c   : > { %v729_v56 = vpop.permute.xlu1 %728  ;;  %v741_v33 = vpop.permute.xlu0 %740 }
 0x19d   : > { %v746_v61 = vadd.f32 %v741_v33, %v732_v55  ;;  %v733_v63 = vadd.f32 %v729_v56, %v719_v60 }
 0x19f   : > { %v754_v1 = vadd.f32 %v752_v57, %v746_v61 }
 0x1a0   : > { %v743_v2 = vpop.permute.xlu1 %742  ;;  %v834_v3 = vpop.permute.xlu0 %833 }
 0x1a1   : > { %v747_v4 = vadd.f32 %v743_v2, %v733_v63  ;;  %v839_v11 = vadd.f32 %v834_v3, %v825_v8 }
 0x1a3   : > { %v755_v62 = vadd.f32 %v753_v38, %v747_v4 }
 0x1a4   : > { %v836_v5 = vpop.permute.xlu1 %835  ;;  %v549_v6 = vpop.permute.xlu0 %548 }
 0x1a5   : > { %v840_v19 = vadd.f32 %v836_v5, %v826_v12  ;;  %v554_v24 = vadd.f32 %v549_v6, %v540_v31  ;;  %v575_v31 = vmul.f32 %v573_v18, %v2762_v27  ;;  %v966_v12 = vstv %s2857_s19  ;;  %s2903_s19 = sld [smem:[#allocation9 + $0xb]] }
 0x1a6   : > { %v1005_v18 = vstv %s2860_s23  ;;  %s2905_s23 = sld [smem:[#allocation9 + $0xf]] }
 0x1a8   : > { %v551_v43 = vpop.permute.xlu1 %550  ;;  %v656_v9 = vpop.permute.xlu0 %655 }
 0x1a9   : > { %v555_v37 = vadd.f32 %v551_v43, %v541_v42  ;;  %v661_v39 = vadd.f32 %v656_v9, %v647_v53  ;;  %v787_v42 = vstv %s1813_s12  ;;  %s2870_s12 = sld [smem:[#allocation9 + $0xd]] }
 0x1aa   : > { %v788_v61 = vmul.f32 %v787_v42, %v2784_v46  ;;  %v789_v2 = vmul.f32 %v787_v42, %v2790_v52  ;;  %v894_v46 = vstv %s2851_s22  ;;  %s2873_s22 = sld [smem:[#allocation9 + $0x2]] }
 0x1ab   : > { %v895_v7 = vmul.f32 %v894_v46, %v2796_v59  ;;  %v896_v59 = vmul.f32 %v894_v46, %v2802_v0 }
 0x1ac   : > { %v658_v13 = vpop.permute.xlu1 %657  ;;  %v848_v14 = vpop.permute.xlu0 %847 }
 0x1ad   : > { %v853_v15 = vadd.f32 %v848_v14, %v839_v11  ;;  %v662_v45 = vadd.f32 %v658_v13, %v648_v58  ;;  %v928_v14 = vstv %s2855_s11  ;;  %s2899_s11 = sld [smem:[#allocation9 + $0x7]] }
 0x1af   : > { %v861_v25 = vadd.f32 %v859_v17, %v853_v15  ;;  %v1048_v0 = vstv %s2870_s12  ;;  %s2934_s12 = sld [smem:[#allocation12 + $0x4]] }
 0x1b0   : > { %v850_v26 = vpop.permute.xlu1 %849  ;;  %v563_v30 = vpop.permute.xlu0 %562 }
 0x1b1   : > { %v854_v22 = vadd.f32 %v850_v26, %v840_v19  ;;  %v568_v48 = vadd.f32 %v563_v30, %v554_v24  ;;  %v1044_v24 = vstv %s2862_s21  ;;  %v932_v26 = vstv %s2864_s15  ;;  %s2918_s21 = sld [smem:[#allocation11 + $0x2]]  ;;  %s1842_s15 = sld [smem:[#allocation11 + $0x3]] }
 0x1b2   : > { %v970_v30 = vstv %s2866_s17  ;;  %s1843_s17 = sld [smem:[#allocation12 + $0x1]] }
 0x1b3   : > { %v862_v51 = vadd.f32 %v860_v32, %v854_v22  ;;  %v576_v40 = vadd.f32 %v574_v35, %v568_v48  ;;  %v1009_v35 = vstv %s2868_s10  ;;  %s1844_s10 = sld [smem:[#allocation12 + $0x2]] }
 0x1b4   : > { %v565_v29 = vpop.permute.xlu1 %564  ;;  %v670_v16 = vpop.permute.xlu0 %669 }
 0x1b5   : > { %v569_v23 = vadd.f32 %v565_v29, %v555_v37  ;;  %v675_v41 = vadd.f32 %v670_v16, %v661_v39  ;;  %v938_v39 = vstv %s2873_s22  ;;  %s3288_s22 = smov 127  }
 0x1b7   : > { %v577_v47 = vadd.f32 %v575_v31, %v569_v23  ;;  %v683_v49 = vadd.f32 %v681_v44, %v675_v41 }
 0x1b8   : > { %v672_v20 = vpop.permute.xlu1 %671  ;;  %v763_v50 = vpop.permute.xlu0 %762 }
 0x1b9   : > { %v676_v21 = vadd.f32 %v672_v20, %v662_v45  ;;  %v768_v53 = vadd.f32 %v763_v50, %v754_v1 }
 0x1bb   : > { %v684_v55 = vadd.f32 %v682_v54, %v676_v21 }
 0x1bc   : > { %v765_v56 = vpop.permute.xlu1 %764  ;;  %v777_v33 = vpop.permute.xlu0 %776 }
 0x1bd   : > { %v782_v60 = vadd.f32 %v777_v33, %v768_v53  ;;  %v769_v57 = vadd.f32 %v765_v56, %v755_v62 }
 0x1bf   : > { %v2848_v27 = vadd.f32 %v788_v61, %v782_v60 }
 0x1c0   : > { %v779_v28 = vpop.permute.xlu1 %778  ;;  %v870_v58 = vpop.permute.xlu0 %869 }
 0x1c1   : > { %v783_v63 = vadd.f32 %v779_v28, %v769_v57  ;;  %v875_v62 = vadd.f32 %v870_v58, %v861_v25 }
 0x1c3   : > { %v2853_v34 = vadd.f32 %v789_v2, %v783_v63  ;;  %v1015_v2 = vstv %s2886_s29  ;;  %s2911_s29 = sld [smem:[#allocation11 + $0x1]] }
 0x1c4   : > { %v872_v1 = vpop.permute.xlu1 %871  ;;  %v585_v3 = vpop.permute.xlu0 %584 }
 0x1c5   : > { %v876_v43 = vadd.f32 %v872_v1, %v862_v51  ;;  %v590_v11 = vadd.f32 %v585_v3, %v576_v40  ;;  %v976_v51 = vstv %s2875_s20  ;;  %s2897_s20 = sld [smem:[#allocation9 + $0x3]]  ;;  %v1054_v1 = vstv %s2888_s16  ;;  %s2908_s16 = sld [smem:[#allocation11]] }
 0x1c8   : > { %v587_v4 = vpop.permute.xlu1 %586  ;;  %v692_v38 = vpop.permute.xlu0 %691 }
 0x1c9   : > { %v591_v15 = vadd.f32 %v587_v4, %v577_v47  ;;  %v697_v17 = vadd.f32 %v692_v38, %v683_v49 }
 0x1cc   : > { %v694_v52 = vpop.permute.xlu1 %693  ;;  %v884_v5 = vpop.permute.xlu0 %883 }
 0x1cd   : > { %v889_v6 = vadd.f32 %v884_v5, %v875_v62  ;;  %v698_v37 = vadd.f32 %v694_v52, %v684_v55 }
 0x1cf   : > { %v2877_v9 = vadd.f32 %v895_v7, %v889_v6 }
 0x1d0   : > { %v886_v8 = vpop.permute.xlu1 %885  ;;  %v599_v10 = vpop.permute.xlu0 %598 }
 0x1d1   : > { %v890_v13 = vadd.f32 %v886_v8, %v876_v43  ;;  %v604_v19 = vadd.f32 %v599_v10, %v590_v11 }
 0x1d3   : > { %v2890_v48 = vadd.f32 %v896_v59, %v890_v13  ;;  %v929_v40 = vmul.f32 %v928_v14, %v604_v19  ;;  %v967_v29 = vmul.f32 %v966_v12, %v604_v19  ;;  %v1006_v16 = vmul.f32 %v1005_v18, %v604_v19 }
 0x1d4   : > { %v601_v25 = vpop.permute.xlu1 %600  ;;  %v706_v22 = vpop.permute.xlu0 %705  ;;  %v1045_v23 = vmul.f32 %v1044_v24, %v604_v19 }
 0x1d5   : > { %v605_v32 = vadd.f32 %v601_v25, %v591_v15  ;;  %v711_v36 = vadd.f32 %v706_v22, %v697_v17  ;;  %v1021_v22 = vstv %s2903_s19  ;;  %s1861_s19 = sld [smem:[#allocation12 + $0x13]] }
 0x1d7   : > { %v933_v41 = vmul.f32 %v932_v26, %v711_v36  ;;  %v971_v31 = vmul.f32 %v970_v30, %v711_v36  ;;  %v1010_v44 = vmul.f32 %v1009_v35, %v711_v36  ;;  %v1049_v45 = vmul.f32 %v1048_v0, %v711_v36 }
 0x1d8   : > { %v708_v47 = vpop.permute.xlu1 %707  ;;  %v799_v49 = vpop.permute.xlu0 %798  ;;  %v930_v20 = vmul.f32 %v928_v14, %v605_v32  ;;  %v968_v50 = vmul.f32 %v966_v12, %v605_v32  ;;  %v1007_v28 = vmul.f32 %v1005_v18, %v605_v32  ;;  %v1046_v58 = vmul.f32 %v1044_v24, %v605_v32 }
 0x1d9   : > { %v712_v21 = vadd.f32 %v708_v47, %v698_v37  ;;  %v804_v54 = vadd.f32 %v799_v49, %v2848_v27  ;;  %v935_v42 = vadd.f32 %v933_v41, %v929_v40  ;;  %v973_v53 = vadd.f32 %v971_v31, %v967_v29 }
 0x1da   : > { %v1012_v55 = vadd.f32 %v1010_v44, %v1006_v16  ;;  %v1051_v56 = vadd.f32 %v1049_v45, %v1045_v23  ;;  %v1060_v32 = vstv %s2905_s23  ;;  %v950_v41 = vstv %s2908_s16  ;;  %s1862_s23 = sld [smem:[#allocation12 + $0x14]] }
 0x1db   : > { %v934_v33 = vmul.f32 %v932_v26, %v712_v21  ;;  %v972_v60 = vmul.f32 %v970_v30, %v712_v21  ;;  %v1011_v61 = vmul.f32 %v1009_v35, %v712_v21  ;;  %v1050_v57 = vmul.f32 %v1048_v0, %v712_v21  ;;  %s1870_s16 = sld [smem:[#allocation12 + $0x1c]] }
 0x1dc   : > { %v801_v63 = vpop.permute.xlu1 %800  ;;  %v813_v3 = vpop.permute.xlu0 %812  ;;  %v944_v26 = vstv %s2897_s20  ;;  %v982_v30 = vstv %s2899_s11  ;;  %v988_v49 = vstv %s2911_s29  ;;  %s1853_s20 = sld [smem:[#allocation12 + $0xb]]  ;;  %s3289_s11 = smov 126  }
 0x1dd   : > { %v818_v27 = vadd.f32 %v813_v3, %v804_v54  ;;  %v936_v4 = vadd.f32 %v934_v33, %v930_v20  ;;  %v974_v38 = vadd.f32 %v972_v60, %v968_v50  ;;  %v805_v46 = vadd.f32 %v801_v63, %v2853_v34  ;;  %s1855_s29 = sld [smem:[#allocation12 + $0xd]] }
 0x1de   : > { %v1013_v62 = vadd.f32 %v1011_v61, %v1007_v28  ;;  %v1052_v52 = vadd.f32 %v1050_v57, %v1046_v58  ;;  %v1027_v60 = vstv %s2918_s21  ;;  %v1066_v3 = vstv %s1842_s15  ;;  %s1871_s21 = sld [smem:[#allocation12 + $0x1d]] }
 0x1df   : > { %v939_v5 = vmul.f32 %v938_v39, %v818_v27  ;;  %v977_v6 = vmul.f32 %v976_v51, %v818_v27  ;;  %v1016_v7 = vmul.f32 %v1015_v2, %v818_v27  ;;  %v1055_v43 = vmul.f32 %v1054_v1, %v818_v27  ;;  %s1847_s15 = sld [smem:[#allocation12 + $0x5]] }
 0x1e0   : > { %v815_v8 = vpop.permute.xlu1 %814  ;;  %v906_v10 = vpop.permute.xlu0 %905 }
 0x1e1   : > { %v819_v11 = vadd.f32 %v815_v8, %v805_v46  ;;  %v941_v13 = vadd.f32 %v939_v5, %v935_v42  ;;  %v979_v14 = vadd.f32 %v977_v6, %v973_v53  ;;  %v911_v12 = vadd.f32 %v906_v10, %v2877_v9 }
 0x1e2   : > { %v1018_v34 = vadd.f32 %v1016_v7, %v1012_v55  ;;  %v1057_v59 = vadd.f32 %v1055_v43, %v1051_v56  ;;  %v1089_v10 = vstv %s1843_s17  ;;  %s1856_s17 = sld [smem:[#allocation12 + $0xe]] }
 0x1e3   : > { %v940_v15 = vmul.f32 %v938_v39, %v819_v11  ;;  %v978_v17 = vmul.f32 %v976_v51, %v819_v11  ;;  %v1017_v18 = vmul.f32 %v1015_v2, %v819_v11  ;;  %v1056_v19 = vmul.f32 %v1054_v1, %v819_v11 }
 0x1e4   : > { %v908_v24 = vpop.permute.xlu1 %907  ;;  %v920_v25 = vpop.permute.xlu0 %919 }
 0x1e5   : > { %v925_v35 = vadd.f32 %v920_v25, %v911_v12  ;;  %v942_v0 = vadd.f32 %v940_v15, %v936_v4  ;;  %v980_v36 = vadd.f32 %v978_v17, %v974_v38  ;;  %v912_v9 = vadd.f32 %v908_v24, %v2890_v48 }
 0x1e6   : > { %v1019_v37 = vadd.f32 %v1017_v18, %v1013_v62  ;;  %v1058_v39 = vadd.f32 %v1056_v19, %v1052_v52  ;;  %v1125_v25 = vstv %s2934_s12  ;;  %s1865_s12 = sld [smem:[#allocation12 + $0x17]] }
 0x1e7   : > { %v945_v51 = vmul.f32 %v944_v26, %v925_v35  ;;  %v983_v40 = vmul.f32 %v982_v30, %v925_v35  ;;  %v1022_v29 = vmul.f32 %v1021_v22, %v925_v35  ;;  %v1061_v16 = vmul.f32 %v1060_v32, %v925_v35 }
 0x1e8   : > { %v922_v23 = vpop.permute.xlu1 %921 }
 0x1e9   : > { %v926_v31 = vadd.f32 %v922_v23, %v912_v9  ;;  %v947_v44 = vadd.f32 %v945_v51, %v941_v13  ;;  %v985_v45 = vadd.f32 %v983_v40, %v979_v14  ;;  %v1024_v47 = vadd.f32 %v1022_v29, %v1018_v34 }
 0x1ea   : > { %v1063_v20 = vadd.f32 %v1061_v16, %v1057_v59  ;;  %v1103_v34 = vstv %s1844_s10  ;;  %v1301_v16 = vstv %s1861_s19  ;;  %s1864_s10 = sld [smem:[#allocation12 + $0x16]]  ;;  %s1858_s19 = sld [smem:[#allocation12 + $0x10]] }
 0x1eb   : > { %v951_v50 = vadd.f32 %v950_v41, %v947_v44  ;;  %v946_v48 = vmul.f32 %v944_v26, %v926_v31  ;;  %v984_v21 = vmul.f32 %v982_v30, %v926_v31  ;;  %v1023_v54 = vmul.f32 %v1021_v22, %v926_v31 }
 0x1ec   : > { %v1062_v42 = vmul.f32 %v1060_v32, %v926_v31  ;;  %v989_v56 = vadd.f32 %v988_v49, %v985_v45  ;;  %v1028_v1 = vadd.f32 %v1027_v60, %v1024_v47  ;;  %v1067_v46 = vadd.f32 %v1066_v3, %v1063_v20 }
 0x1ed   : > { %v953_v53 = vmax.f32 %v951_v50, 0.0  ;;  %v948_v55 = vadd.f32 %v946_v48, %v942_v0  ;;  %v986_v33 = vadd.f32 %v984_v21, %v980_v36  ;;  %v1025_v61 = vadd.f32 %v1023_v54, %v1019_v37 }
 0x1ee   : > { %v1064_v57 = vadd.f32 %v1062_v42, %v1058_v39  ;;  %v991_v63 = vmax.f32 %v989_v56, 0.0  ;;  %v1030_v4 = vmax.f32 %v1028_v1, 0.0  ;;  %v1069_v52 = vmax.f32 %v1067_v46, 0.0 }
 0x1ef   : > { %957 = vrot.lane.b32.xlu0 %v953_v53, %s2237_s9  ;;  %v952_v28 = vadd.f32 %v950_v41, %v948_v55  ;;  %v990_v2 = vadd.f32 %v988_v49, %v986_v33  ;;  %v1029_v38 = vadd.f32 %v1027_v60, %v1025_v61  ;;  %v1209_v39 = vstv %s1853_s20  ;;  %s1849_s20 = sld [smem:[#allocation12 + $0x7]] }
 0x1f0   : > { %v1068_v5 = vadd.f32 %v1066_v3, %v1064_v57  ;;  %v1315_v44 = vstv %s1862_s23  ;;  %v1407_v20 = vstv %s1870_s16  ;;  %v1231_v42 = vstv %s1855_s29  ;;  %s1874_s23 = sld [smem:[#allocation12 + $0x20]]  ;;  %s1859_s29 = sld [smem:[#allocation12 + $0x11]] }
 0x1f1   : > { %v954_v58 = vmax.f32 %v952_v28, 0.0  ;;  %v992_v27 = vmax.f32 %v990_v2, 0.0  ;;  %v1031_v62 = vmax.f32 %v1029_v38, 0.0  ;;  %v1421_v33 = vstv %s1871_s21  ;;  %s1850_s16 = sld [smem:[#allocation12 + $0x8]]  ;;  %s1867_s21 = sld [smem:[#allocation12 + $0x19]] }
 0x1f2   : > { %v1070_v6 = vmax.f32 %v1068_v5, 0.0  ;;  %v1139_v57 = vstv %s1847_s15  ;;  %s1868_s15 = sld [smem:[#allocation12 + $0x1a]] }
 0x1f3   : > { %959 = vrot.lane.b32.xlu1 %v954_v58, %s2237_s9  ;;  %995 = vrot.lane.b32.xlu0 %v991_v63, %s2237_s9  ;;  %v1245_v63 = vstv %s1856_s17  ;;  %s1876_s17 = sld [smem:[#allocation12 + $0x22]] }
 0x1f7   : > { %997 = vrot.lane.b32.xlu1 %v992_v27, %s2237_s9  ;;  %1034 = vrot.lane.b32.xlu0 %v1030_v4, %s2237_s9  ;;  %v1337_v27 = vstv %s1864_s10  ;;  %s1877_s10 = sld [smem:[#allocation12 + $0x23]] }
 0x1fb   : > { %1036 = vrot.lane.b32.xlu1 %v1031_v62, %s2237_s9  ;;  %1073 = vrot.lane.b32.xlu0 %v1069_v52, %s2237_s9  ;;  %v1351_v62 = vstv %s1865_s12  ;;  %s1084_s12 = sld [smem:[#allocation12]] }
 0x1ff   : > { %1075 = vrot.lane.b32.xlu1 %v1070_v6, %s2237_s9  ;;  %s2941_s9 = sld [smem:[#allocation12 + $0xa]] }
 0x205   : > { %v1195_v0 = vstv %s2941_s9  ;;  %s1873_s9 = sld [smem:[#allocation12 + $0x1f]] }
 0x261   : > { %v958_v7 = vpop.permute.xlu0 %957 }
 0x262   : > { %963 = vst.msk [vmem:[#allocation3 + $0x1] sm:$0xff] %vm491_vm5, %v958_v7  ;;  %v1443_v7 = vstv %s1873_s9  ;;  %s1845_s9 = sld [smem:[#allocation12 + $0x3]] }
 0x265   : > { %v960_v43 = vpop.permute.xlu1 %959  ;;  %v996_v8 = vpop.permute.xlu0 %995 }
 0x266   : > { %964 = vst.msk [vmem:[#allocation3 + $0x9] sm:$0xff] %vm491_vm5, %v960_v43  ;;  %1002 = vst.msk [vmem:[#allocation3 + $0x19] sm:$0xff] %vm491_vm5, %v996_v8 }
 0x269   : > { %v998_v11 = vpop.permute.xlu1 %997  ;;  %v1035_v13 = vpop.permute.xlu0 %1034  ;;  %v2936_v14 = vld [vmem:[#allocation3] sm:$0xff] }
 0x26a   : > { %1003 = vst.msk [vmem:[#allocation3 + $0x21] sm:$0xff] %vm491_vm5, %v998_v11  ;;  %1041 = vst.msk [vmem:[#allocation3 + $0x31] sm:$0xff] %vm491_vm5, %v1035_v13  ;;  %v1090_v12 = vmul.f32 %v1089_v10, %v2936_v14  ;;  %v1104_v19 = vmul.f32 %v1103_v34, %v2936_v14  ;;  %v2950_v24 = vld [vmem:[#allocation3 + $0x1] sm:$0xff]  ;;  %v1161_v13 = vstv %s1849_s20  ;;  %s1851_s20 = sld [smem:[#allocation12 + $0x9]] }
 0x26b   : > { %v1126_v22 = vmul.f32 %v1125_v25, %v2950_v24  ;;  %v1140_v58 = vmul.f32 %v1139_v57, %v2950_v24 }
 0x26c   : > { %1094 = vrot.lane.b32.xlu0 %v1090_v12, %s3288_s22 }
 0x26d   : > { %v1037_v59 = vpop.permute.xlu1 %1036  ;;  %v1074_v15 = vpop.permute.xlu0 %1073  ;;  %v2944_v17 = vld [vmem:[#allocation3 + $0x8] sm:$0xff]  ;;  %v2960_v35 = vld [vmem:[#allocation3 + $0x18] sm:$0xff] }
 0x26e   : > { %1042 = vst.msk [vmem:[#allocation3 + $0x39] sm:$0xff] %vm491_vm5, %v1037_v59  ;;  %1080 = vst.msk [vmem:[#allocation3 + $0x49] sm:$0xff] %vm491_vm5, %v1074_v15  ;;  %v1091_v18 = vmul.f32 %v1089_v10, %v2944_v17  ;;  %v1105_v30 = vmul.f32 %v1103_v34, %v2944_v17  ;;  %v2958_v32 = vld [vmem:[#allocation3 + $0x9] sm:$0xff]  ;;  %v1196_v9 = vmul.f32 %v1195_v0, %v2960_v35  ;;  %v2993_v54 = vld [vmem:[#allocation3 + $0x19] sm:$0xff] }
 0x26f   : > { %v1127_v36 = vmul.f32 %v1125_v25, %v2958_v32  ;;  %v1210_v40 = vmul.f32 %v1209_v39, %v2960_v35  ;;  %v1232_v55 = vmul.f32 %v1231_v42, %v2993_v54  ;;  %v1141_v2 = vmul.f32 %v1139_v57, %v2958_v32  ;;  %v3033_v11 = vld [vmem:[#allocation3 + $0x2] sm:$0xff]  ;;  %v3039_v59 = vld [vmem:[#allocation3 + $0xa] sm:$0xff] }
 0x270   : > { %1096 = vrot.lane.b32.xlu1 %v1091_v18, %s3288_s22  ;;  %1108 = vrot.lane.b32.xlu0 %v1104_v19, %s3289_s11  ;;  %v1246_v1 = vmul.f32 %v1245_v63, %v2993_v54  ;;  %v1162_v34 = vmul.f32 %v1161_v13, %v3033_v11  ;;  %v1267_v18 = vstv %s1858_s19  ;;  %v1163_v19 = vmul.f32 %v1161_v13, %v3039_v59  ;;  %s1863_s19 = sld [smem:[#allocation12 + $0x15]] }
 0x271   : > { %v1076_v26 = vpop.permute.xlu1 %1075  ;;  %v2967_v37 = vld [vmem:[#allocation3 + $0x20] sm:$0xff]  ;;  %v2973_v29 = vld [vmem:[#allocation3 + $0x30] sm:$0xff] }
 0x272   : > { %1081 = vst.msk [vmem:[#allocation3 + $0x51] sm:$0xff] %vm491_vm5, %v1076_v26  ;;  %v1197_v51 = vmul.f32 %v1195_v0, %v2967_v37  ;;  %v1211_v23 = vmul.f32 %v1209_v39, %v2967_v37  ;;  %v1302_v41 = vmul.f32 %v1301_v16, %v2973_v29  ;;  %v1316_v47 = vmul.f32 %v1315_v44, %v2973_v29  ;;  %v2999_v56 = vld [vmem:[#allocation3 + $0x21] sm:$0xff]  ;;  %v3013_v3 = vld [vmem:[#allocation3 + $0x31] sm:$0xff] }
 0x273   : > { %v1233_v60 = vmul.f32 %v1231_v42, %v2999_v56  ;;  %v1247_v4 = vmul.f32 %v1245_v63, %v2999_v56  ;;  %v1338_v38 = vmul.f32 %v1337_v27, %v3013_v3  ;;  %v1352_v5 = vmul.f32 %v1351_v62, %v3013_v3  ;;  %v3041_v15 = vld [vmem:[#allocation3 + $0x1a] sm:$0xff]  ;;  %v3047_v26 = vld [vmem:[#allocation3 + $0x22] sm:$0xff] }
 0x274   : > { %1110 = vrot.lane.b32.xlu1 %v1105_v30, %s3289_s11  ;;  %1130 = vrot.lane.b32.xlu0 %v1126_v22, %s3288_s22  ;;  %v1268_v25 = vmul.f32 %v1267_v18, %v3041_v15  ;;  %v1457_v30 = vstv %s1874_s23  ;;  %v1269_v22 = vmul.f32 %v1267_v18, %v3047_v26  ;;  %v1085_v63 = vstv %s1084_s12  ;;  %s1869_s23 = sld [smem:[#allocation12 + $0x1b]]  ;;  %s3126_s12 = sld [smem:[#allocation14 + $0x4]] }
 0x275   : > { %v2979_v31 = vld [vmem:[#allocation3 + $0x38] sm:$0xff]  ;;  %v2985_v49 = vld [vmem:[#allocation3 + $0x48] sm:$0xff] }
 0x276   : > { %v1303_v45 = vmul.f32 %v1301_v16, %v2979_v31  ;;  %v1317_v50 = vmul.f32 %v1315_v44, %v2979_v31  ;;  %v1408_v48 = vmul.f32 %v1407_v20, %v2985_v49  ;;  %v1422_v61 = vmul.f32 %v1421_v33, %v2985_v49  ;;  %v3019_v46 = vld [vmem:[#allocation3 + $0x39] sm:$0xff]  ;;  %v3025_v6 = vld [vmem:[#allocation3 + $0x49] sm:$0xff] }
 0x277   : > { %v1339_v52 = vmul.f32 %v1337_v27, %v3019_v46  ;;  %v1353_v43 = vmul.f32 %v1351_v62, %v3019_v46  ;;  %v1444_v8 = vmul.f32 %v1443_v7, %v3025_v6  ;;  %v1458_v0 = vmul.f32 %v1457_v30, %v3025_v6 }
 0x278   : > { %1132 = vrot.lane.b32.xlu1 %v1127_v36, %s3288_s22  ;;  %1200 = vrot.lane.b32.xlu0 %v1196_v9, %s3288_s22  ;;  %v1175_v36 = vstv %s1850_s16  ;;  %s1872_s16 = sld [smem:[#allocation12 + $0x1e]] }
 0x279   : > { %v2991_v21 = vld [vmem:[#allocation3 + $0x50] sm:$0xff]  ;;  %v1176_v39 = vmul.f32 %v1175_v36, %v3033_v11 }
 0x27a   : > { %v1409_v53 = vmul.f32 %v1407_v20, %v2991_v21  ;;  %v1423_v28 = vmul.f32 %v1421_v33, %v2991_v21  ;;  %v3031_v10 = vld [vmem:[#allocation3 + $0x51] sm:$0xff]  ;;  %v1387_v20 = vstv %s1868_s15  ;;  %s1866_s15 = sld [smem:[#allocation12 + $0x18]] }
 0x27b   : > { %v1445_v12 = vmul.f32 %v1443_v7, %v3031_v10  ;;  %v1459_v9 = vmul.f32 %v1457_v30, %v3031_v10  ;;  %v3073_v42 = vld [vmem:[#allocation3 + $0x4a] sm:$0xff] }
 0x27c   : > { %1202 = vrot.lane.b32.xlu1 %v1197_v51, %s3288_s22  ;;  %1214 = vrot.lane.b32.xlu0 %v1210_v40, %s3289_s11  ;;  %v1281_v51 = vstv %s1859_s29  ;;  %v1177_v40 = vmul.f32 %v1175_v36, %v3039_v59  ;;  %s3103_s29 = sld [smem:[#allocation12 + $0x6]] }
 0x27d   : > { %v1282_v16 = vmul.f32 %v1281_v51, %v3041_v15  ;;  %v1283_v44 = vmul.f32 %v1281_v51, %v3047_v26 }
 0x280   : > { %1216 = vrot.lane.b32.xlu1 %v1211_v23, %s3289_s11  ;;  %1306 = vrot.lane.b32.xlu0 %v1302_v41, %s3288_s22  ;;  %v3061_v23 = vld [vmem:[#allocation3 + $0x32] sm:$0xff]  ;;  %v1373_v41 = vstv %s1867_s21  ;;  %s3106_s21 = sld [smem:[#allocation12 + $0xf]] }
 0x284   : > { %1308 = vrot.lane.b32.xlu1 %v1303_v45, %s3288_s22  ;;  %1320 = vrot.lane.b32.xlu0 %v1316_v47, %s3289_s11  ;;  %v1374_v45 = vmul.f32 %v1373_v41, %v3061_v23  ;;  %v3067_v47 = vld [vmem:[#allocation3 + $0x3a] sm:$0xff] }
 0x288   : > { %1322 = vrot.lane.b32.xlu1 %v1317_v50, %s3289_s11  ;;  %1412 = vrot.lane.b32.xlu0 %v1408_v48, %s3288_s22  ;;  %v1375_v50 = vmul.f32 %v1373_v41, %v3067_v47  ;;  %v1388_v48 = vmul.f32 %v1387_v20, %v3061_v23 }
 0x28c   : > { %1414 = vrot.lane.b32.xlu1 %v1409_v53, %s3288_s22  ;;  %1236 = vrot.lane.b32.xlu0 %v1232_v55, %s3288_s22  ;;  %v1479_v53 = vstv %s1876_s17  ;;  %v1389_v55 = vmul.f32 %v1387_v20, %v3067_v47  ;;  %s1875_s17 = sld [smem:[#allocation12 + $0x21]] }
 0x28d   : > { %v1480_v33 = vmul.f32 %v1479_v53, %v3073_v42 }
 0x290   : > { %1238 = vrot.lane.b32.xlu1 %v1233_v60, %s3288_s22  ;;  %1426 = vrot.lane.b32.xlu0 %v1422_v61, %s3289_s11  ;;  %v3079_v60 = vld [vmem:[#allocation3 + $0x52] sm:$0xff]  ;;  %v1493_v61 = vstv %s1877_s10  ;;  %s3124_s10 = sld [smem:[#allocation14]] }
 0x291   : > { %v1481_v57 = vmul.f32 %v1479_v53, %v3079_v60  ;;  %v1331_v53 = vstv %s1863_s19  ;;  %s3136_s19 = sld [smem:[#allocation14 + $0x9]] }
 0x294   : > { %1428 = vrot.lane.b32.xlu1 %v1423_v28, %s3289_s11  ;;  %1144 = vrot.lane.b32.xlu0 %v1140_v58, %s3289_s11  ;;  %v1494_v28 = vmul.f32 %v1493_v61, %v3073_v42  ;;  %v1495_v58 = vmul.f32 %v1493_v61, %v3079_v60 }
 0x298   : > { %1146 = vrot.lane.b32.xlu1 %v1141_v2, %s3289_s11  ;;  %1250 = vrot.lane.b32.xlu0 %v1246_v1, %s3289_s11  ;;  %v1086_v2 = vmul.f32 %v1085_v63, %v2936_v14 }
 0x29c   : > { %1252 = vrot.lane.b32.xlu1 %v1247_v4, %s3289_s11  ;;  %1342 = vrot.lane.b32.xlu0 %v1338_v38, %s3288_s22  ;;  %v1119_v4 = vstv %s1845_s9  ;;  %v1087_v38 = vmul.f32 %v1085_v63, %v2944_v17  ;;  %s3128_s9 = sld [smem:[#allocation14 + $0x8]] }
 0x29d   : > { %v1121_v14 = vmul.f32 %v1119_v4, %v2958_v32 }
 0x2a0   : > { %1344 = vrot.lane.b32.xlu1 %v1339_v52, %s3288_s22  ;;  %1356 = vrot.lane.b32.xlu0 %v1352_v5, %s3289_s11 }
 0x2a4   : > { %1358 = vrot.lane.b32.xlu1 %v1353_v43, %s3289_s11  ;;  %1448 = vrot.lane.b32.xlu0 %v1444_v8, %s3288_s22  ;;  %v1120_v43 = vmul.f32 %v1119_v4, %v2950_v24 }
 0x2a8   : > { %1450 = vrot.lane.b32.xlu1 %v1445_v12, %s3288_s22  ;;  %1166 = vrot.lane.b32.xlu0 %v1162_v34, %s3288_s22 }
 0x2ac   : > { %1168 = vrot.lane.b32.xlu1 %v1163_v19, %s3288_s22  ;;  %1272 = vrot.lane.b32.xlu0 %v1268_v25, %s3288_s22  ;;  %v1191_v19 = vstv %s1851_s20  ;;  %s3130_s20 = sld [smem:[#allocation14 + $0xc]] }
 0x2ad   : > { %v1193_v51 = vmul.f32 %v1191_v19, %v2967_v37 }
 0x2b0   : > { %1274 = vrot.lane.b32.xlu1 %v1269_v22, %s3288_s22  ;;  %1462 = vrot.lane.b32.xlu0 %v1458_v0, %s3289_s11  ;;  %v1192_v0 = vmul.f32 %v1191_v19, %v2960_v35 }
 0x2b4   : > { %1464 = vrot.lane.b32.xlu1 %v1459_v9, %s3289_s11  ;;  %1180 = vrot.lane.b32.xlu0 %v1176_v39, %s3289_s11 }
 0x2b8   : > { %1182 = vrot.lane.b32.xlu1 %v1177_v40, %s3289_s11  ;;  %1286 = vrot.lane.b32.xlu0 %v1282_v16, %s3289_s11 }
 0x2bc   : > { %1288 = vrot.lane.b32.xlu1 %v1283_v44, %s3289_s11  ;;  %1378 = vrot.lane.b32.xlu0 %v1374_v45, %s3288_s22 }
 0x2c0   : > { %1380 = vrot.lane.b32.xlu1 %v1375_v50, %s3288_s22  ;;  %1392 = vrot.lane.b32.xlu0 %v1388_v48, %s3289_s11 }
 0x2c4   : > { %1394 = vrot.lane.b32.xlu1 %v1389_v55, %s3289_s11  ;;  %1484 = vrot.lane.b32.xlu0 %v1480_v33, %s3288_s22 }
 0x2c8   : > { %1486 = vrot.lane.b32.xlu1 %v1481_v57, %s3288_s22  ;;  %1498 = vrot.lane.b32.xlu0 %v1494_v28, %s3289_s11  ;;  %s1854_s22 = sld [smem:[#allocation12 + $0xc]] }
 0x2cc   : > { %1500 = vrot.lane.b32.xlu1 %v1495_v58, %s3289_s11  ;;  %s1860_s11 = sld [smem:[#allocation12 + $0x12]] }
 0x2ce   : > { %v1225_v36 = vstv %s1854_s22  ;;  %s3132_s22 = sld [smem:[#allocation14 + $0x1]] }
 0x2cf   : > { %v1226_v16 = vmul.f32 %v1225_v36, %v2993_v54  ;;  %v1227_v35 = vmul.f32 %v1225_v36, %v2999_v56  ;;  %v1332_v54 = vmul.f32 %v1331_v53, %v3013_v3  ;;  %v1403_v56 = vstv %s1869_s23  ;;  %s3138_s23 = sld [smem:[#allocation14 + $0xd]] }
 0x2d2   : > { %v1297_v32 = vstv %s1860_s11  ;;  %s3134_s11 = sld [smem:[#allocation14 + $0x5]] }
 0x2d3   : > { %v1298_v48 = vmul.f32 %v1297_v32, %v2973_v29  ;;  %v1299_v37 = vmul.f32 %v1297_v32, %v2979_v31  ;;  %v1333_v29 = vmul.f32 %v1331_v53, %v3019_v46  ;;  %v1404_v31 = vmul.f32 %v1403_v56, %v2985_v49 }
 0x2de   : > { %v1095_v1 = vpop.permute.xlu0 %1094 }
 0x2df   : > { %v1100_v27 = vadd.f32 %v1095_v1, %v1086_v2 }
 0x2e2   : > { %v1097_v62 = vpop.permute.xlu1 %1096  ;;  %v1109_v52 = vpop.permute.xlu0 %1108 }
 0x2e3   : > { %v1101_v5 = vadd.f32 %v1097_v62, %v1087_v38  ;;  %v1114_v7 = vadd.f32 %v1109_v52, %v1100_v27  ;;  %v1437_v52 = vstv %s1872_s16  ;;  %s3141_s16 = sld [smem:[#allocation14 + $0x2]] }
 0x2e4   : > { %v1438_v46 = vmul.f32 %v1437_v52, %v3025_v6  ;;  %v1439_v49 = vmul.f32 %v1437_v52, %v3031_v10 }
 0x2e5   : > { %v1122_v8 = vadd.f32 %v1120_v43, %v1114_v7  ;;  %v1405_v43 = vmul.f32 %v1403_v56, %v2991_v21 }
 0x2e6   : > { %v1111_v13 = vpop.permute.xlu1 %1110  ;;  %v1131_v12 = vpop.permute.xlu0 %1130 }
 0x2e7   : > { %v1115_v34 = vadd.f32 %v1111_v13, %v1101_v5  ;;  %v1136_v18 = vadd.f32 %v1131_v12, %v1122_v8  ;;  %v1155_v13 = vstv %s3103_s29  ;;  %s3149_s29 = sld [smem:[#allocation14 + $0x6]] }
 0x2e9   : > { %v1123_v25 = vadd.f32 %v1121_v14, %v1115_v34 }
 0x2ea   : > { %v1133_v30 = vpop.permute.xlu1 %1132  ;;  %v1201_v22 = vpop.permute.xlu0 %1200 }
 0x2eb   : > { %v3093_v17 = vadd.f32 %v1133_v30, %v1123_v25  ;;  %v1206_v24 = vadd.f32 %v1201_v22, %v1192_v0  ;;  %v1156_v22 = vmul.f32 %v1155_v13, %v3033_v11  ;;  %v1261_v0 = vstv %s3106_s21  ;;  %s3154_s21 = sld [smem:[#allocation14 + $0xa]] }
 0x2ee   : > { %v1203_v9 = vpop.permute.xlu1 %1202  ;;  %v1215_v39 = vpop.permute.xlu0 %1214 }
 0x2ef   : > { %v1220_v40 = vadd.f32 %v1215_v39, %v1206_v24  ;;  %v1207_v41 = vadd.f32 %v1203_v9, %v1193_v51 }
 0x2f1   : > { %v1228_v44 = vadd.f32 %v1226_v16, %v1220_v40  ;;  %v1157_v40 = vmul.f32 %v1155_v13, %v3039_v59  ;;  %v1262_v16 = vmul.f32 %v1261_v0, %v3041_v15  ;;  %v1594_v13 = vstv %s3130_s20  ;;  %s3176_s20 = sld [smem:[#allocation15]] }
 0x2f2   : > { %v1217_v45 = vpop.permute.xlu1 %1216  ;;  %v1307_v20 = vpop.permute.xlu0 %1306 }
 0x2f3   : > { %v1221_v50 = vadd.f32 %v1217_v45, %v1207_v41  ;;  %v1312_v55 = vadd.f32 %v1307_v20, %v1298_v48  ;;  %v1263_v20 = vmul.f32 %v1261_v0, %v3047_v26 }
 0x2f5   : > { %v1229_v33 = vadd.f32 %v1227_v35, %v1221_v50 }
 0x2f6   : > { %v1309_v61 = vpop.permute.xlu1 %1308  ;;  %v1321_v57 = vpop.permute.xlu0 %1320 }
 0x2f7   : > { %v1326_v28 = vadd.f32 %v1321_v57, %v1312_v55  ;;  %v1313_v58 = vadd.f32 %v1309_v61, %v1299_v37 }
 0x2f9   : > { %v1334_v63 = vadd.f32 %v1332_v54, %v1326_v28 }
 0x2fa   : > { %v1323_v2 = vpop.permute.xlu1 %1322  ;;  %v1413_v1 = vpop.permute.xlu0 %1412 }
 0x2fb   : > { %v1327_v27 = vadd.f32 %v1323_v2, %v1313_v58  ;;  %v1418_v3 = vadd.f32 %v1413_v1, %v1404_v31 }
 0x2fd   : > { %v1335_v4 = vadd.f32 %v1333_v29, %v1327_v27 }
 0x2fe   : > { %v1415_v38 = vpop.permute.xlu1 %1414  ;;  %v1237_v62 = vpop.permute.xlu0 %1236 }
 0x2ff   : > { %v1419_v12 = vadd.f32 %v1415_v38, %v1405_v43  ;;  %v1242_v36 = vadd.f32 %v1237_v62, %v1228_v44  ;;  %v1367_v44 = vstv %s1866_s15  ;;  %s3156_s15 = sld [smem:[#allocation14 + $0xe]] }
 0x300   : > { %v1369_v37 = vmul.f32 %v1367_v44, %v3067_v47 }
 0x302   : > { %v1239_v5 = vpop.permute.xlu1 %1238  ;;  %v1427_v7 = vpop.permute.xlu0 %1426 }
 0x303   : > { %v1432_v8 = vadd.f32 %v1427_v7, %v1418_v3  ;;  %v1243_v32 = vadd.f32 %v1239_v5, %v1229_v33  ;;  %v1507_v3 = vstv %s3124_s10  ;;  %s3165_s10 = sld [smem:[#allocation14 + $0x7]] }
 0x305   : > { %v1440_v34 = vadd.f32 %v1438_v46, %v1432_v8  ;;  %v1536_v8 = vstv %s3126_s12  ;;  %v1565_v46 = vstv %s3128_s9  ;;  %s3171_s12 = sld [smem:[#allocation14 + $0xb]]  ;;  %s3173_s9 = sld [smem:[#allocation14 + $0xf]] }
 0x306   : > { %v1429_v14 = vpop.permute.xlu1 %1428  ;;  %v1145_v19 = vpop.permute.xlu0 %1144 }
 0x307   : > { %v1433_v25 = vadd.f32 %v1429_v14, %v1419_v12  ;;  %v1150_v30 = vadd.f32 %v1145_v19, %v1136_v18  ;;  %v1540_v14 = vstv %s3134_s11  ;;  %s3181_s11 = sld [smem:[#allocation15 + $0x2]] }
 0x309   : > { %v1441_v24 = vadd.f32 %v1439_v49, %v1433_v25  ;;  %v1158_v9 = vadd.f32 %v1156_v22, %v1150_v30  ;;  %v1569_v30 = vstv %s3136_s19  ;;  %v1598_v49 = vstv %s3138_s23  ;;  %s3183_s19 = sld [smem:[#allocation15 + $0x3]]  ;;  %s1908_s23 = sshll.u32 %s2308_s8, 10 }
 0x30a   : > { %v1147_v21 = vpop.permute.xlu1 %1146  ;;  %v1251_v39 = vpop.permute.xlu0 %1250 }
 0x30b   : > { %v1151_v6 = vadd.f32 %v1147_v21, %v3093_v17  ;;  %v1256_v51 = vadd.f32 %v1251_v39, %v1242_v36  ;;  %v1368_v17 = vmul.f32 %v1367_v44, %v3061_v23  ;;  %v1473_v23 = vstv %s1875_s17  ;;  %s3163_s17 = sld [smem:[#allocation14 + $0x3]] }
 0x30c   : > { %v1474_v29 = vmul.f32 %v1473_v23, %v3073_v42  ;;  %v1475_v7 = vmul.f32 %v1473_v23, %v3079_v60 }
 0x30d   : > { %v1159_v18 = vadd.f32 %v1157_v40, %v1151_v6  ;;  %v1264_v41 = vadd.f32 %v1262_v16, %v1256_v51 }
 0x30e   : > { %v1253_v10 = vpop.permute.xlu1 %1252  ;;  %v1343_v45 = vpop.permute.xlu0 %1342 }
 0x30f   : > { %v1257_v11 = vadd.f32 %v1253_v10, %v1243_v32  ;;  %v1348_v50 = vadd.f32 %v1343_v45, %v1334_v63 }
 0x311   : > { %v1265_v48 = vadd.f32 %v1263_v20, %v1257_v11 }
 0x312   : > { %v1345_v35 = vpop.permute.xlu1 %1344  ;;  %v1357_v53 = vpop.permute.xlu0 %1356 }
 0x313   : > { %v1362_v55 = vadd.f32 %v1357_v53, %v1348_v50  ;;  %v1349_v61 = vadd.f32 %v1345_v35, %v1335_v4 }
 0x315   : > { %v3119_v59 = vadd.f32 %v1368_v17, %v1362_v55 }
 0x316   : > { %v1359_v15 = vpop.permute.xlu1 %1358  ;;  %v1449_v33 = vpop.permute.xlu0 %1448 }
 0x317   : > { %v1363_v57 = vadd.f32 %v1359_v15, %v1349_v61  ;;  %v1454_v2 = vadd.f32 %v1449_v33, %v1440_v34  ;;  %v1511_v34 = vstv %s3132_s22  ;;  %s3178_s22 = sld [smem:[#allocation15 + $0x1]] }
 0x319   : > { %v3122_v28 = vadd.f32 %v1369_v37, %v1363_v57  ;;  %v1546_v57 = vstv %s3149_s29  ;;  %v1575_v37 = vstv %s3154_s21 }
 0x31a   : > { %v1451_v26 = vpop.permute.xlu1 %1450  ;;  %v1167_v54 = vpop.permute.xlu0 %1166 }
 0x31b   : > { %v1455_v56 = vadd.f32 %v1451_v26, %v1441_v24  ;;  %v1172_v38 = vadd.f32 %v1167_v54, %v1158_v9  ;;  %v1517_v24 = vstv %s3141_s16  ;;  %v1604_v26 = vstv %s3156_s15  ;;  %s3290_s16 = sshll.u32 %s2466_s18, 6 }
 0x31c   : > { %s373_s29 = scalar_lea.vmem [#allocation17], %s3290_s16 }
 0x31d   : > { %s1636_s21 = sshll.u32 %s373_s29, 4  ;;  %s3206_s21 = int_to_ptr.vmem [resolvable:$true] %s1636_s21 }
 0x31e   : > { %v1169_v58 = vpop.permute.xlu1 %1168  ;;  %v1273_v63 = vpop.permute.xlu0 %1272 }
 0x31f   : > { %v1173_v43 = vadd.f32 %v1169_v58, %v1159_v18  ;;  %v1278_v42 = vadd.f32 %v1273_v63, %v1264_v41 }
 0x322   : > { %v1275_v1 = vpop.permute.xlu1 %1274  ;;  %v1463_v47 = vpop.permute.xlu0 %1462 }
 0x323   : > { %v1468_v27 = vadd.f32 %v1463_v47, %v1454_v2  ;;  %v1279_v0 = vadd.f32 %v1275_v1, %v1265_v48 }
 0x325   : > { %v3143_v4 = vadd.f32 %v1474_v29, %v1468_v27 }
 0x326   : > { %v1465_v62 = vpop.permute.xlu1 %1464  ;;  %v1181_v31 = vpop.permute.xlu0 %1180 }
 0x327   : > { %v1469_v52 = vadd.f32 %v1465_v62, %v1455_v56  ;;  %v1186_v5 = vadd.f32 %v1181_v31, %v1172_v38 }
 0x329   : > { %v3158_v25 = vadd.f32 %v1475_v7, %v1469_v52  ;;  %v1508_v36 = vmul.f32 %v1507_v3, %v1186_v5  ;;  %v1537_v9 = vmul.f32 %v1536_v8, %v1186_v5  ;;  %v1566_v21 = vmul.f32 %v1565_v46, %v1186_v5 }
 0x32a   : > { %v1183_v12 = vpop.permute.xlu1 %1182  ;;  %v1287_v19 = vpop.permute.xlu0 %1286  ;;  %v1595_v39 = vmul.f32 %v1594_v13, %v1186_v5  ;;  %v1523_v52 = vstv %s3163_s17  ;;  %s3204_s17 = scalar_lea.hbm %s3261_s7, %s1908_s23 }
 0x32b   : > { %v1187_v60 = vadd.f32 %v1183_v12, %v1173_v43  ;;  %v1292_v22 = vadd.f32 %v1287_v19, %v1278_v42  ;;  %v1610_v19 = vstv %s3173_s9  ;;  %s2241_s9 = smov [#allocation17]  }
 0x32d   : > { %v1509_v6 = vmul.f32 %v1507_v3, %v1187_v60  ;;  %v1512_v51 = vmul.f32 %v1511_v34, %v1292_v22  ;;  %v1541_v40 = vmul.f32 %v1540_v14, %v1292_v22  ;;  %v1570_v16 = vmul.f32 %v1569_v30, %v1292_v22 }
 0x32e   : > { %v1599_v32 = vmul.f32 %v1598_v49, %v1292_v22  ;;  %v1289_v18 = vpop.permute.xlu1 %1288  ;;  %v1379_v41 = vpop.permute.xlu0 %1378  ;;  %v1538_v10 = vmul.f32 %v1536_v8, %v1187_v60  ;;  %v1567_v45 = vmul.f32 %v1565_v46, %v1187_v60  ;;  %v1596_v11 = vmul.f32 %v1594_v13, %v1187_v60 }
 0x32f   : > { %v1293_v20 = vadd.f32 %v1289_v18, %v1279_v0  ;;  %v1514_v44 = vadd.f32 %v1512_v51, %v1508_v36  ;;  %v1543_v50 = vadd.f32 %v1541_v40, %v1537_v9  ;;  %v1572_v48 = vadd.f32 %v1570_v16, %v1566_v21 }
 0x330   : > { %v1601_v35 = vadd.f32 %v1599_v32, %v1595_v39  ;;  %v1384_v15 = vadd.f32 %v1379_v41, %v3119_v59  ;;  %v1529_v9 = vstv %s3176_s20  ;;  %v1558_v40 = vstv %s3178_s22  ;;  %s2148_s20 = sshll.u32 %s2241_s9, 4  ;;  %s2149_s20 = int_to_ptr.vmem [resolvable:$false] %s2148_s20 }
 0x331   : > { %v1513_v53 = vmul.f32 %v1511_v34, %v1293_v20  ;;  %v1542_v55 = vmul.f32 %v1540_v14, %v1293_v20  ;;  %v1571_v17 = vmul.f32 %v1569_v30, %v1293_v20  ;;  %v1600_v61 = vmul.f32 %v1598_v49, %v1293_v20  ;;  %s2150_s22 = scalar_lea.vmem %s2149_s20, 2048  ;;  %p2151_p4 = scmp.lt.s32.totalorder %s3206_s21, %s2149_s20 }
 0x332   : > { %v1381_v33 = vpop.permute.xlu1 %1380  ;;  %v1393_v54 = vpop.permute.xlu0 %1392  ;;  %v1552_v34 = vstv %s3165_s10  ;;  %v1581_v14 = vstv %s3171_s12  ;;  %v1587_v16 = vstv %s3181_s11  ;;  %v1616_v32 = vstv %s3183_s19  ;;  %s1623_s10 = scalar_lea.sflag [#allocation6], %s2466_s18  ;;  %s2144_s12 = scalar_lea.vmem %s3206_s21, 1024 }
 0x333   : > { %v1515_v58 = vadd.f32 %v1513_v53, %v1509_v6  ;;  %v1544_v63 = vadd.f32 %v1542_v55, %v1538_v10  ;;  %v1573_v23 = vadd.f32 %v1571_v17, %v1567_v45  ;;  %v1602_v2 = vadd.f32 %v1600_v61, %v1596_v11  ;;  %p2145_p13 = scmp.ne.s32.totalorder %s3206_s21, %s2144_s12  ;;  %p2152_p8 = scmp.lt.s32.totalorder %s2150_s22, %s2144_s12 }
 0x334   : > { %v1398_v1 = vadd.f32 %v1393_v54, %v1384_v15  ;;  %v1385_v47 = vadd.f32 %v1381_v33, %v3122_v28 }
 0x335   : > { %p2146_p1 = pnand %p2145_p13, %p3291_p0  ;;  %p2153_p10 = por %p2152_p8, %p2151_p4 }
 0x336   : > { %v1518_v59 = vmul.f32 %v1517_v24, %v1398_v1  ;;  %v1547_v27 = vmul.f32 %v1546_v57, %v1398_v1  ;;  %v1576_v29 = vmul.f32 %v1575_v37, %v1398_v1  ;;  %v1605_v56 = vmul.f32 %v1604_v26, %v1398_v1  ;;  %v1395_v38 = vpop.permute.xlu1 %1394  ;;  %v1485_v62 = vpop.permute.xlu0 %1484 }
 0x337   : > { %v1399_v31 = vadd.f32 %v1395_v38, %v1385_v47  ;;  %v1490_v13 = vadd.f32 %v1485_v62, %v3143_v4  ;;  %p2147_p3 = pneg %p2146_p1 }
 0x338   : > { %v1520_v28 = vadd.f32 %v1518_v59, %v1514_v44  ;;  %v1549_v3 = vadd.f32 %v1547_v27, %v1543_v50  ;;  %v1578_v5 = vadd.f32 %v1576_v29, %v1572_v48  ;;  %v1607_v7 = vadd.f32 %v1605_v56, %v1601_v35 }
 0x339   : > { %v1519_v43 = vmul.f32 %v1517_v24, %v1399_v31  ;;  %v1548_v42 = vmul.f32 %v1546_v57, %v1399_v31  ;;  %v1577_v8 = vmul.f32 %v1575_v37, %v1399_v31  ;;  %v1606_v46 = vmul.f32 %v1604_v26, %v1399_v31  ;;  %p2154_p11 = pnand %p2153_p10, %p2147_p3 }
 0x33a   : > { %v1487_v12 = vpop.permute.xlu1 %1486  ;;  %v1499_v60 = vpop.permute.xlu0 %1498 }
 0x33b   : > { %v1521_v30 = vadd.f32 %v1519_v43, %v1515_v58  ;;  %v1550_v49 = vadd.f32 %v1548_v42, %v1544_v63  ;;  %v1579_v22 = vadd.f32 %v1577_v8, %v1573_v23  ;;  %v1608_v0 = vadd.f32 %v1606_v46, %v1602_v2 }
 0x33c   : > { %v1504_v36 = vadd.f32 %v1499_v60, %v1490_v13  ;;  %v1491_v24 = vadd.f32 %v1487_v12, %v3158_v25 }
 0x33e   : > { %v1524_v21 = vmul.f32 %v1523_v52, %v1504_v36  ;;  %v1553_v39 = vmul.f32 %v1552_v34, %v1504_v36  ;;  %v1582_v4 = vmul.f32 %v1581_v14, %v1504_v36  ;;  %v1611_v6 = vmul.f32 %v1610_v19, %v1504_v36  ;;  %v1501_v51 = vpop.permute.xlu1 %1500 }
 0x33f   : > { %v1505_v18 = vadd.f32 %v1501_v51, %v1491_v24 }
 0x340   : > { %v1526_v41 = vadd.f32 %v1524_v21, %v1520_v28  ;;  %v1555_v10 = vadd.f32 %v1553_v39, %v1549_v3  ;;  %v1584_v45 = vadd.f32 %v1582_v4, %v1578_v5  ;;  %v1613_v11 = vadd.f32 %v1611_v6, %v1607_v7 }
 0x341   : > { %v1525_v20 = vmul.f32 %v1523_v52, %v1505_v18  ;;  %v1554_v44 = vmul.f32 %v1552_v34, %v1505_v18  ;;  %v1583_v25 = vmul.f32 %v1581_v14, %v1505_v18  ;;  %v1612_v50 = vmul.f32 %v1610_v19, %v1505_v18 }
 0x342   : > { %v1530_v48 = vadd.f32 %v1529_v9, %v1526_v41  ;;  %v1559_v35 = vadd.f32 %v1558_v40, %v1555_v10  ;;  %v1588_v53 = vadd.f32 %v1587_v16, %v1584_v45  ;;  %v1617_v55 = vadd.f32 %v1616_v32, %v1613_v11 }
 0x343   : > { %v1527_v17 = vadd.f32 %v1525_v20, %v1521_v30  ;;  %v1556_v61 = vadd.f32 %v1554_v44, %v1550_v49  ;;  %v1585_v15 = vadd.f32 %v1583_v25, %v1579_v22  ;;  %v1614_v33 = vadd.f32 %v1612_v50, %v1608_v0 }
 0x344   : > { %1533 = vst.msk [vmem:[%s373_s29] sm:$0xff] %vm1532_vm6, %v1530_v48  ;;  %1886 = vst.msk [vmem:[%s373_s29 + $0x10] sm:$0xff] %vm1532_vm6, %v1559_v35 }
 0x345   : > { %1893 = vst.msk [vmem:[%s373_s29 + $0x20] sm:$0xff] %vm1532_vm6, %v1588_v53  ;;  %1900 = vst.msk [vmem:[%s373_s29 + $0x30] sm:$0xff] %vm1532_vm6, %v1617_v55  ;;  %v1531_v57 = vadd.f32 %v1529_v9, %v1527_v17  ;;  %v1560_v37 = vadd.f32 %v1558_v40, %v1556_v61  ;;  %v1589_v26 = vadd.f32 %v1587_v16, %v1585_v15 }
 0x346   : > { %v1618_v54 = vadd.f32 %v1616_v32, %v1614_v33 }
 0x347   : > { %1534 = vst.msk [vmem:[%s373_s29 + $0x8] sm:$0xff] %vm1532_vm6, %v1531_v57  ;;  %1887 = vst.msk [vmem:[%s373_s29 + $0x18] sm:$0xff] %vm1532_vm6, %v1560_v37 }
 0x348   : > { %1894 = vst.msk [vmem:[%s373_s29 + $0x28] sm:$0xff] %vm1532_vm6, %v1589_v26  ;;  %1901 = vst.msk [vmem:[%s373_s29 + $0x38] sm:$0xff] %vm1532_vm6, %v1618_v54 }
 0x349   : > { %2157 = shalt.err (!%p2154_p11)
}
 0x34a   : > { %s2158_s11 = scalar_lea.hbm %s3204_s17, 1024  ;;  %s2162_s16 = scalar_lea.hbm %s3261_s7, 2048 }
 0x34b   : > { %p2159_p12 = scmp.ne.s32.totalorder %s3204_s17, %s2158_s11  ;;  %p2163_p7 = scmp.lt.u32.totalorder %s3204_s17, %s3261_s7 }
 0x34c   : > { %p2164_p6 = scmp.lt.u32.totalorder %s2162_s16, %s2158_s11  ;;  %p2166_p13 = scmp.lt.u32.totalorder %s2158_s11, %s3204_s17 }
 0x34d   : > { %p2160_p2 = pnand %p2159_p12, %p3291_p0 }
 0x34e   : > { %p2165_p9 = por %p2164_p6, %p2163_p7 }
 0x34f   : > { %p2161_p5 = pneg %p2160_p2 }
 0x350   : > { %p2167_p1 = por %p2166_p13, %p2165_p9 }
 0x352   : > { %p2168_p3 = pnand %p2167_p1, %p2161_p5 }
 0x354   : > { %2171 = shalt.err (!%p2168_p3)
}
 0x355   : > { %s2242_s15 = smov 128   ;;  %s2243_s12 = smov 8  }
 0x356   : > { %1935 = dma.vmem_to_hbm [thread:$0]  (%p3291_p0), %s3206_s21, 1024, %s3204_s17, %s1623_s10, %s2242_s15, %s2242_s15, %s2243_s12  }
 0x357 PF: > { %s1651_s9 = sand.u32 1, %s2214_s24   ;;  %p3292_p4 = scmp.ne.s32.totalorder %s3277_s14, 0 }
 0x358   : > { %p3293_p8 = scmp.ge.s32.totalorder %s2226_s27, 2  ;;  %s1652_s20 = scalar_lea.sflag [#allocation6], %s1651_s9 }
 0x35a   : > { %p1961_p10 = pnand %p3293_p8, %p3292_p4 }
 0x35c   : > { %2209 = dma.done.wait (!%p1961_p10), %s1652_s20, 1024  }
 0x35d   : > { %2211 = vsyncadd (!%p1961_p10), %s1652_s20, 4294966272  ;;  %p24_p11 = scmp.ge.s32.totalorder %s2387_s28, 4   ;;  %s3294_s24 = smov %s2218_s25 }
 0x35e   : > { %s3295_s25 = smov %s2222_s26  ;;  %s3296_s26 = smov %s2398_s30 }
 0x35f   : > { %s3297_s27 = smov %s2387_s28  ;;  %26 = sbr.rel (!%p24_p11) target bundleno = 9 (0x9), region = 127 }
 0x366   :  { %1657 = vsyncpa [#allocation5], 1 }
 0x367   :  { %1659 = vsyncpa [#allocation5 + $0x1], 1 }
 0x368   :  { %1660 = vsyncpa [#allocation6], 1 }
 0x369   :  { %1662 = vsyncpa [#allocation6 + $0x1], 1 }
 0x36a   :  { %1663 = vsyncpa [#allocation7], 1 }
 0x36b   :  { %1665 = vsyncpa [#allocation7 + $0x1], 1 }
 0x36c   :  { %1666 = vsyncpa [#allocation10], 1 }
 0x36d   :  { %1667 = vsyncpa [#allocation13], 1 }
 0x36e   :  { %1668 = vsyncpa [#allocation16], 1 }

</bundles_post_ra>
